<compile_context>
chip_gen: v7x
topology: tpu7x:2x2x1
jax: 0.10.0
libtpu: 0.0.40
codegen_flags: <defaults>
</compile_context>

<pallas_src>
import functools

import jax
import jax.numpy as jnp
from jax.experimental import pallas as pl
from jax.experimental.pallas import tpu as pltpu

BN_EPS = 1e-5


# ----------------------------------------------------------------------------
# Fused BasicBlock kernel (one batch element per grid step, NHWC, C on lanes)
# ----------------------------------------------------------------------------
def _basic_block_kernel(x_ref, w1_ref, b1_ref, w2_ref, b2_ref, *rest,
                        stride, has_proj, H, W, dense_out):
    if has_proj:
        wsc_ref, bsc_ref, o_ref, xp_ref, hp_ref = rest
    else:
        o_ref, xp_ref, hp_ref = rest

    Ho = (H - 1) // stride + 1          # == (H + 2*1 - 3) // stride + 1
    Wo = (W - 1) // stride + 1
    Cin = x_ref.shape[-1]
    C1 = w1_ref.shape[-1]               # planes

    # Stage the input into a zero-padded VMEM scratch: the 3x3 halo is handled
    # on-chip.  Re-zero every grid step so the kernel stays correct under
    # "parallel" megacore partitioning (scratch is per-core, no cross-step state).
    xp_ref[...] = jnp.zeros_like(xp_ref)
    xp_ref[pl.ds(1, H), pl.ds(1, W), :] = x_ref[0]

    def conv3x3(src_ref, w_ref, cin, s):
        # 3x3 conv as 9 tap-wise MXU matmuls; taps are Ref-level (strided)
        # slices of the padded scratch -> no value-level slicing/relayout of
        # the whole padded image.
        acc = jnp.zeros((Ho * Wo, w_ref.shape[-1]), jnp.float32)
        for kh in range(3):
            for kw in range(3):
                if s == 1:
                    p = src_ref[pl.ds(kh, Ho), pl.ds(kw, Wo), :]
                else:
                    p = src_ref[pl.ds(kh, Ho, stride=s), pl.ds(kw, Wo, stride=s), :]
                acc = acc + jnp.dot(p.reshape(Ho * Wo, cin), w_ref[kh, kw],
                                    preferred_element_type=jnp.float32)
        return acc

    # conv1 (3x3, stride=s) + folded BN1 (scale pre-folded into w1) + ReLU.
    h = jnp.maximum(conv3x3(xp_ref, w1_ref, Cin, stride) + b1_ref[...], 0.0)
    # dropout(p=0.0) == Identity.

    # Stage h into a second zero-padded VMEM scratch for conv2 (stride 1).
    hp_ref[...] = jnp.zeros_like(hp_ref)
    hp_ref[pl.ds(1, Ho), pl.ds(1, Wo), :] = h.reshape(Ho, Wo, C1)

    # conv2 (3x3, stride=1) + folded BN2.
    out = conv3x3(hp_ref, w2_ref, C1, 1) + b2_ref[...]

    # Shortcut, fused in-kernel (no extra pallas_call / HBM round trip).
    if stride == 1:
        xs = x_ref[0].reshape(Ho * Wo, Cin)
    else:
        xs = xp_ref[pl.ds(1, Ho, stride=stride),
                    pl.ds(1, Wo, stride=stride), :].reshape(Ho * Wo, Cin)
    if has_proj:    # 1x1 conv (scale folded into wsc) + bias
        out = out + jnp.dot(xs, wsc_ref[...],
                            preferred_element_type=jnp.float32) + bsc_ref[...]
    else:           # identity shortcut (stride == 1, Cin == planes)
        out = out + xs

    out = jnp.maximum(out, 0.0)

    if dense_out:
        # Lane-dense store: last block dim is Wo*C1 (>= 128), so the writeback
        # is unmasked vsts instead of Cout-wide masked partial stores.
        o_ref[0] = out.reshape(Ho, Wo * C1).astype(o_ref.dtype)
    else:
        o_ref[0] = out.reshape(Ho, Wo, C1).astype(o_ref.dtype)


def _basic_block_call(N, H, W, Cin, C1, stride, has_proj, dtype, dense_out):
    Ho = (H - 1) // stride + 1
    Wo = (W - 1) // stride + 1

    in_specs = [
        pl.BlockSpec((1, H, W, Cin), lambda n: (n, 0, 0, 0)),   # x (NHWC)
        pl.BlockSpec((3, 3, Cin, C1), lambda n: (0, 0, 0, 0)),  # w1 (scale folded)
        pl.BlockSpec((1, C1), lambda n: (0, 0)),                # bias1
        pl.BlockSpec((3, 3, C1, C1), lambda n: (0, 0, 0, 0)),   # w2 (scale folded)
        pl.BlockSpec((1, C1), lambda n: (0, 0)),                # bias2
    ]
    if has_proj:
        in_specs += [pl.BlockSpec((Cin, C1), lambda n: (0, 0)),  # w_sc (scale folded)
                     pl.BlockSpec((1, C1), lambda n: (0, 0))]    # bias_sc

    if dense_out:
        out_shape = jax.ShapeDtypeStruct((N, Ho, Wo * C1), dtype)
        out_spec = pl.BlockSpec((1, Ho, Wo * C1), lambda n: (n, 0, 0))
    else:
        out_shape = jax.ShapeDtypeStruct((N, Ho, Wo, C1), dtype)
        out_spec = pl.BlockSpec((1, Ho, Wo, C1), lambda n: (n, 0, 0, 0))

    kernel = functools.partial(_basic_block_kernel, stride=stride,
                               has_proj=has_proj, H=H, W=W, dense_out=dense_out)

    return pl.pallas_call(
        kernel,
        out_shape=out_shape,
        grid=(N,),
        in_specs=in_specs,
        out_specs=out_spec,
        scratch_shapes=[pltpu.VMEM((H + 2, W + 2, Cin), jnp.float32),    # padded x
                        pltpu.VMEM((Ho + 2, Wo + 2, C1), jnp.float32)],  # padded h
        compiler_params=pltpu.CompilerParams(
            dimension_semantics=("parallel",)),   # batch is embarrassingly parallel
    )


def basic_block_forward(x_nchw, params, *, stride=1):
    # NCHW (PyTorch contract) <-> NHWC (TPU-friendly, channels on lanes) glue.
    x = jnp.transpose(x_nchw, (0, 2, 3, 1))
    N, H, W, Cin = x.shape
    C1 = params["w1"].shape[-1]
    has_proj = "w_sc" in params
    Ho = (H - 1) // stride + 1
    Wo = (W - 1) // stride + 1

    # Fold the BN scale into the conv weights (tiny op); kernel adds bias only.
    w1 = params["w1"] * params["scale1"].reshape(1, 1, 1, -1)
    w2 = params["w2"] * params["scale2"].reshape(1, 1, 1, -1)
    args = [x, w1, params["bias1"], w2, params["bias2"]]
    if has_proj:
        args += [params["w_sc"][0, 0] * params["scale_sc"].reshape(1, -1),
                 params["bias_sc"]]

    try:
        out = _basic_block_call(N, H, W, Cin, C1, stride, has_proj, x.dtype,
                                dense_out=True)(*args)
    except Exception:
        # Fallback: lane-sparse (Ho, Wo, Cout) store if the lane-dense relayout
        # does not lower on this toolchain.
        out = _basic_block_call(N, H, W, Cin, C1, stride, has_proj, x.dtype,
                                dense_out=False)(*args)

    out = out.reshape(N, Ho, Wo, C1)          # free (contiguous)
    return jnp.transpose(out, (0, 3, 1, 2))   # back to NCHW


# ----------------------------------------------------------------------------
# Parameters (deterministic init), pure-JAX reference
# ----------------------------------------------------------------------------
def fold_bn(gamma, beta, mean, var):
    scale = gamma / jnp.sqrt(var + BN_EPS)
    bias = beta - mean * scale
    return scale.reshape(1, -1), bias.reshape(1, -1)


def init_basic_block(key, in_planes, planes, stride=1):
    ks = jax.random.split(key, 16)
    p = {}
    p["w1"] = 0.1 * jax.random.normal(ks[0], (3, 3, in_planes, planes), jnp.float32)
    p["w2"] = 0.1 * jax.random.normal(ks[1], (3, 3, planes, planes), jnp.float32)
    g1 = 1.0 + 0.1 * jax.random.normal(ks[2], (planes,), jnp.float32)
    b1 = 0.1 * jax.random.normal(ks[3], (planes,), jnp.float32)
    m1 = 0.1 * jax.random.normal(ks[4], (planes,), jnp.float32)
    v1 = 1.0 + 0.1 * jax.random.uniform(ks[5], (planes,), jnp.float32)
    p["scale1"], p["bias1"] = fold_bn(g1, b1, m1, v1)
    g2 = 1.0 + 0.1 * jax.random.normal(ks[6], (planes,), jnp.float32)
    b2 = 0.1 * jax.random.normal(ks[7], (planes,), jnp.float32)
    m2 = 0.1 * jax.random.normal(ks[8], (planes,), jnp.float32)
    v2 = 1.0 + 0.1 * jax.random.uniform(ks[9], (planes,), jnp.float32)
    p["scale2"], p["bias2"] = fold_bn(g2, b2, m2, v2)
    if stride != 1 or in_planes != planes:
        p["w_sc"] = 0.1 * jax.random.normal(ks[10], (1, 1, in_planes, planes), jnp.float32)
        gs = 1.0 + 0.1 * jax.random.normal(ks[11], (planes,), jnp.float32)
        bs = 0.1 * jax.random.normal(ks[12], (planes,), jnp.float32)
        ms = 0.1 * jax.random.normal(ks[13], (planes,), jnp.float32)
        vs = 1.0 + 0.1 * jax.random.uniform(ks[14], (planes,), jnp.float32)
        p["scale_sc"], p["bias_sc"] = fold_bn(gs, bs, ms, vs)
    return p


def _ref_conv(x_nchw, w_hwio, stride, pad):
    return jax.lax.conv_general_dilated(
        x_nchw, w_hwio, (stride, stride), [(pad, pad), (pad, pad)],
        dimension_numbers=("NCHW", "HWIO", "NCHW"),
        precision=jax.lax.Precision.HIGHEST)


def ref_forward(x_nchw, p, *, stride=1):
    def bn(x, scale, bias):
        return x * scale.reshape(1, -1, 1, 1) + bias.reshape(1, -1, 1, 1)

    h = jax.nn.relu(bn(_ref_conv(x_nchw, p["w1"], stride, 1), p["scale1"], p["bias1"]))
    if "w_sc" in p:
        sc = bn(_ref_conv(x_nchw, p["w_sc"], stride, 0), p["scale_sc"], p["bias_sc"])
    else:
        sc = x_nchw
    out = bn(_ref_conv(h, p["w2"], 1, 1), p["scale2"], p["bias2"]) + sc
    return jax.nn.relu(out)


# ----------------------------------------------------------------------------
if __name__ == "__main__":
    key = jax.random.PRNGKey(0)
    kx1, kp1, kx2, kp2 = jax.random.split(key, 4)

    def check(x, params, stride):
        out = jax.block_until_ready(basic_block_forward(x, params, stride=stride))
        ref = jax.block_until_ready(ref_forward(x, params, stride=stride))
        assert out.shape == ref.shape, (out.shape, ref.shape)
        err = jnp.max(jnp.abs(out - ref))
        # Tighter than the previous 2e-2; margin covers MXU f32-pass accumulation
        # order/rounding differences vs. the XLA HIGHEST-precision reference.
        assert jnp.allclose(out, ref, atol=2e-3, rtol=2e-3), \
            f"mismatch vs reference (max |err| = {err})"

    # Case 1: projection shortcut (in_planes != planes), stride 1.
    N, in_planes, planes, H, W = 2, 4, 8, 16, 16
    x1 = jax.random.normal(kx1, (N, in_planes, H, W), jnp.float32)
    p1 = init_basic_block(kp1, in_planes, planes, stride=1)
    check(x1, p1, stride=1)

    # Case 2: identity shortcut (in_planes == planes), stride 1.
    x2 = jax.random.normal(kx2, (N, planes, H, W), jnp.float32)
    p2 = init_basic_block(kp2, planes, planes, stride=1)
    check(x2, p2, stride=1)

    print("KERNEL_OK")
</pallas_src>

<mosaic_0001>
module attributes {stable_mosaic.version = 11 : i64} {
  func.func @_basic_block_kernel(%arg0: i32, %arg1: memref<1x16x16x4xf32, #tpu.memory_space<vmem>>, %arg2: memref<3x3x4x8xf32, #tpu.memory_space<vmem>>, %arg3: memref<1x8xf32, #tpu.memory_space<vmem>>, %arg4: memref<3x3x8x8xf32, #tpu.memory_space<vmem>>, %arg5: memref<1x8xf32, #tpu.memory_space<vmem>>, %arg6: memref<4x8xf32, #tpu.memory_space<vmem>>, %arg7: memref<1x8xf32, #tpu.memory_space<vmem>>, %arg8: memref<1x16x128xf32, #tpu.memory_space<vmem>>, %arg9: memref<18x18x4xf32, #tpu.memory_space<vmem>>, %arg10: memref<18x18x8xf32, #tpu.memory_space<vmem>>) attributes {dimension_semantics = [#tpu.dimension_semantics<parallel>], iteration_bounds = array<i64: 2>, scalar_prefetch = 0 : i64, scratch_operands = 2 : i64, tpu.core_type = #tpu.core_type<tc>, window_params = [{transform_indices = @transform_0, window_bounds = array<i64: 1, 16, 16, 4>}, {pipeline_mode = #tpu.pipeline_mode<synchronous>, transform_indices = @transform_1, window_bounds = array<i64: 3, 3, 4, 8>}, {pipeline_mode = #tpu.pipeline_mode<synchronous>, transform_indices = @transform_2, window_bounds = array<i64: 1, 8>}, {pipeline_mode = #tpu.pipeline_mode<synchronous>, transform_indices = @transform_3, window_bounds = array<i64: 3, 3, 8, 8>}, {pipeline_mode = #tpu.pipeline_mode<synchronous>, transform_indices = @transform_4, window_bounds = array<i64: 1, 8>}, {pipeline_mode = #tpu.pipeline_mode<synchronous>, transform_indices = @transform_5, window_bounds = array<i64: 4, 8>}, {pipeline_mode = #tpu.pipeline_mode<synchronous>, transform_indices = @transform_6, window_bounds = array<i64: 1, 8>}, {transform_indices = @transform_7, window_bounds = array<i64: 1, 16, 128>}]} {
    %cst = arith.constant 0.000000e+00 : f32
    %0 = vector.broadcast %cst : f32 to vector<18x18x4xf32>
    %c0 = arith.constant 0 : index
    %c0_0 = arith.constant 0 : index
    %c0_1 = arith.constant 0 : index
    %1 = vector.load %arg9[%c0, %c0_0, %c0_1] : memref<18x18x4xf32, #tpu.memory_space<vmem>>, vector<18x18x4xf32>
    tpu.vector_store %arg9[%c0, %c0_0, %c0_1], %0 {strides = array<i32>} : memref<18x18x4xf32, #tpu.memory_space<vmem>>, vector<18x18x4xf32>,
    %c0_2 = arith.constant 0 : index
    %c0_3 = arith.constant 0 : index
    %c0_4 = arith.constant 0 : index
    %c0_5 = arith.constant 0 : index
    %2 = vector.load %arg1[%c0_2, %c0_3, %c0_4, %c0_5] : memref<1x16x16x4xf32, #tpu.memory_space<vmem>>, vector<1x16x16x4xf32>
    %3 = vector.shape_cast %2 : vector<1x16x16x4xf32> to vector<16x16x4xf32>
    %c1 = arith.constant 1 : index
    %c1_6 = arith.constant 1 : index
    %c0_7 = arith.constant 0 : index
    %4 = vector.load %arg9[%c1, %c1_6, %c0_7] : memref<18x18x4xf32, #tpu.memory_space<vmem>>, vector<16x16x4xf32>
    tpu.vector_store %arg9[%c1, %c1_6, %c0_7], %3 {strides = array<i32>} : memref<18x18x4xf32, #tpu.memory_space<vmem>>, vector<16x16x4xf32>,
    %cst_8 = arith.constant 0.000000e+00 : f32
    %5 = vector.broadcast %cst_8 : f32 to vector<256x8xf32>
    %c0_9 = arith.constant 0 : index
    %c0_10 = arith.constant 0 : index
    %c0_11 = arith.constant 0 : index
    %6 = vector.load %arg9[%c0_9, %c0_10, %c0_11] : memref<18x18x4xf32, #tpu.memory_space<vmem>>, vector<16x16x4xf32>
    %7 = vector.shape_cast %6 : vector<16x16x4xf32> to vector<256x4xf32>
    %c0_12 = arith.constant 0 : index
    %c0_13 = arith.constant 0 : index
    %c0_14 = arith.constant 0 : index
    %c0_15 = arith.constant 0 : index
    %8 = vector.load %arg2[%c0_12, %c0_13, %c0_14, %c0_15] : memref<3x3x4x8xf32, #tpu.memory_space<vmem>>, vector<1x1x4x8xf32>
    %9 = vector.shape_cast %8 : vector<1x1x4x8xf32> to vector<4x8xf32>
    %cst_16 = arith.constant dense<0.000000e+00> : vector<256x8xf32>
    %10 = tpu.matmul %7, %9, %cst_16 {dimension_numbers = #tpu.dot_dimension_numbers<[1], [0], [0], [1], [0, 0, 1, 1], [], []>} : vector<256x4xf32>, vector<4x8xf32>, vector<256x8xf32> -> vector<256x8xf32>
    %11 = arith.addf %5, %10 : vector<256x8xf32>
    %c0_17 = arith.constant 0 : index
    %c1_18 = arith.constant 1 : index
    %c0_19 = arith.constant 0 : index
    %12 = vector.load %arg9[%c0_17, %c1_18, %c0_19] : memref<18x18x4xf32, #tpu.memory_space<vmem>>, vector<16x16x4xf32>
    %13 = vector.shape_cast %12 : vector<16x16x4xf32> to vector<256x4xf32>
    %c0_20 = arith.constant 0 : index
    %c1_21 = arith.constant 1 : index
    %c0_22 = arith.constant 0 : index
    %c0_23 = arith.constant 0 : index
    %14 = vector.load %arg2[%c0_20, %c1_21, %c0_22, %c0_23] : memref<3x3x4x8xf32, #tpu.memory_space<vmem>>, vector<1x1x4x8xf32>
    %15 = vector.shape_cast %14 : vector<1x1x4x8xf32> to vector<4x8xf32>
    %cst_24 = arith.constant dense<0.000000e+00> : vector<256x8xf32>
    %16 = tpu.matmul %13, %15, %cst_24 {dimension_numbers = #tpu.dot_dimension_numbers<[1], [0], [0], [1], [0, 0, 1, 1], [], []>} : vector<256x4xf32>, vector<4x8xf32>, vector<256x8xf32> -> vector<256x8xf32>
    %17 = arith.addf %11, %16 : vector<256x8xf32>
    %c0_25 = arith.constant 0 : index
    %c2 = arith.constant 2 : index
    %c0_26 = arith.constant 0 : index
    %18 = vector.load %arg9[%c0_25, %c2, %c0_26] : memref<18x18x4xf32, #tpu.memory_space<vmem>>, vector<16x16x4xf32>
    %19 = vector.shape_cast %18 : vector<16x16x4xf32> to vector<256x4xf32>
    %c0_27 = arith.constant 0 : index
    %c2_28 = arith.constant 2 : index
    %c0_29 = arith.constant 0 : index
    %c0_30 = arith.constant 0 : index
    %20 = vector.load %arg2[%c0_27, %c2_28, %c0_29, %c0_30] : memref<3x3x4x8xf32, #tpu.memory_space<vmem>>, vector<1x1x4x8xf32>
    %21 = vector.shape_cast %20 : vector<1x1x4x8xf32> to vector<4x8xf32>
    %cst_31 = arith.constant dense<0.000000e+00> : vector<256x8xf32>
    %22 = tpu.matmul %19, %21, %cst_31 {dimension_numbers = #tpu.dot_dimension_numbers<[1], [0], [0], [1], [0, 0, 1, 1], [], []>} : vector<256x4xf32>, vector<4x8xf32>, vector<256x8xf32> -> vector<256x8xf32>
    %23 = arith.addf %17, %22 : vector<256x8xf32>
    %c1_32 = arith.constant 1 : index
    %c0_33 = arith.constant 0 : index
    %c0_34 = arith.constant 0 : index
    %24 = vector.load %arg9[%c1_32, %c0_33, %c0_34] : memref<18x18x4xf32, #tpu.memory_space<vmem>>, vector<16x16x4xf32>
    %25 = vector.shape_cast %24 : vector<16x16x4xf32> to vector<256x4xf32>
    %c1_35 = arith.constant 1 : index
    %c0_36 = arith.constant 0 : index
    %c0_37 = arith.constant 0 : index
    %c0_38 = arith.constant 0 : index
    %26 = vector.load %arg2[%c1_35, %c0_36, %c0_37, %c0_38] : memref<3x3x4x8xf32, #tpu.memory_space<vmem>>, vector<1x1x4x8xf32>
    %27 = vector.shape_cast %26 : vector<1x1x4x8xf32> to vector<4x8xf32>
    %cst_39 = arith.constant dense<0.000000e+00> : vector<256x8xf32>
    %28 = tpu.matmul %25, %27, %cst_39 {dimension_numbers = #tpu.dot_dimension_numbers<[1], [0], [0], [1], [0, 0, 1, 1], [], []>} : vector<256x4xf32>, vector<4x8xf32>, vector<256x8xf32> -> vector<256x8xf32>
    %29 = arith.addf %23, %28 : vector<256x8xf32>
    %c1_40 = arith.constant 1 : index
    %c1_41 = arith.constant 1 : index
    %c0_42 = arith.constant 0 : index
    %30 = vector.load %arg9[%c1_40, %c1_41, %c0_42] : memref<18x18x4xf32, #tpu.memory_space<vmem>>, vector<16x16x4xf32>
    %31 = vector.shape_cast %30 : vector<16x16x4xf32> to vector<256x4xf32>
    %c1_43 = arith.constant 1 : index
    %c1_44 = arith.constant 1 : index
    %c0_45 = arith.constant 0 : index
    %c0_46 = arith.constant 0 : index
    %32 = vector.load %arg2[%c1_43, %c1_44, %c0_45, %c0_46] : memref<3x3x4x8xf32, #tpu.memory_space<vmem>>, vector<1x1x4x8xf32>
    %33 = vector.shape_cast %32 : vector<1x1x4x8xf32> to vector<4x8xf32>
    %cst_47 = arith.constant dense<0.000000e+00> : vector<256x8xf32>
    %34 = tpu.matmul %31, %33, %cst_47 {dimension_numbers = #tpu.dot_dimension_numbers<[1], [0], [0], [1], [0, 0, 1, 1], [], []>} : vector<256x4xf32>, vector<4x8xf32>, vector<256x8xf32> -> vector<256x8xf32>
    %35 = arith.addf %29, %34 : vector<256x8xf32>
    %c1_48 = arith.constant 1 : index
    %c2_49 = arith.constant 2 : index
    %c0_50 = arith.constant 0 : index
    %36 = vector.load %arg9[%c1_48, %c2_49, %c0_50] : memref<18x18x4xf32, #tpu.memory_space<vmem>>, vector<16x16x4xf32>
    %37 = vector.shape_cast %36 : vector<16x16x4xf32> to vector<256x4xf32>
    %c1_51 = arith.constant 1 : index
    %c2_52 = arith.constant 2 : index
    %c0_53 = arith.constant 0 : index
    %c0_54 = arith.constant 0 : index
    %38 = vector.load %arg2[%c1_51, %c2_52, %c0_53, %c0_54] : memref<3x3x4x8xf32, #tpu.memory_space<vmem>>, vector<1x1x4x8xf32>
    %39 = vector.shape_cast %38 : vector<1x1x4x8xf32> to vector<4x8xf32>
    %cst_55 = arith.constant dense<0.000000e+00> : vector<256x8xf32>
    %40 = tpu.matmul %37, %39, %cst_55 {dimension_numbers = #tpu.dot_dimension_numbers<[1], [0], [0], [1], [0, 0, 1, 1], [], []>} : vector<256x4xf32>, vector<4x8xf32>, vector<256x8xf32> -> vector<256x8xf32>
    %41 = arith.addf %35, %40 : vector<256x8xf32>
    %c2_56 = arith.constant 2 : index
    %c0_57 = arith.constant 0 : index
    %c0_58 = arith.constant 0 : index
    %42 = vector.load %arg9[%c2_56, %c0_57, %c0_58] : memref<18x18x4xf32, #tpu.memory_space<vmem>>, vector<16x16x4xf32>
    %43 = vector.shape_cast %42 : vector<16x16x4xf32> to vector<256x4xf32>
    %c2_59 = arith.constant 2 : index
    %c0_60 = arith.constant 0 : index
    %c0_61 = arith.constant 0 : index
    %c0_62 = arith.constant 0 : index
    %44 = vector.load %arg2[%c2_59, %c0_60, %c0_61, %c0_62] : memref<3x3x4x8xf32, #tpu.memory_space<vmem>>, vector<1x1x4x8xf32>
    %45 = vector.shape_cast %44 : vector<1x1x4x8xf32> to vector<4x8xf32>
    %cst_63 = arith.constant dense<0.000000e+00> : vector<256x8xf32>
    %46 = tpu.matmul %43, %45, %cst_63 {dimension_numbers = #tpu.dot_dimension_numbers<[1], [0], [0], [1], [0, 0, 1, 1], [], []>} : vector<256x4xf32>, vector<4x8xf32>, vector<256x8xf32> -> vector<256x8xf32>
    %47 = arith.addf %41, %46 : vector<256x8xf32>
    %c2_64 = arith.constant 2 : index
    %c1_65 = arith.constant 1 : index
    %c0_66 = arith.constant 0 : index
    %48 = vector.load %arg9[%c2_64, %c1_65, %c0_66] : memref<18x18x4xf32, #tpu.memory_space<vmem>>, vector<16x16x4xf32>
    %49 = vector.shape_cast %48 : vector<16x16x4xf32> to vector<256x4xf32>
    %c2_67 = arith.constant 2 : index
    %c1_68 = arith.constant 1 : index
    %c0_69 = arith.constant 0 : index
    %c0_70 = arith.constant 0 : index
    %50 = vector.load %arg2[%c2_67, %c1_68, %c0_69, %c0_70] : memref<3x3x4x8xf32, #tpu.memory_space<vmem>>, vector<1x1x4x8xf32>
    %51 = vector.shape_cast %50 : vector<1x1x4x8xf32> to vector<4x8xf32>
    %cst_71 = arith.constant dense<0.000000e+00> : vector<256x8xf32>
    %52 = tpu.matmul %49, %51, %cst_71 {dimension_numbers = #tpu.dot_dimension_numbers<[1], [0], [0], [1], [0, 0, 1, 1], [], []>} : vector<256x4xf32>, vector<4x8xf32>, vector<256x8xf32> -> vector<256x8xf32>
    %53 = arith.addf %47, %52 : vector<256x8xf32>
    %c2_72 = arith.constant 2 : index
    %c2_73 = arith.constant 2 : index
    %c0_74 = arith.constant 0 : index
    %54 = vector.load %arg9[%c2_72, %c2_73, %c0_74] : memref<18x18x4xf32, #tpu.memory_space<vmem>>, vector<16x16x4xf32>
    %55 = vector.shape_cast %54 : vector<16x16x4xf32> to vector<256x4xf32>
    %c2_75 = arith.constant 2 : index
    %c2_76 = arith.constant 2 : index
    %c0_77 = arith.constant 0 : index
    %c0_78 = arith.constant 0 : index
    %56 = vector.load %arg2[%c2_75, %c2_76, %c0_77, %c0_78] : memref<3x3x4x8xf32, #tpu.memory_space<vmem>>, vector<1x1x4x8xf32>
    %57 = vector.shape_cast %56 : vector<1x1x4x8xf32> to vector<4x8xf32>
    %cst_79 = arith.constant dense<0.000000e+00> : vector<256x8xf32>
    %58 = tpu.matmul %55, %57, %cst_79 {dimension_numbers = #tpu.dot_dimension_numbers<[1], [0], [0], [1], [0, 0, 1, 1], [], []>} : vector<256x4xf32>, vector<4x8xf32>, vector<256x8xf32> -> vector<256x8xf32>
    %59 = arith.addf %53, %58 : vector<256x8xf32>
    %c0_80 = arith.constant 0 : index
    %c0_81 = arith.constant 0 : index
    %60 = vector.load %arg3[%c0_80, %c0_81] : memref<1x8xf32, #tpu.memory_space<vmem>>, vector<1x8xf32>
    %61 = vector.broadcast %60 : vector<1x8xf32> to vector<256x8xf32>
    %62 = arith.addf %59, %61 : vector<256x8xf32>
    %cst_82 = arith.constant 0.000000e+00 : f32
    %63 = vector.broadcast %cst_82 : f32 to vector<256x8xf32>
    %64 = arith.maximumf %62, %63 : vector<256x8xf32>
    %cst_83 = arith.constant 0.000000e+00 : f32
    %65 = vector.broadcast %cst_83 : f32 to vector<18x18x8xf32>
    %c0_84 = arith.constant 0 : index
    %c0_85 = arith.constant 0 : index
    %c0_86 = arith.constant 0 : index
    %66 = vector.load %arg10[%c0_84, %c0_85, %c0_86] : memref<18x18x8xf32, #tpu.memory_space<vmem>>, vector<18x18x8xf32>
    tpu.vector_store %arg10[%c0_84, %c0_85, %c0_86], %65 {strides = array<i32>} : memref<18x18x8xf32, #tpu.memory_space<vmem>>, vector<18x18x8xf32>,
    %67 = vector.shape_cast %64 : vector<256x8xf32> to vector<16x16x8xf32>
    %c1_87 = arith.constant 1 : index
    %c1_88 = arith.constant 1 : index
    %c0_89 = arith.constant 0 : index
    %68 = vector.load %arg10[%c1_87, %c1_88, %c0_89] : memref<18x18x8xf32, #tpu.memory_space<vmem>>, vector<16x16x8xf32>
    tpu.vector_store %arg10[%c1_87, %c1_88, %c0_89], %67 {strides = array<i32>} : memref<18x18x8xf32, #tpu.memory_space<vmem>>, vector<16x16x8xf32>,
    %cst_90 = arith.constant 0.000000e+00 : f32
    %69 = vector.broadcast %cst_90 : f32 to vector<256x8xf32>
    %c0_91 = arith.constant 0 : index
    %c0_92 = arith.constant 0 : index
    %c0_93 = arith.constant 0 : index
    %70 = vector.load %arg10[%c0_91, %c0_92, %c0_93] : memref<18x18x8xf32, #tpu.memory_space<vmem>>, vector<16x16x8xf32>
    %71 = vector.shape_cast %70 : vector<16x16x8xf32> to vector<256x8xf32>
    %c0_94 = arith.constant 0 : index
    %c0_95 = arith.constant 0 : index
    %c0_96 = arith.constant 0 : index
    %c0_97 = arith.constant 0 : index
    %72 = vector.load %arg4[%c0_94, %c0_95, %c0_96, %c0_97] : memref<3x3x8x8xf32, #tpu.memory_space<vmem>>, vector<1x1x8x8xf32>
    %73 = vector.shape_cast %72 : vector<1x1x8x8xf32> to vector<8x8xf32>
    %cst_98 = arith.constant dense<0.000000e+00> : vector<256x8xf32>
    %74 = tpu.matmul %71, %73, %cst_98 {dimension_numbers = #tpu.dot_dimension_numbers<[1], [0], [0], [1], [0, 0, 1, 1], [], []>} : vector<256x8xf32>, vector<8x8xf32>, vector<256x8xf32> -> vector<256x8xf32>
    %75 = arith.addf %69, %74 : vector<256x8xf32>
    %c0_99 = arith.constant 0 : index
    %c1_100 = arith.constant 1 : index
    %c0_101 = arith.constant 0 : index
    %76 = vector.load %arg10[%c0_99, %c1_100, %c0_101] : memref<18x18x8xf32, #tpu.memory_space<vmem>>, vector<16x16x8xf32>
    %77 = vector.shape_cast %76 : vector<16x16x8xf32> to vector<256x8xf32>
    %c0_102 = arith.constant 0 : index
    %c1_103 = arith.constant 1 : index
    %c0_104 = arith.constant 0 : index
    %c0_105 = arith.constant 0 : index
    %78 = vector.load %arg4[%c0_102, %c1_103, %c0_104, %c0_105] : memref<3x3x8x8xf32, #tpu.memory_space<vmem>>, vector<1x1x8x8xf32>
    %79 = vector.shape_cast %78 : vector<1x1x8x8xf32> to vector<8x8xf32>
    %cst_106 = arith.constant dense<0.000000e+00> : vector<256x8xf32>
    %80 = tpu.matmul %77, %79, %cst_106 {dimension_numbers = #tpu.dot_dimension_numbers<[1], [0], [0], [1], [0, 0, 1, 1], [], []>} : vector<256x8xf32>, vector<8x8xf32>, vector<256x8xf32> -> vector<256x8xf32>
    %81 = arith.addf %75, %80 : vector<256x8xf32>
    %c0_107 = arith.constant 0 : index
    %c2_108 = arith.constant 2 : index
    %c0_109 = arith.constant 0 : index
    %82 = vector.load %arg10[%c0_107, %c2_108, %c0_109] : memref<18x18x8xf32, #tpu.memory_space<vmem>>, vector<16x16x8xf32>
    %83 = vector.shape_cast %82 : vector<16x16x8xf32> to vector<256x8xf32>
    %c0_110 = arith.constant 0 : index
    %c2_111 = arith.constant 2 : index
    %c0_112 = arith.constant 0 : index
    %c0_113 = arith.constant 0 : index
    %84 = vector.load %arg4[%c0_110, %c2_111, %c0_112, %c0_113] : memref<3x3x8x8xf32, #tpu.memory_space<vmem>>, vector<1x1x8x8xf32>
    %85 = vector.shape_cast %84 : vector<1x1x8x8xf32> to vector<8x8xf32>
    %cst_114 = arith.constant dense<0.000000e+00> : vector<256x8xf32>
    %86 = tpu.matmul %83, %85, %cst_114 {dimension_numbers = #tpu.dot_dimension_numbers<[1], [0], [0], [1], [0, 0, 1, 1], [], []>} : vector<256x8xf32>, vector<8x8xf32>, vector<256x8xf32> -> vector<256x8xf32>
    %87 = arith.addf %81, %86 : vector<256x8xf32>
    %c1_115 = arith.constant 1 : index
    %c0_116 = arith.constant 0 : index
    %c0_117 = arith.constant 0 : index
    %88 = vector.load %arg10[%c1_115, %c0_116, %c0_117] : memref<18x18x8xf32, #tpu.memory_space<vmem>>, vector<16x16x8xf32>
    %89 = vector.shape_cast %88 : vector<16x16x8xf32> to vector<256x8xf32>
    %c1_118 = arith.constant 1 : index
    %c0_119 = arith.constant 0 : index
    %c0_120 = arith.constant 0 : index
    %c0_121 = arith.constant 0 : index
    %90 = vector.load %arg4[%c1_118, %c0_119, %c0_120, %c0_121] : memref<3x3x8x8xf32, #tpu.memory_space<vmem>>, vector<1x1x8x8xf32>
    %91 = vector.shape_cast %90 : vector<1x1x8x8xf32> to vector<8x8xf32>
    %cst_122 = arith.constant dense<0.000000e+00> : vector<256x8xf32>
    %92 = tpu.matmul %89, %91, %cst_122 {dimension_numbers = #tpu.dot_dimension_numbers<[1], [0], [0], [1], [0, 0, 1, 1], [], []>} : vector<256x8xf32>, vector<8x8xf32>, vector<256x8xf32> -> vector<256x8xf32>
    %93 = arith.addf %87, %92 : vector<256x8xf32>
    %c1_123 = arith.constant 1 : index
    %c1_124 = arith.constant 1 : index
    %c0_125 = arith.constant 0 : index
    %94 = vector.load %arg10[%c1_123, %c1_124, %c0_125] : memref<18x18x8xf32, #tpu.memory_space<vmem>>, vector<16x16x8xf32>
    %95 = vector.shape_cast %94 : vector<16x16x8xf32> to vector<256x8xf32>
    %c1_126 = arith.constant 1 : index
    %c1_127 = arith.constant 1 : index
    %c0_128 = arith.constant 0 : index
    %c0_129 = arith.constant 0 : index
    %96 = vector.load %arg4[%c1_126, %c1_127, %c0_128, %c0_129] : memref<3x3x8x8xf32, #tpu.memory_space<vmem>>, vector<1x1x8x8xf32>
    %97 = vector.shape_cast %96 : vector<1x1x8x8xf32> to vector<8x8xf32>
    %cst_130 = arith.constant dense<0.000000e+00> : vector<256x8xf32>
    %98 = tpu.matmul %95, %97, %cst_130 {dimension_numbers = #tpu.dot_dimension_numbers<[1], [0], [0], [1], [0, 0, 1, 1], [], []>} : vector<256x8xf32>, vector<8x8xf32>, vector<256x8xf32> -> vector<256x8xf32>
    %99 = arith.addf %93, %98 : vector<256x8xf32>
    %c1_131 = arith.constant 1 : index
    %c2_132 = arith.constant 2 : index
    %c0_133 = arith.constant 0 : index
    %100 = vector.load %arg10[%c1_131, %c2_132, %c0_133] : memref<18x18x8xf32, #tpu.memory_space<vmem>>, vector<16x16x8xf32>
    %101 = vector.shape_cast %100 : vector<16x16x8xf32> to vector<256x8xf32>
    %c1_134 = arith.constant 1 : index
    %c2_135 = arith.constant 2 : index
    %c0_136 = arith.constant 0 : index
    %c0_137 = arith.constant 0 : index
    %102 = vector.load %arg4[%c1_134, %c2_135, %c0_136, %c0_137] : memref<3x3x8x8xf32, #tpu.memory_space<vmem>>, vector<1x1x8x8xf32>
    %103 = vector.shape_cast %102 : vector<1x1x8x8xf32> to vector<8x8xf32>
    %cst_138 = arith.constant dense<0.000000e+00> : vector<256x8xf32>
    %104 = tpu.matmul %101, %103, %cst_138 {dimension_numbers = #tpu.dot_dimension_numbers<[1], [0], [0], [1], [0, 0, 1, 1], [], []>} : vector<256x8xf32>, vector<8x8xf32>, vector<256x8xf32> -> vector<256x8xf32>
    %105 = arith.addf %99, %104 : vector<256x8xf32>
    %c2_139 = arith.constant 2 : index
    %c0_140 = arith.constant 0 : index
    %c0_141 = arith.constant 0 : index
    %106 = vector.load %arg10[%c2_139, %c0_140, %c0_141] : memref<18x18x8xf32, #tpu.memory_space<vmem>>, vector<16x16x8xf32>
    %107 = vector.shape_cast %106 : vector<16x16x8xf32> to vector<256x8xf32>
    %c2_142 = arith.constant 2 : index
    %c0_143 = arith.constant 0 : index
    %c0_144 = arith.constant 0 : index
    %c0_145 = arith.constant 0 : index
    %108 = vector.load %arg4[%c2_142, %c0_143, %c0_144, %c0_145] : memref<3x3x8x8xf32, #tpu.memory_space<vmem>>, vector<1x1x8x8xf32>
    %109 = vector.shape_cast %108 : vector<1x1x8x8xf32> to vector<8x8xf32>
    %cst_146 = arith.constant dense<0.000000e+00> : vector<256x8xf32>
    %110 = tpu.matmul %107, %109, %cst_146 {dimension_numbers = #tpu.dot_dimension_numbers<[1], [0], [0], [1], [0, 0, 1, 1], [], []>} : vector<256x8xf32>, vector<8x8xf32>, vector<256x8xf32> -> vector<256x8xf32>
    %111 = arith.addf %105, %110 : vector<256x8xf32>
    %c2_147 = arith.constant 2 : index
    %c1_148 = arith.constant 1 : index
    %c0_149 = arith.constant 0 : index
    %112 = vector.load %arg10[%c2_147, %c1_148, %c0_149] : memref<18x18x8xf32, #tpu.memory_space<vmem>>, vector<16x16x8xf32>
    %113 = vector.shape_cast %112 : vector<16x16x8xf32> to vector<256x8xf32>
    %c2_150 = arith.constant 2 : index
    %c1_151 = arith.constant 1 : index
    %c0_152 = arith.constant 0 : index
    %c0_153 = arith.constant 0 : index
    %114 = vector.load %arg4[%c2_150, %c1_151, %c0_152, %c0_153] : memref<3x3x8x8xf32, #tpu.memory_space<vmem>>, vector<1x1x8x8xf32>
    %115 = vector.shape_cast %114 : vector<1x1x8x8xf32> to vector<8x8xf32>
    %cst_154 = arith.constant dense<0.000000e+00> : vector<256x8xf32>
    %116 = tpu.matmul %113, %115, %cst_154 {dimension_numbers = #tpu.dot_dimension_numbers<[1], [0], [0], [1], [0, 0, 1, 1], [], []>} : vector<256x8xf32>, vector<8x8xf32>, vector<256x8xf32> -> vector<256x8xf32>
    %117 = arith.addf %111, %116 : vector<256x8xf32>
    %c2_155 = arith.constant 2 : index
    %c2_156 = arith.constant 2 : index
    %c0_157 = arith.constant 0 : index
    %118 = vector.load %arg10[%c2_155, %c2_156, %c0_157] : memref<18x18x8xf32, #tpu.memory_space<vmem>>, vector<16x16x8xf32>
    %119 = vector.shape_cast %118 : vector<16x16x8xf32> to vector<256x8xf32>
    %c2_158 = arith.constant 2 : index
    %c2_159 = arith.constant 2 : index
    %c0_160 = arith.constant 0 : index
    %c0_161 = arith.constant 0 : index
    %120 = vector.load %arg4[%c2_158, %c2_159, %c0_160, %c0_161] : memref<3x3x8x8xf32, #tpu.memory_space<vmem>>, vector<1x1x8x8xf32>
    %121 = vector.shape_cast %120 : vector<1x1x8x8xf32> to vector<8x8xf32>
    %cst_162 = arith.constant dense<0.000000e+00> : vector<256x8xf32>
    %122 = tpu.matmul %119, %121, %cst_162 {dimension_numbers = #tpu.dot_dimension_numbers<[1], [0], [0], [1], [0, 0, 1, 1], [], []>} : vector<256x8xf32>, vector<8x8xf32>, vector<256x8xf32> -> vector<256x8xf32>
    %123 = arith.addf %117, %122 : vector<256x8xf32>
    %c0_163 = arith.constant 0 : index
    %c0_164 = arith.constant 0 : index
    %124 = vector.load %arg5[%c0_163, %c0_164] : memref<1x8xf32, #tpu.memory_space<vmem>>, vector<1x8xf32>
    %125 = vector.broadcast %124 : vector<1x8xf32> to vector<256x8xf32>
    %126 = arith.addf %123, %125 : vector<256x8xf32>
    %c0_165 = arith.constant 0 : index
    %c0_166 = arith.constant 0 : index
    %c0_167 = arith.constant 0 : index
    %c0_168 = arith.constant 0 : index
    %127 = vector.load %arg1[%c0_165, %c0_166, %c0_167, %c0_168] : memref<1x16x16x4xf32, #tpu.memory_space<vmem>>, vector<1x16x16x4xf32>
    %128 = vector.shape_cast %127 : vector<1x16x16x4xf32> to vector<16x16x4xf32>
    %129 = vector.shape_cast %128 : vector<16x16x4xf32> to vector<256x4xf32>
    %c0_169 = arith.constant 0 : index
    %c0_170 = arith.constant 0 : index
    %130 = vector.load %arg6[%c0_169, %c0_170] : memref<4x8xf32, #tpu.memory_space<vmem>>, vector<4x8xf32>
    %cst_171 = arith.constant dense<0.000000e+00> : vector<256x8xf32>
    %131 = tpu.matmul %129, %130, %cst_171 {dimension_numbers = #tpu.dot_dimension_numbers<[1], [0], [0], [1], [0, 0, 1, 1], [], []>} : vector<256x4xf32>, vector<4x8xf32>, vector<256x8xf32> -> vector<256x8xf32>
    %132 = arith.addf %126, %131 : vector<256x8xf32>
    %c0_172 = arith.constant 0 : index
    %c0_173 = arith.constant 0 : index
    %133 = vector.load %arg7[%c0_172, %c0_173] : memref<1x8xf32, #tpu.memory_space<vmem>>, vector<1x8xf32>
    %134 = vector.broadcast %133 : vector<1x8xf32> to vector<256x8xf32>
    %135 = arith.addf %132, %134 : vector<256x8xf32>
    %cst_174 = arith.constant 0.000000e+00 : f32
    %136 = vector.broadcast %cst_174 : f32 to vector<256x8xf32>
    %137 = arith.maximumf %135, %136 : vector<256x8xf32>
    %138 = vector.shape_cast %137 : vector<256x8xf32> to vector<16x128xf32>
    %c0_175 = arith.constant 0 : index
    %c0_176 = arith.constant 0 : index
    %c0_177 = arith.constant 0 : index
    %139 = vector.load %arg8[%c0_175, %c0_176, %c0_177] : memref<1x16x128xf32, #tpu.memory_space<vmem>>, vector<1x16x128xf32>
    %140 = vector.shape_cast %139 : vector<1x16x128xf32> to vector<16x128xf32>
    %141 = vector.shape_cast %138 : vector<16x128xf32> to vector<1x16x128xf32>
    tpu.vector_store %arg8[%c0_175, %c0_176, %c0_177], %141 {strides = array<i32>} : memref<1x16x128xf32, #tpu.memory_space<vmem>>, vector<1x16x128xf32>,
    return
  }
  func.func @transform_0(%arg0: i32) -> (i32, i32, i32, i32) {
    %c0_i32 = arith.constant 0 : i32
    %c0_i32_0 = arith.constant 0 : i32
    %c0_i32_1 = arith.constant 0 : i32
    %c0_i32_2 = arith.constant 0 : i32
    return %arg0, %c0_i32, %c0_i32_0, %c0_i32_1 : i32, i32, i32, i32
  }
  func.func @transform_1(%arg0: i32) -> (i32, i32, i32, i32) {
    %c0_i32 = arith.constant 0 : i32
    %c0_i32_0 = arith.constant 0 : i32
    %c0_i32_1 = arith.constant 0 : i32
    %c0_i32_2 = arith.constant 0 : i32
    %c0_i32_3 = arith.constant 0 : i32
    return %c0_i32, %c0_i32_0, %c0_i32_1, %c0_i32_2 : i32, i32, i32, i32
  }
  func.func @transform_2(%arg0: i32) -> (i32, i32) {
    %c0_i32 = arith.constant 0 : i32
    %c0_i32_0 = arith.constant 0 : i32
    %c0_i32_1 = arith.constant 0 : i32
    return %c0_i32, %c0_i32_0 : i32, i32
  }
  func.func @transform_3(%arg0: i32) -> (i32, i32, i32, i32) {
    %c0_i32 = arith.constant 0 : i32
    %c0_i32_0 = arith.constant 0 : i32
    %c0_i32_1 = arith.constant 0 : i32
    %c0_i32_2 = arith.constant 0 : i32
    %c0_i32_3 = arith.constant 0 : i32
    return %c0_i32, %c0_i32_0, %c0_i32_1, %c0_i32_2 : i32, i32, i32, i32
  }
  func.func @transform_4(%arg0: i32) -> (i32, i32) {
    %c0_i32 = arith.constant 0 : i32
    %c0_i32_0 = arith.constant 0 : i32
    %c0_i32_1 = arith.constant 0 : i32
    return %c0_i32, %c0_i32_0 : i32, i32
  }
  func.func @transform_5(%arg0: i32) -> (i32, i32) {
    %c0_i32 = arith.constant 0 : i32
    %c0_i32_0 = arith.constant 0 : i32
    %c0_i32_1 = arith.constant 0 : i32
    return %c0_i32, %c0_i32_0 : i32, i32
  }
  func.func @transform_6(%arg0: i32) -> (i32, i32) {
    %c0_i32 = arith.constant 0 : i32
    %c0_i32_0 = arith.constant 0 : i32
    %c0_i32_1 = arith.constant 0 : i32
    return %c0_i32, %c0_i32_0 : i32, i32
  }
  func.func @transform_7(%arg0: i32) -> (i32, i32, i32) {
    %c0_i32 = arith.constant 0 : i32
    %c0_i32_0 = arith.constant 0 : i32
    %c0_i32_1 = arith.constant 0 : i32
    return %arg0, %c0_i32, %c0_i32_0 : i32, i32, i32
  }
}

module attributes {stable_mosaic.version = 11 : i64} {
  func.func @_basic_block_kernel(%arg0: i32, %arg1: memref<1x16x16x4xf32, #tpu.memory_space<vmem>>, %arg2: memref<3x3x4x8xf32, #tpu.memory_space<vmem>>, %arg3: memref<1x8xf32, #tpu.memory_space<vmem>>, %arg4: memref<3x3x8x8xf32, #tpu.memory_space<vmem>>, %arg5: memref<1x8xf32, #tpu.memory_space<vmem>>, %arg6: memref<4x8xf32, #tpu.memory_space<vmem>>, %arg7: memref<1x8xf32, #tpu.memory_space<vmem>>, %arg8: memref<1x16x16x8xf32, #tpu.memory_space<vmem>>, %arg9: memref<18x18x4xf32, #tpu.memory_space<vmem>>, %arg10: memref<18x18x8xf32, #tpu.memory_space<vmem>>) attributes {dimension_semantics = [#tpu.dimension_semantics<parallel>], iteration_bounds = array<i64: 2>, scalar_prefetch = 0 : i64, scratch_operands = 2 : i64, tpu.core_type = #tpu.core_type<tc>, window_params = [{transform_indices = @transform_0, window_bounds = array<i64: 1, 16, 16, 4>}, {pipeline_mode = #tpu.pipeline_mode<synchronous>, transform_indices = @transform_1, window_bounds = array<i64: 3, 3, 4, 8>}, {pipeline_mode = #tpu.pipeline_mode<synchronous>, transform_indices = @transform_2, window_bounds = array<i64: 1, 8>}, {pipeline_mode = #tpu.pipeline_mode<synchronous>, transform_indices = @transform_3, window_bounds = array<i64: 3, 3, 8, 8>}, {pipeline_mode = #tpu.pipeline_mode<synchronous>, transform_indices = @transform_4, window_bounds = array<i64: 1, 8>}, {pipeline_mode = #tpu.pipeline_mode<synchronous>, transform_indices = @transform_5, window_bounds = array<i64: 4, 8>}, {pipeline_mode = #tpu.pipeline_mode<synchronous>, transform_indices = @transform_6, window_bounds = array<i64: 1, 8>}, {transform_indices = @transform_7, window_bounds = array<i64: 1, 16, 16, 8>}]} {
    %cst = arith.constant 0.000000e+00 : f32
    %0 = vector.broadcast %cst : f32 to vector<18x18x4xf32>
    %c0 = arith.constant 0 : index
    %c0_0 = arith.constant 0 : index
    %c0_1 = arith.constant 0 : index
    %1 = vector.load %arg9[%c0, %c0_0, %c0_1] : memref<18x18x4xf32, #tpu.memory_space<vmem>>, vector<18x18x4xf32>
    tpu.vector_store %arg9[%c0, %c0_0, %c0_1], %0 {strides = array<i32>} : memref<18x18x4xf32, #tpu.memory_space<vmem>>, vector<18x18x4xf32>,
    %c0_2 = arith.constant 0 : index
    %c0_3 = arith.constant 0 : index
    %c0_4 = arith.constant 0 : index
    %c0_5 = arith.constant 0 : index
    %2 = vector.load %arg1[%c0_2, %c0_3, %c0_4, %c0_5] : memref<1x16x16x4xf32, #tpu.memory_space<vmem>>, vector<1x16x16x4xf32>
    %3 = vector.shape_cast %2 : vector<1x16x16x4xf32> to vector<16x16x4xf32>
    %c1 = arith.constant 1 : index
    %c1_6 = arith.constant 1 : index
    %c0_7 = arith.constant 0 : index
    %4 = vector.load %arg9[%c1, %c1_6, %c0_7] : memref<18x18x4xf32, #tpu.memory_space<vmem>>, vector<16x16x4xf32>
    tpu.vector_store %arg9[%c1, %c1_6, %c0_7], %3 {strides = array<i32>} : memref<18x18x4xf32, #tpu.memory_space<vmem>>, vector<16x16x4xf32>,
    %cst_8 = arith.constant 0.000000e+00 : f32
    %5 = vector.broadcast %cst_8 : f32 to vector<256x8xf32>
    %c0_9 = arith.constant 0 : index
    %c0_10 = arith.constant 0 : index
    %c0_11 = arith.constant 0 : index
    %6 = vector.load %arg9[%c0_9, %c0_10, %c0_11] : memref<18x18x4xf32, #tpu.memory_space<vmem>>, vector<16x16x4xf32>
    %7 = vector.shape_cast %6 : vector<16x16x4xf32> to vector<256x4xf32>
    %c0_12 = arith.constant 0 : index
    %c0_13 = arith.constant 0 : index
    %c0_14 = arith.constant 0 : index
    %c0_15 = arith.constant 0 : index
    %8 = vector.load %arg2[%c0_12, %c0_13, %c0_14, %c0_15] : memref<3x3x4x8xf32, #tpu.memory_space<vmem>>, vector<1x1x4x8xf32>
    %9 = vector.shape_cast %8 : vector<1x1x4x8xf32> to vector<4x8xf32>
    %cst_16 = arith.constant dense<0.000000e+00> : vector<256x8xf32>
    %10 = tpu.matmul %7, %9, %cst_16 {dimension_numbers = #tpu.dot_dimension_numbers<[1], [0], [0], [1], [0, 0, 1, 1], [], []>} : vector<256x4xf32>, vector<4x8xf32>, vector<256x8xf32> -> vector<256x8xf32>
    %11 = arith.addf %5, %10 : vector<256x8xf32>
    %c0_17 = arith.constant 0 : index
    %c1_18 = arith.constant 1 : index
    %c0_19 = arith.constant 0 : index
    %12 = vector.load %arg9[%c0_17, %c1_18, %c0_19] : memref<18x18x4xf32, #tpu.memory_space<vmem>>, vector<16x16x4xf32>
    %13 = vector.shape_cast %12 : vector<16x16x4xf32> to vector<256x4xf32>
    %c0_20 = arith.constant 0 : index
    %c1_21 = arith.constant 1 : index
    %c0_22 = arith.constant 0 : index
    %c0_23 = arith.constant 0 : index
    %14 = vector.load %arg2[%c0_20, %c1_21, %c0_22, %c0_23] : memref<3x3x4x8xf32, #tpu.memory_space<vmem>>, vector<1x1x4x8xf32>
    %15 = vector.shape_cast %14 : vector<1x1x4x8xf32> to vector<4x8xf32>
    %cst_24 = arith.constant dense<0.000000e+00> : vector<256x8xf32>
    %16 = tpu.matmul %13, %15, %cst_24 {dimension_numbers = #tpu.dot_dimension_numbers<[1], [0], [0], [1], [0, 0, 1, 1], [], []>} : vector<256x4xf32>, vector<4x8xf32>, vector<256x8xf32> -> vector<256x8xf32>
    %17 = arith.addf %11, %16 : vector<256x8xf32>
    %c0_25 = arith.constant 0 : index
    %c2 = arith.constant 2 : index
    %c0_26 = arith.constant 0 : index
    %18 = vector.load %arg9[%c0_25, %c2, %c0_26] : memref<18x18x4xf32, #tpu.memory_space<vmem>>, vector<16x16x4xf32>
    %19 = vector.shape_cast %18 : vector<16x16x4xf32> to vector<256x4xf32>
    %c0_27 = arith.constant 0 : index
    %c2_28 = arith.constant 2 : index
    %c0_29 = arith.constant 0 : index
    %c0_30 = arith.constant 0 : index
    %20 = vector.load %arg2[%c0_27, %c2_28, %c0_29, %c0_30] : memref<3x3x4x8xf32, #tpu.memory_space<vmem>>, vector<1x1x4x8xf32>
    %21 = vector.shape_cast %20 : vector<1x1x4x8xf32> to vector<4x8xf32>
    %cst_31 = arith.constant dense<0.000000e+00> : vector<256x8xf32>
    %22 = tpu.matmul %19, %21, %cst_31 {dimension_numbers = #tpu.dot_dimension_numbers<[1], [0], [0], [1], [0, 0, 1, 1], [], []>} : vector<256x4xf32>, vector<4x8xf32>, vector<256x8xf32> -> vector<256x8xf32>
    %23 = arith.addf %17, %22 : vector<256x8xf32>
    %c1_32 = arith.constant 1 : index
    %c0_33 = arith.constant 0 : index
    %c0_34 = arith.constant 0 : index
    %24 = vector.load %arg9[%c1_32, %c0_33, %c0_34] : memref<18x18x4xf32, #tpu.memory_space<vmem>>, vector<16x16x4xf32>
    %25 = vector.shape_cast %24 : vector<16x16x4xf32> to vector<256x4xf32>
    %c1_35 = arith.constant 1 : index
    %c0_36 = arith.constant 0 : index
    %c0_37 = arith.constant 0 : index
    %c0_38 = arith.constant 0 : index
    %26 = vector.load %arg2[%c1_35, %c0_36, %c0_37, %c0_38] : memref<3x3x4x8xf32, #tpu.memory_space<vmem>>, vector<1x1x4x8xf32>
    %27 = vector.shape_cast %26 : vector<1x1x4x8xf32> to vector<4x8xf32>
    %cst_39 = arith.constant dense<0.000000e+00> : vector<256x8xf32>
    %28 = tpu.matmul %25, %27, %cst_39 {dimension_numbers = #tpu.dot_dimension_numbers<[1], [0], [0], [1], [0, 0, 1, 1], [], []>} : vector<256x4xf32>, vector<4x8xf32>, vector<256x8xf32> -> vector<256x8xf32>
    %29 = arith.addf %23, %28 : vector<256x8xf32>
    %c1_40 = arith.constant 1 : index
    %c1_41 = arith.constant 1 : index
    %c0_42 = arith.constant 0 : index
    %30 = vector.load %arg9[%c1_40, %c1_41, %c0_42] : memref<18x18x4xf32, #tpu.memory_space<vmem>>, vector<16x16x4xf32>
    %31 = vector.shape_cast %30 : vector<16x16x4xf32> to vector<256x4xf32>
    %c1_43 = arith.constant 1 : index
    %c1_44 = arith.constant 1 : index
    %c0_45 = arith.constant 0 : index
    %c0_46 = arith.constant 0 : index
    %32 = vector.load %arg2[%c1_43, %c1_44, %c0_45, %c0_46] : memref<3x3x4x8xf32, #tpu.memory_space<vmem>>, vector<1x1x4x8xf32>
    %33 = vector.shape_cast %32 : vector<1x1x4x8xf32> to vector<4x8xf32>
    %cst_47 = arith.constant dense<0.000000e+00> : vector<256x8xf32>
    %34 = tpu.matmul %31, %33, %cst_47 {dimension_numbers = #tpu.dot_dimension_numbers<[1], [0], [0], [1], [0, 0, 1, 1], [], []>} : vector<256x4xf32>, vector<4x8xf32>, vector<256x8xf32> -> vector<256x8xf32>
    %35 = arith.addf %29, %34 : vector<256x8xf32>
    %c1_48 = arith.constant 1 : index
    %c2_49 = arith.constant 2 : index
    %c0_50 = arith.constant 0 : index
    %36 = vector.load %arg9[%c1_48, %c2_49, %c0_50] : memref<18x18x4xf32, #tpu.memory_space<vmem>>, vector<16x16x4xf32>
    %37 = vector.shape_cast %36 : vector<16x16x4xf32> to vector<256x4xf32>
    %c1_51 = arith.constant 1 : index
    %c2_52 = arith.constant 2 : index
    %c0_53 = arith.constant 0 : index
    %c0_54 = arith.constant 0 : index
    %38 = vector.load %arg2[%c1_51, %c2_52, %c0_53, %c0_54] : memref<3x3x4x8xf32, #tpu.memory_space<vmem>>, vector<1x1x4x8xf32>
    %39 = vector.shape_cast %38 : vector<1x1x4x8xf32> to vector<4x8xf32>
    %cst_55 = arith.constant dense<0.000000e+00> : vector<256x8xf32>
    %40 = tpu.matmul %37, %39, %cst_55 {dimension_numbers = #tpu.dot_dimension_numbers<[1], [0], [0], [1], [0, 0, 1, 1], [], []>} : vector<256x4xf32>, vector<4x8xf32>, vector<256x8xf32> -> vector<256x8xf32>
    %41 = arith.addf %35, %40 : vector<256x8xf32>
    %c2_56 = arith.constant 2 : index
    %c0_57 = arith.constant 0 : index
    %c0_58 = arith.constant 0 : index
    %42 = vector.load %arg9[%c2_56, %c0_57, %c0_58] : memref<18x18x4xf32, #tpu.memory_space<vmem>>, vector<16x16x4xf32>
    %43 = vector.shape_cast %42 : vector<16x16x4xf32> to vector<256x4xf32>
    %c2_59 = arith.constant 2 : index
    %c0_60 = arith.constant 0 : index
    %c0_61 = arith.constant 0 : index
    %c0_62 = arith.constant 0 : index
    %44 = vector.load %arg2[%c2_59, %c0_60, %c0_61, %c0_62] : memref<3x3x4x8xf32, #tpu.memory_space<vmem>>, vector<1x1x4x8xf32>
    %45 = vector.shape_cast %44 : vector<1x1x4x8xf32> to vector<4x8xf32>
    %cst_63 = arith.constant dense<0.000000e+00> : vector<256x8xf32>
    %46 = tpu.matmul %43, %45, %cst_63 {dimension_numbers = #tpu.dot_dimension_numbers<[1], [0], [0], [1], [0, 0, 1, 1], [], []>} : vector<256x4xf32>, vector<4x8xf32>, vector<256x8xf32> -> vector<256x8xf32>
    %47 = arith.addf %41, %46 : vector<256x8xf32>
    %c2_64 = arith.constant 2 : index
    %c1_65 = arith.constant 1 : index
    %c0_66 = arith.constant 0 : index
    %48 = vector.load %arg9[%c2_64, %c1_65, %c0_66] : memref<18x18x4xf32, #tpu.memory_space<vmem>>, vector<16x16x4xf32>
    %49 = vector.shape_cast %48 : vector<16x16x4xf32> to vector<256x4xf32>
    %c2_67 = arith.constant 2 : index
    %c1_68 = arith.constant 1 : index
    %c0_69 = arith.constant 0 : index
    %c0_70 = arith.constant 0 : index
    %50 = vector.load %arg2[%c2_67, %c1_68, %c0_69, %c0_70] : memref<3x3x4x8xf32, #tpu.memory_space<vmem>>, vector<1x1x4x8xf32>
    %51 = vector.shape_cast %50 : vector<1x1x4x8xf32> to vector<4x8xf32>
    %cst_71 = arith.constant dense<0.000000e+00> : vector<256x8xf32>
    %52 = tpu.matmul %49, %51, %cst_71 {dimension_numbers = #tpu.dot_dimension_numbers<[1], [0], [0], [1], [0, 0, 1, 1], [], []>} : vector<256x4xf32>, vector<4x8xf32>, vector<256x8xf32> -> vector<256x8xf32>
    %53 = arith.addf %47, %52 : vector<256x8xf32>
    %c2_72 = arith.constant 2 : index
    %c2_73 = arith.constant 2 : index
    %c0_74 = arith.constant 0 : index
    %54 = vector.load %arg9[%c2_72, %c2_73, %c0_74] : memref<18x18x4xf32, #tpu.memory_space<vmem>>, vector<16x16x4xf32>
    %55 = vector.shape_cast %54 : vector<16x16x4xf32> to vector<256x4xf32>
    %c2_75 = arith.constant 2 : index
    %c2_76 = arith.constant 2 : index
    %c0_77 = arith.constant 0 : index
    %c0_78 = arith.constant 0 : index
    %56 = vector.load %arg2[%c2_75, %c2_76, %c0_77, %c0_78] : memref<3x3x4x8xf32, #tpu.memory_space<vmem>>, vector<1x1x4x8xf32>
    %57 = vector.shape_cast %56 : vector<1x1x4x8xf32> to vector<4x8xf32>
    %cst_79 = arith.constant dense<0.000000e+00> : vector<256x8xf32>
    %58 = tpu.matmul %55, %57, %cst_79 {dimension_numbers = #tpu.dot_dimension_numbers<[1], [0], [0], [1], [0, 0, 1, 1], [], []>} : vector<256x4xf32>, vector<4x8xf32>, vector<256x8xf32> -> vector<256x8xf32>
    %59 = arith.addf %53, %58 : vector<256x8xf32>
    %c0_80 = arith.constant 0 : index
    %c0_81 = arith.constant 0 : index
    %60 = vector.load %arg3[%c0_80, %c0_81] : memref<1x8xf32, #tpu.memory_space<vmem>>, vector<1x8xf32>
    %61 = vector.broadcast %60 : vector<1x8xf32> to vector<256x8xf32>
    %62 = arith.addf %59, %61 : vector<256x8xf32>
    %cst_82 = arith.constant 0.000000e+00 : f32
    %63 = vector.broadcast %cst_82 : f32 to vector<256x8xf32>
    %64 = arith.maximumf %62, %63 : vector<256x8xf32>
    %cst_83 = arith.constant 0.000000e+00 : f32
    %65 = vector.broadcast %cst_83 : f32 to vector<18x18x8xf32>
    %c0_84 = arith.constant 0 : index
    %c0_85 = arith.constant 0 : index
    %c0_86 = arith.constant 0 : index
    %66 = vector.load %arg10[%c0_84, %c0_85, %c0_86] : memref<18x18x8xf32, #tpu.memory_space<vmem>>, vector<18x18x8xf32>
    tpu.vector_store %arg10[%c0_84, %c0_85, %c0_86], %65 {strides = array<i32>} : memref<18x18x8xf32, #tpu.memory_space<vmem>>, vector<18x18x8xf32>,
    %67 = vector.shape_cast %64 : vector<256x8xf32> to vector<16x16x8xf32>
    %c1_87 = arith.constant 1 : index
    %c1_88 = arith.constant 1 : index
    %c0_89 = arith.constant 0 : index
    %68 = vector.load %arg10[%c1_87, %c1_88, %c0_89] : memref<18x18x8xf32, #tpu.memory_space<vmem>>, vector<16x16x8xf32>
    tpu.vector_store %arg10[%c1_87, %c1_88, %c0_89], %67 {strides = array<i32>} : memref<18x18x8xf32, #tpu.memory_space<vmem>>, vector<16x16x8xf32>,
    %cst_90 = arith.constant 0.000000e+00 : f32
    %69 = vector.broadcast %cst_90 : f32 to vector<256x8xf32>
    %c0_91 = arith.constant 0 : index
    %c0_92 = arith.constant 0 : index
    %c0_93 = arith.constant 0 : index
    %70 = vector.load %arg10[%c0_91, %c0_92, %c0_93] : memref<18x18x8xf32, #tpu.memory_space<vmem>>, vector<16x16x8xf32>
    %71 = vector.shape_cast %70 : vector<16x16x8xf32> to vector<256x8xf32>
    %c0_94 = arith.constant 0 : index
    %c0_95 = arith.constant 0 : index
    %c0_96 = arith.constant 0 : index
    %c0_97 = arith.constant 0 : index
    %72 = vector.load %arg4[%c0_94, %c0_95, %c0_96, %c0_97] : memref<3x3x8x8xf32, #tpu.memory_space<vmem>>, vector<1x1x8x8xf32>
    %73 = vector.shape_cast %72 : vector<1x1x8x8xf32> to vector<8x8xf32>
    %cst_98 = arith.constant dense<0.000000e+00> : vector<256x8xf32>
    %74 = tpu.matmul %71, %73, %cst_98 {dimension_numbers = #tpu.dot_dimension_numbers<[1], [0], [0], [1], [0, 0, 1, 1], [], []>} : vector<256x8xf32>, vector<8x8xf32>, vector<256x8xf32> -> vector<256x8xf32>
    %75 = arith.addf %69, %74 : vector<256x8xf32>
    %c0_99 = arith.constant 0 : index
    %c1_100 = arith.constant 1 : index
    %c0_101 = arith.constant 0 : index
    %76 = vector.load %arg10[%c0_99, %c1_100, %c0_101] : memref<18x18x8xf32, #tpu.memory_space<vmem>>, vector<16x16x8xf32>
    %77 = vector.shape_cast %76 : vector<16x16x8xf32> to vector<256x8xf32>
    %c0_102 = arith.constant 0 : index
    %c1_103 = arith.constant 1 : index
    %c0_104 = arith.constant 0 : index
    %c0_105 = arith.constant 0 : index
    %78 = vector.load %arg4[%c0_102, %c1_103, %c0_104, %c0_105] : memref<3x3x8x8xf32, #tpu.memory_space<vmem>>, vector<1x1x8x8xf32>
    %79 = vector.shape_cast %78 : vector<1x1x8x8xf32> to vector<8x8xf32>
    %cst_106 = arith.constant dense<0.000000e+00> : vector<256x8xf32>
    %80 = tpu.matmul %77, %79, %cst_106 {dimension_numbers = #tpu.dot_dimension_numbers<[1], [0], [0], [1], [0, 0, 1, 1], [], []>} : vector<256x8xf32>, vector<8x8xf32>, vector<256x8xf32> -> vector<256x8xf32>
    %81 = arith.addf %75, %80 : vector<256x8xf32>
    %c0_107 = arith.constant 0 : index
    %c2_108 = arith.constant 2 : index
    %c0_109 = arith.constant 0 : index
    %82 = vector.load %arg10[%c0_107, %c2_108, %c0_109] : memref<18x18x8xf32, #tpu.memory_space<vmem>>, vector<16x16x8xf32>
    %83 = vector.shape_cast %82 : vector<16x16x8xf32> to vector<256x8xf32>
    %c0_110 = arith.constant 0 : index
    %c2_111 = arith.constant 2 : index
    %c0_112 = arith.constant 0 : index
    %c0_113 = arith.constant 0 : index
    %84 = vector.load %arg4[%c0_110, %c2_111, %c0_112, %c0_113] : memref<3x3x8x8xf32, #tpu.memory_space<vmem>>, vector<1x1x8x8xf32>
    %85 = vector.shape_cast %84 : vector<1x1x8x8xf32> to vector<8x8xf32>
    %cst_114 = arith.constant dense<0.000000e+00> : vector<256x8xf32>
    %86 = tpu.matmul %83, %85, %cst_114 {dimension_numbers = #tpu.dot_dimension_numbers<[1], [0], [0], [1], [0, 0, 1, 1], [], []>} : vector<256x8xf32>, vector<8x8xf32>, vector<256x8xf32> -> vector<256x8xf32>
    %87 = arith.addf %81, %86 : vector<256x8xf32>
    %c1_115 = arith.constant 1 : index
    %c0_116 = arith.constant 0 : index
    %c0_117 = arith.constant 0 : index
    %88 = vector.load %arg10[%c1_115, %c0_116, %c0_117] : memref<18x18x8xf32, #tpu.memory_space<vmem>>, vector<16x16x8xf32>
    %89 = vector.shape_cast %88 : vector<16x16x8xf32> to vector<256x8xf32>
    %c1_118 = arith.constant 1 : index
    %c0_119 = arith.constant 0 : index
    %c0_120 = arith.constant 0 : index
    %c0_121 = arith.constant 0 : index
    %90 = vector.load %arg4[%c1_118, %c0_119, %c0_120, %c0_121] : memref<3x3x8x8xf32, #tpu.memory_space<vmem>>, vector<1x1x8x8xf32>
    %91 = vector.shape_cast %90 : vector<1x1x8x8xf32> to vector<8x8xf32>
    %cst_122 = arith.constant dense<0.000000e+00> : vector<256x8xf32>
    %92 = tpu.matmul %89, %91, %cst_122 {dimension_numbers = #tpu.dot_dimension_numbers<[1], [0], [0], [1], [0, 0, 1, 1], [], []>} : vector<256x8xf32>, vector<8x8xf32>, vector<256x8xf32> -> vector<256x8xf32>
    %93 = arith.addf %87, %92 : vector<256x8xf32>
    %c1_123 = arith.constant 1 : index
    %c1_124 = arith.constant 1 : index
    %c0_125 = arith.constant 0 : index
    %94 = vector.load %arg10[%c1_123, %c1_124, %c0_125] : memref<18x18x8xf32, #tpu.memory_space<vmem>>, vector<16x16x8xf32>
    %95 = vector.shape_cast %94 : vector<16x16x8xf32> to vector<256x8xf32>
    %c1_126 = arith.constant 1 : index
    %c1_127 = arith.constant 1 : index
    %c0_128 = arith.constant 0 : index
    %c0_129 = arith.constant 0 : index
    %96 = vector.load %arg4[%c1_126, %c1_127, %c0_128, %c0_129] : memref<3x3x8x8xf32, #tpu.memory_space<vmem>>, vector<1x1x8x8xf32>
    %97 = vector.shape_cast %96 : vector<1x1x8x8xf32> to vector<8x8xf32>
    %cst_130 = arith.constant dense<0.000000e+00> : vector<256x8xf32>
    %98 = tpu.matmul %95, %97, %cst_130 {dimension_numbers = #tpu.dot_dimension_numbers<[1], [0], [0], [1], [0, 0, 1, 1], [], []>} : vector<256x8xf32>, vector<8x8xf32>, vector<256x8xf32> -> vector<256x8xf32>
    %99 = arith.addf %93, %98 : vector<256x8xf32>
    %c1_131 = arith.constant 1 : index
    %c2_132 = arith.constant 2 : index
    %c0_133 = arith.constant 0 : index
    %100 = vector.load %arg10[%c1_131, %c2_132, %c0_133] : memref<18x18x8xf32, #tpu.memory_space<vmem>>, vector<16x16x8xf32>
    %101 = vector.shape_cast %100 : vector<16x16x8xf32> to vector<256x8xf32>
    %c1_134 = arith.constant 1 : index
    %c2_135 = arith.constant 2 : index
    %c0_136 = arith.constant 0 : index
    %c0_137 = arith.constant 0 : index
    %102 = vector.load %arg4[%c1_134, %c2_135, %c0_136, %c0_137] : memref<3x3x8x8xf32, #tpu.memory_space<vmem>>, vector<1x1x8x8xf32>
    %103 = vector.shape_cast %102 : vector<1x1x8x8xf32> to vector<8x8xf32>
    %cst_138 = arith.constant dense<0.000000e+00> : vector<256x8xf32>
    %104 = tpu.matmul %101, %103, %cst_138 {dimension_numbers = #tpu.dot_dimension_numbers<[1], [0], [0], [1], [0, 0, 1, 1], [], []>} : vector<256x8xf32>, vector<8x8xf32>, vector<256x8xf32> -> vector<256x8xf32>
    %105 = arith.addf %99, %104 : vector<256x8xf32>
    %c2_139 = arith.constant 2 : index
    %c0_140 = arith.constant 0 : index
    %c0_141 = arith.constant 0 : index
    %106 = vector.load %arg10[%c2_139, %c0_140, %c0_141] : memref<18x18x8xf32, #tpu.memory_space<vmem>>, vector<16x16x8xf32>
    %107 = vector.shape_cast %106 : vector<16x16x8xf32> to vector<256x8xf32>
    %c2_142 = arith.constant 2 : index
    %c0_143 = arith.constant 0 : index
    %c0_144 = arith.constant 0 : index
    %c0_145 = arith.constant 0 : index
    %108 = vector.load %arg4[%c2_142, %c0_143, %c0_144, %c0_145] : memref<3x3x8x8xf32, #tpu.memory_space<vmem>>, vector<1x1x8x8xf32>
    %109 = vector.shape_cast %108 : vector<1x1x8x8xf32> to vector<8x8xf32>
    %cst_146 = arith.constant dense<0.000000e+00> : vector<256x8xf32>
    %110 = tpu.matmul %107, %109, %cst_146 {dimension_numbers = #tpu.dot_dimension_numbers<[1], [0], [0], [1], [0, 0, 1, 1], [], []>} : vector<256x8xf32>, vector<8x8xf32>, vector<256x8xf32> -> vector<256x8xf32>
    %111 = arith.addf %105, %110 : vector<256x8xf32>
    %c2_147 = arith.constant 2 : index
    %c1_148 = arith.constant 1 : index
    %c0_149 = arith.constant 0 : index
    %112 = vector.load %arg10[%c2_147, %c1_148, %c0_149] : memref<18x18x8xf32, #tpu.memory_space<vmem>>, vector<16x16x8xf32>
    %113 = vector.shape_cast %112 : vector<16x16x8xf32> to vector<256x8xf32>
    %c2_150 = arith.constant 2 : index
    %c1_151 = arith.constant 1 : index
    %c0_152 = arith.constant 0 : index
    %c0_153 = arith.constant 0 : index
    %114 = vector.load %arg4[%c2_150, %c1_151, %c0_152, %c0_153] : memref<3x3x8x8xf32, #tpu.memory_space<vmem>>, vector<1x1x8x8xf32>
    %115 = vector.shape_cast %114 : vector<1x1x8x8xf32> to vector<8x8xf32>
    %cst_154 = arith.constant dense<0.000000e+00> : vector<256x8xf32>
    %116 = tpu.matmul %113, %115, %cst_154 {dimension_numbers = #tpu.dot_dimension_numbers<[1], [0], [0], [1], [0, 0, 1, 1], [], []>} : vector<256x8xf32>, vector<8x8xf32>, vector<256x8xf32> -> vector<256x8xf32>
    %117 = arith.addf %111, %116 : vector<256x8xf32>
    %c2_155 = arith.constant 2 : index
    %c2_156 = arith.constant 2 : index
    %c0_157 = arith.constant 0 : index
    %118 = vector.load %arg10[%c2_155, %c2_156, %c0_157] : memref<18x18x8xf32, #tpu.memory_space<vmem>>, vector<16x16x8xf32>
    %119 = vector.shape_cast %118 : vector<16x16x8xf32> to vector<256x8xf32>
    %c2_158 = arith.constant 2 : index
    %c2_159 = arith.constant 2 : index
    %c0_160 = arith.constant 0 : index
    %c0_161 = arith.constant 0 : index
    %120 = vector.load %arg4[%c2_158, %c2_159, %c0_160, %c0_161] : memref<3x3x8x8xf32, #tpu.memory_space<vmem>>, vector<1x1x8x8xf32>
    %121 = vector.shape_cast %120 : vector<1x1x8x8xf32> to vector<8x8xf32>
    %cst_162 = arith.constant dense<0.000000e+00> : vector<256x8xf32>
    %122 = tpu.matmul %119, %121, %cst_162 {dimension_numbers = #tpu.dot_dimension_numbers<[1], [0], [0], [1], [0, 0, 1, 1], [], []>} : vector<256x8xf32>, vector<8x8xf32>, vector<256x8xf32> -> vector<256x8xf32>
    %123 = arith.addf %117, %122 : vector<256x8xf32>
    %c0_163 = arith.constant 0 : index
    %c0_164 = arith.constant 0 : index
    %124 = vector.load %arg5[%c0_163, %c0_164] : memref<1x8xf32, #tpu.memory_space<vmem>>, vector<1x8xf32>
    %125 = vector.broadcast %124 : vector<1x8xf32> to vector<256x8xf32>
    %126 = arith.addf %123, %125 : vector<256x8xf32>
    %c0_165 = arith.constant 0 : index
    %c0_166 = arith.constant 0 : index
    %c0_167 = arith.constant 0 : index
    %c0_168 = arith.constant 0 : index
    %127 = vector.load %arg1[%c0_165, %c0_166, %c0_167, %c0_168] : memref<1x16x16x4xf32, #tpu.memory_space<vmem>>, vector<1x16x16x4xf32>
    %128 = vector.shape_cast %127 : vector<1x16x16x4xf32> to vector<16x16x4xf32>
    %129 = vector.shape_cast %128 : vector<16x16x4xf32> to vector<256x4xf32>
    %c0_169 = arith.constant 0 : index
    %c0_170 = arith.constant 0 : index
    %130 = vector.load %arg6[%c0_169, %c0_170] : memref<4x8xf32, #tpu.memory_space<vmem>>, vector<4x8xf32>
    %cst_171 = arith.constant dense<0.000000e+00> : vector<256x8xf32>
    %131 = tpu.matmul %129, %130, %cst_171 {dimension_numbers = #tpu.dot_dimension_numbers<[1], [0], [0], [1], [0, 0, 1, 1], [], []>} : vector<256x4xf32>, vector<4x8xf32>, vector<256x8xf32> -> vector<256x8xf32>
    %132 = arith.addf %126, %131 : vector<256x8xf32>
    %c0_172 = arith.constant 0 : index
    %c0_173 = arith.constant 0 : index
    %133 = vector.load %arg7[%c0_172, %c0_173] : memref<1x8xf32, #tpu.memory_space<vmem>>, vector<1x8xf32>
    %134 = vector.broadcast %133 : vector<1x8xf32> to vector<256x8xf32>
    %135 = arith.addf %132, %134 : vector<256x8xf32>
    %cst_174 = arith.constant 0.000000e+00 : f32
    %136 = vector.broadcast %cst_174 : f32 to vector<256x8xf32>
    %137 = arith.maximumf %135, %136 : vector<256x8xf32>
    %138 = vector.shape_cast %137 : vector<256x8xf32> to vector<16x16x8xf32>
    %c0_175 = arith.constant 0 : index
    %c0_176 = arith.constant 0 : index
    %c0_177 = arith.constant 0 : index
    %c0_178 = arith.constant 0 : index
    %139 = vector.load %arg8[%c0_175, %c0_176, %c0_177, %c0_178] : memref<1x16x16x8xf32, #tpu.memory_space<vmem>>, vector<1x16x16x8xf32>
    %140 = vector.shape_cast %139 : vector<1x16x16x8xf32> to vector<16x16x8xf32>
    %141 = vector.shape_cast %138 : vector<16x16x8xf32> to vector<1x16x16x8xf32>
    tpu.vector_store %arg8[%c0_175, %c0_176, %c0_177, %c0_178], %141 {strides = array<i32>} : memref<1x16x16x8xf32, #tpu.memory_space<vmem>>, vector<1x16x16x8xf32>,
    return
  }
  func.func @transform_0(%arg0: i32) -> (i32, i32, i32, i32) {
    %c0_i32 = arith.constant 0 : i32
    %c0_i32_0 = arith.constant 0 : i32
    %c0_i32_1 = arith.constant 0 : i32
    %c0_i32_2 = arith.constant 0 : i32
    return %arg0, %c0_i32, %c0_i32_0, %c0_i32_1 : i32, i32, i32, i32
  }
  func.func @transform_1(%arg0: i32) -> (i32, i32, i32, i32) {
    %c0_i32 = arith.constant 0 : i32
    %c0_i32_0 = arith.constant 0 : i32
    %c0_i32_1 = arith.constant 0 : i32
    %c0_i32_2 = arith.constant 0 : i32
    %c0_i32_3 = arith.constant 0 : i32
    return %c0_i32, %c0_i32_0, %c0_i32_1, %c0_i32_2 : i32, i32, i32, i32
  }
  func.func @transform_2(%arg0: i32) -> (i32, i32) {
    %c0_i32 = arith.constant 0 : i32
    %c0_i32_0 = arith.constant 0 : i32
    %c0_i32_1 = arith.constant 0 : i32
    return %c0_i32, %c0_i32_0 : i32, i32
  }
  func.func @transform_3(%arg0: i32) -> (i32, i32, i32, i32) {
    %c0_i32 = arith.constant 0 : i32
    %c0_i32_0 = arith.constant 0 : i32
    %c0_i32_1 = arith.constant 0 : i32
    %c0_i32_2 = arith.constant 0 : i32
    %c0_i32_3 = arith.constant 0 : i32
    return %c0_i32, %c0_i32_0, %c0_i32_1, %c0_i32_2 : i32, i32, i32, i32
  }
  func.func @transform_4(%arg0: i32) -> (i32, i32) {
    %c0_i32 = arith.constant 0 : i32
    %c0_i32_0 = arith.constant 0 : i32
    %c0_i32_1 = arith.constant 0 : i32
    return %c0_i32, %c0_i32_0 : i32, i32
  }
  func.func @transform_5(%arg0: i32) -> (i32, i32) {
    %c0_i32 = arith.constant 0 : i32
    %c0_i32_0 = arith.constant 0 : i32
    %c0_i32_1 = arith.constant 0 : i32
    return %c0_i32, %c0_i32_0 : i32, i32
  }
  func.func @transform_6(%arg0: i32) -> (i32, i32) {
    %c0_i32 = arith.constant 0 : i32
    %c0_i32_0 = arith.constant 0 : i32
    %c0_i32_1 = arith.constant 0 : i32
    return %c0_i32, %c0_i32_0 : i32, i32
  }
  func.func @transform_7(%arg0: i32) -> (i32, i32, i32, i32) {
    %c0_i32 = arith.constant 0 : i32
    %c0_i32_0 = arith.constant 0 : i32
    %c0_i32_1 = arith.constant 0 : i32
    %c0_i32_2 = arith.constant 0 : i32
    return %arg0, %c0_i32, %c0_i32_0, %c0_i32_1 : i32, i32, i32, i32
  }
}

</mosaic_0001>

<bundles_post_ra>
// kernel: tpu_custom_call.1
= control target key start
LH: loop header
LB: loop body
LE: loop exit
PB: predicated region body
PF: predicated region fallthrough
CT: control target
= control target key end

     0   :  { %s10875_s24 = smov 0   ;;  %s13101_s0 = inlined_call_operand.vmem [shape: f32[2,16,16,4], index: 0, kind: input, shape index: {}]   ;;  %s13102_s1 = inlined_call_operand.vmem [shape: f32[3,3,4,8], index: 1, kind: input, shape index: {}]   ;;  %s13103_s2 = inlined_call_operand.vmem [shape: f32[1,8], index: 2, kind: input, shape index: {}]   ;;  %s13104_s3 = inlined_call_operand.vmem [shape: f32[3,3,8,8], index: 3, kind: input, shape index: {}]   ;;  %s13105_s4 = inlined_call_operand.vmem [shape: f32[1,8], index: 4, kind: input, shape index: {}]   ;;  %s13106_s5 = inlined_call_operand.vmem [shape: f32[4,8], index: 5, kind: input, shape index: {}]   ;;  %s13107_s6 = inlined_call_operand.vmem [shape: f32[1,8], index: 6, kind: input, shape index: {}]   ;;  %s13108_s7 = inlined_call_operand.vmem [shape: f32[2,16,16,8], index: 7, kind: output, shape index: {}]  }
   0x1 LB: > { %s8012_s25 = sadd.s32 4294967295, %s10832_s24   ;;  %p8016_p0 = scmp.ge.s32.totalorder %s10832_s24, 1  ;;  %s10832_s24 = sphi %s10875_s24, %s17_s24  }
   0x2   : > { %p237_p1 = scmp.lt.s32.totalorder %s10832_s24, 3 }
   0x4   : > { %p238_p2 = pnand %p8016_p0, %p237_p1 }
   0x6   : > { %241 = sbr.rel (%p238_p2) target bundleno = 1636 (0x664), region = 48 }
   0xd   : > { %v8021_v0 = vld [vmem:[%s13102_s1 + $0x4] sm:$0xf]  ;;  %vm563_vm0 = vcmask 1043456   ;;  %vm279_vm1 = vcmask 31744   ;;  %vm282_vm2 = vcmask 25600   ;;  %v13109_v1 = vmov 0.0  }
   0xe   : > { %9289 = vmatprep.subr.msk.mxu0 %vm563_vm0, %v8021_v0  ;;  %280 = vst.msk [vmem:[#allocation2] sm:$0xff] %vm279_vm1, %v13109_v1  ;;  %281 = vst.msk [vmem:[#allocation2 + $0x8] sm:$0xff] %vm279_vm1, %v13109_v1  ;;  %v432_v2 = vld [vmem:[%s13102_s1] sm:$0xf]  ;;  %p269_p3 = scmp.lt.s32.totalorder %s8012_s25, 1  ;;  %vm3918_vm3 = vcmask 64512  }
   0xf   : > { %284 = vst.msk [vmem:[#allocation2 + $0x18] sm:$0xff] %vm279_vm1, %v13109_v1  ;;  %285 = vst.msk [vmem:[#allocation2 + $0x20] sm:$0xff] %vm279_vm1, %v13109_v1  ;;  %9290 = vmatpush3.msk.msra.mxu0 %vm563_vm0, %v8021_v0  ;;  %v11020_v6 = vld [vmem:[%s13102_s1 + $0x8] sm:$0xf]  ;;  %vm3921_vm4 = vcmask 58368  }
  0x10   : > { %287 = vst.msk [vmem:[#allocation2 + $0x30] sm:$0xff] %vm279_vm1, %v13109_v1  ;;  %288 = vst.msk [vmem:[#allocation2 + $0x38] sm:$0xff] %vm279_vm1, %v13109_v1  ;;  %9339 = vmatprep.subr.msk.mxu0 %vm563_vm0, %v432_v2  ;;  %s13413_s25 = smov (!%p269_p3, %s8012_s25), 1 }
  0x11   : > { %290 = vst.msk [vmem:[#allocation2 + $0x48] sm:$0xff] %vm279_vm1, %v13109_v1  ;;  %291 = vst.msk [vmem:[#allocation2 + $0x50] sm:$0xff] %vm279_vm1, %v13109_v1  ;;  %s8660_s30 = sshll.u32 %s13413_s25, 8 }
  0x12   : > { %293 = vst.msk [vmem:[#allocation2 + $0x60] sm:$0xff] %vm279_vm1, %v13109_v1  ;;  %294 = vst.msk [vmem:[#allocation2 + $0x68] sm:$0xff] %vm279_vm1, %v13109_v1  ;;  %s11012_s10 = scalar_lea.vmem %s13101_s0, %s8660_s30  ;;  %s12961_s14 = scalar_lea.vmem %s13108_s7, %s8660_s30 }
  0x13   : > { %296 = vst.msk [vmem:[#allocation2 + $0x78] sm:$0xff] %vm279_vm1, %v13109_v1  ;;  %297 = vst.msk [vmem:[#allocation2 + $0x80] sm:$0xff] %vm279_vm1, %v13109_v1  ;;  %v335_v3 = vld [vmem:[%s11012_s10] sm:$0xff]  ;;  %v336_v4 = vld [vmem:[%s11012_s10 + $0x8] sm:$0xff] }
  0x14   : > { %299 = vst.msk [vmem:[#allocation2 + $0x90] sm:$0xff] %vm279_vm1, %v13109_v1  ;;  %300 = vst.msk [vmem:[#allocation2 + $0x98] sm:$0xff] %vm279_vm1, %v13109_v1  ;;  %v337_v5 = vld [vmem:[%s11012_s10 + $0x10] sm:$0xff]  ;;  %v338_v9 = vld [vmem:[%s11012_s10 + $0x18] sm:$0xff] }
  0x15   : > { %302 = vst.msk [vmem:[#allocation2 + $0xa8] sm:$0xff] %vm279_vm1, %v13109_v1  ;;  %303 = vst.msk [vmem:[#allocation2 + $0xb0] sm:$0xff] %vm279_vm1, %v13109_v1  ;;  %v433_v7 = vld [vmem:[#allocation2 + $0x1] sm:$0xff]  ;;  %v341_v12 = vld [vmem:[%s11012_s10 + $0x30] sm:$0xff] }
  0x16   : > { %305 = vst.msk [vmem:[#allocation2 + $0xc0] sm:$0xff] %vm279_vm1, %v13109_v1  ;;  %306 = vst.msk [vmem:[#allocation2 + $0xc8] sm:$0xff] %vm279_vm1, %v13109_v1  ;;  %9291 = vmatprep.mubr.msk.f32.mxu0 %vm279_vm1, %v433_v7  ;;  %v339_v10 = vld [vmem:[%s11012_s10 + $0x20] sm:$0xff]  ;;  %v340_v11 = vld [vmem:[%s11012_s10 + $0x28] sm:$0xff] }
  0x17   : > { %308 = vst.msk [vmem:[#allocation2 + $0xd8] sm:$0xff] %vm279_vm1, %v13109_v1  ;;  %309 = vst.msk [vmem:[#allocation2 + $0xe0] sm:$0xff] %vm279_vm1, %v13109_v1  ;;  %v342_v13 = vld [vmem:[%s11012_s10 + $0x38] sm:$0xff]  ;;  %v343_v14 = vld [vmem:[%s11012_s10 + $0x40] sm:$0xff] }
  0x18   : > { %311 = vst.msk [vmem:[#allocation2 + $0xf0] sm:$0xff] %vm279_vm1, %v13109_v1  ;;  %312 = vst.msk [vmem:[#allocation2 + $0xf8] sm:$0xff] %vm279_vm1, %v13109_v1  ;;  %v344_v15 = vld [vmem:[%s11012_s10 + $0x48] sm:$0xff]  ;;  %v345_v16 = vld [vmem:[%s11012_s10 + $0x50] sm:$0xff] }
  0x19   : > { %314 = vst.msk [vmem:[#allocation2 + $0x108] sm:$0xff] %vm279_vm1, %v13109_v1  ;;  %315 = vst.msk [vmem:[#allocation2 + $0x110] sm:$0xff] %vm279_vm1, %v13109_v1  ;;  %v346_v17 = vld [vmem:[%s11012_s10 + $0x58] sm:$0xff]  ;;  %v347_v18 = vld [vmem:[%s11012_s10 + $0x60] sm:$0xff] }
  0x1a   : > { %317 = vst.msk [vmem:[#allocation2 + $0x120] sm:$0xff] %vm279_vm1, %v13109_v1  ;;  %318 = vst.msk [vmem:[#allocation2 + $0x128] sm:$0xff] %vm279_vm1, %v13109_v1  ;;  %v348_v19 = vld [vmem:[%s11012_s10 + $0x68] sm:$0xff]  ;;  %v349_v20 = vld [vmem:[%s11012_s10 + $0x70] sm:$0xff] }
  0x1b   : > { %320 = vst.msk [vmem:[#allocation2 + $0x138] sm:$0xff] %vm279_vm1, %v13109_v1  ;;  %321 = vst.msk [vmem:[#allocation2 + $0x140] sm:$0xff] %vm279_vm1, %v13109_v1  ;;  %v350_v21 = vld [vmem:[%s11012_s10 + $0x78] sm:$0xff]  ;;  %v351_v22 = vld [vmem:[%s11012_s10 + $0x80] sm:$0xff] }
  0x1c   : > { %323 = vst.msk [vmem:[#allocation2 + $0x150] sm:$0xff] %vm279_vm1, %v13109_v1  ;;  %324 = vst.msk [vmem:[#allocation2 + $0x158] sm:$0xff] %vm279_vm1, %v13109_v1  ;;  %v352_v23 = vld [vmem:[%s11012_s10 + $0x88] sm:$0xff]  ;;  %v353_v24 = vld [vmem:[%s11012_s10 + $0x90] sm:$0xff] }
  0x1d   : > { %326 = vst.msk [vmem:[#allocation2 + $0x168] sm:$0xff] %vm279_vm1, %v13109_v1  ;;  %327 = vst.msk [vmem:[#allocation2 + $0x170] sm:$0xff] %vm279_vm1, %v13109_v1  ;;  %v354_v25 = vld [vmem:[%s11012_s10 + $0x98] sm:$0xff]  ;;  %v355_v26 = vld [vmem:[%s11012_s10 + $0xa0] sm:$0xff] }
  0x1e   : > { %329 = vst.msk [vmem:[#allocation2 + $0x180] sm:$0xff] %vm279_vm1, %v13109_v1  ;;  %330 = vst.msk [vmem:[#allocation2 + $0x188] sm:$0xff] %vm279_vm1, %v13109_v1  ;;  %v356_v27 = vld [vmem:[%s11012_s10 + $0xa8] sm:$0xff]  ;;  %v357_v31 = vld [vmem:[%s11012_s10 + $0xb0] sm:$0xff] }
  0x1f   : > { %332 = vst.msk [vmem:[#allocation2 + $0x198] sm:$0xff] %vm279_vm1, %v13109_v1  ;;  %333 = vst.msk [vmem:[#allocation2 + $0x1a0] sm:$0xff] %vm279_vm1, %v13109_v1  ;;  %v358_v32 = vld [vmem:[%s11012_s10 + $0xb8] sm:$0xff]  ;;  %v359_v37 = vld [vmem:[%s11012_s10 + $0xc0] sm:$0xff] }
  0x20   : > { %283 = vst.msk [vmem:[#allocation2 + $0x10] sm:$0x3] %vm282_vm2, %v13109_v1  ;;  %286 = vst.msk [vmem:[#allocation2 + $0x28] sm:$0x3] %vm282_vm2, %v13109_v1  ;;  %v360_v38 = vld [vmem:[%s11012_s10 + $0xc8] sm:$0xff]  ;;  %v361_v39 = vld [vmem:[%s11012_s10 + $0xd0] sm:$0xff] }
  0x21   : > { %289 = vst.msk [vmem:[#allocation2 + $0x40] sm:$0x3] %vm282_vm2, %v13109_v1  ;;  %292 = vst.msk [vmem:[#allocation2 + $0x58] sm:$0x3] %vm282_vm2, %v13109_v1  ;;  %v362_v40 = vld [vmem:[%s11012_s10 + $0xd8] sm:$0xff]  ;;  %v363_v41 = vld [vmem:[%s11012_s10 + $0xe0] sm:$0xff] }
  0x22   : > { %295 = vst.msk [vmem:[#allocation2 + $0x70] sm:$0x3] %vm282_vm2, %v13109_v1  ;;  %298 = vst.msk [vmem:[#allocation2 + $0x88] sm:$0x3] %vm282_vm2, %v13109_v1  ;;  %v364_v42 = vld [vmem:[%s11012_s10 + $0xe8] sm:$0xff] }
  0x23   : > { %301 = vst.msk [vmem:[#allocation2 + $0xa0] sm:$0x3] %vm282_vm2, %v13109_v1  ;;  %304 = vst.msk [vmem:[#allocation2 + $0xb8] sm:$0x3] %vm282_vm2, %v13109_v1  ;;  %v11210_v7 = vld [vmem:[%s13102_s1 + $0xc] sm:$0xf] }
  0x24   : > { %307 = vst.msk [vmem:[#allocation2 + $0xd0] sm:$0x3] %vm282_vm2, %v13109_v1  ;;  %310 = vst.msk [vmem:[#allocation2 + $0xe8] sm:$0x3] %vm282_vm2, %v13109_v1 }
  0x25   : > { %313 = vst.msk [vmem:[#allocation2 + $0x100] sm:$0x3] %vm282_vm2, %v13109_v1  ;;  %316 = vst.msk [vmem:[#allocation2 + $0x118] sm:$0x3] %vm282_vm2, %v13109_v1 }
  0x26   : > { %319 = vst.msk [vmem:[#allocation2 + $0x130] sm:$0x3] %vm282_vm2, %v13109_v1  ;;  %322 = vst.msk [vmem:[#allocation2 + $0x148] sm:$0x3] %vm282_vm2, %v13109_v1 }
  0x27   : > { %325 = vst.msk [vmem:[#allocation2 + $0x160] sm:$0x3] %vm282_vm2, %v13109_v1  ;;  %328 = vst.msk [vmem:[#allocation2 + $0x178] sm:$0x3] %vm282_vm2, %v13109_v1  ;;  %v434_v8 = vld [vmem:[#allocation2 + $0x9] sm:$0xff] }
  0x28   : > { %331 = vst.msk [vmem:[#allocation2 + $0x190] sm:$0x3] %vm282_vm2, %v13109_v1  ;;  %334 = vst.msk [vmem:[#allocation2 + $0x1a8] sm:$0x3] %vm282_vm2, %v13109_v1  ;;  %9292 = vmatmul.mubr.msk.f32.vlgmr.msra.gmra.mrb[0].mxu0 %vm279_vm1, %v434_v8 }
  0x29   : > { %368 = vst.msk [vmem:[#allocation2 + $0x19] sm:$0xff] %vm279_vm1, %v335_v3  ;;  %369 = vst.msk [vmem:[#allocation2 + $0x21] sm:$0xff] %vm279_vm1, %v336_v4  ;;  %9340 = vmatpush3.msk.msra.mxu0 %vm563_vm0, %v432_v2  ;;  %v400_v3 = vld [vmem:[#allocation2] sm:$0xff]  ;;  %v401_v4 = vld [vmem:[#allocation2 + $0x8] sm:$0xff] }
  0x2a   : > { %370 = vst.msk [vmem:[#allocation2 + $0x31] sm:$0xff] %vm279_vm1, %v337_v5  ;;  %371 = vst.msk [vmem:[#allocation2 + $0x39] sm:$0xff] %vm279_vm1, %v338_v9  ;;  %9389 = vmatprep.subr.msk.mxu0 %vm563_vm0, %v11020_v6 }
  0x2b   : > { %372 = vst.msk [vmem:[#allocation2 + $0x49] sm:$0xff] %vm279_vm1, %v339_v10  ;;  %373 = vst.msk [vmem:[#allocation2 + $0x51] sm:$0xff] %vm279_vm1, %v340_v11 }
  0x2c   : > { %374 = vst.msk [vmem:[#allocation2 + $0x61] sm:$0xff] %vm279_vm1, %v341_v12  ;;  %375 = vst.msk [vmem:[#allocation2 + $0x69] sm:$0xff] %vm279_vm1, %v342_v13 }
  0x2d   : > { %376 = vst.msk [vmem:[#allocation2 + $0x79] sm:$0xff] %vm279_vm1, %v343_v14  ;;  %377 = vst.msk [vmem:[#allocation2 + $0x81] sm:$0xff] %vm279_vm1, %v344_v15 }
  0x2e   : > { %378 = vst.msk [vmem:[#allocation2 + $0x91] sm:$0xff] %vm279_vm1, %v345_v16  ;;  %379 = vst.msk [vmem:[#allocation2 + $0x99] sm:$0xff] %vm279_vm1, %v346_v17 }
  0x2f   : > { %380 = vst.msk [vmem:[#allocation2 + $0xa9] sm:$0xff] %vm279_vm1, %v347_v18  ;;  %381 = vst.msk [vmem:[#allocation2 + $0xb1] sm:$0xff] %vm279_vm1, %v348_v19 }
  0x30   : > { %382 = vst.msk [vmem:[#allocation2 + $0xc1] sm:$0xff] %vm279_vm1, %v349_v20  ;;  %383 = vst.msk [vmem:[#allocation2 + $0xc9] sm:$0xff] %vm279_vm1, %v350_v21  ;;  %v11065_v28 = vld [vmem:[#allocation2 + $0x19] sm:$0xff]  ;;  %v11067_v29 = vld [vmem:[#allocation2 + $0x21] sm:$0xff] }
  0x31   : > { %384 = vst.msk [vmem:[#allocation2 + $0xd9] sm:$0xff] %vm279_vm1, %v351_v22  ;;  %385 = vst.msk [vmem:[#allocation2 + $0xe1] sm:$0xff] %vm279_vm1, %v352_v23  ;;  %v11069_v30 = vld [vmem:[#allocation2 + $0x31] sm:$0xff]  ;;  %9294 = vmatprep.mubr.msk.f32.mxu0 %vm279_vm1, %v11065_v28  ;;  %v11084_v33 = vld [vmem:[#allocation2 + $0x39] sm:$0xff] }
  0x32   : > { %386 = vst.msk [vmem:[#allocation2 + $0xf1] sm:$0xff] %vm279_vm1, %v353_v24  ;;  %387 = vst.msk [vmem:[#allocation2 + $0xf9] sm:$0xff] %vm279_vm1, %v354_v25  ;;  %9295 = vmatmul.mubr.msk.f32.gmra.mrb[2].mxu0 %vm279_vm1, %v11067_v29  ;;  %v11086_v34 = vld [vmem:[#allocation2 + $0x49] sm:$0xff]  ;;  %v11092_v35 = vld [vmem:[#allocation2 + $0x51] sm:$0xff] }
  0x33   : > { %388 = vst.msk [vmem:[#allocation2 + $0x109] sm:$0xff] %vm279_vm1, %v355_v26  ;;  %389 = vst.msk [vmem:[#allocation2 + $0x111] sm:$0xff] %vm279_vm1, %v356_v27  ;;  %9297 = vmatprep.mubr.msk.f32.mxu0 %vm279_vm1, %v11069_v30  ;;  %v11094_v36 = vld [vmem:[#allocation2 + $0x61] sm:$0xff]  ;;  %v11110_v43 = vld [vmem:[#allocation2 + $0x69] sm:$0xff] }
  0x34   : > { %390 = vst.msk [vmem:[#allocation2 + $0x121] sm:$0xff] %vm279_vm1, %v357_v31  ;;  %391 = vst.msk [vmem:[#allocation2 + $0x129] sm:$0xff] %vm279_vm1, %v358_v32  ;;  %v11114_v44 = vld [vmem:[#allocation2 + $0x79] sm:$0xff]  ;;  %v11120_v45 = vld [vmem:[#allocation2 + $0x81] sm:$0xff] }
  0x35   : > { %392 = vst.msk [vmem:[#allocation2 + $0x139] sm:$0xff] %vm279_vm1, %v359_v37  ;;  %393 = vst.msk [vmem:[#allocation2 + $0x141] sm:$0xff] %vm279_vm1, %v360_v38  ;;  %v11122_v46 = vld [vmem:[#allocation2 + $0x91] sm:$0xff]  ;;  %v11128_v47 = vld [vmem:[#allocation2 + $0x99] sm:$0xff] }
  0x36   : > { %9298 = vmatmul.mubr.msk.f32.gmra.mrb[4].mxu0 %vm279_vm1, %v11084_v33  ;;  %394 = vst.msk [vmem:[#allocation2 + $0x151] sm:$0xff] %vm279_vm1, %v361_v39  ;;  %395 = vst.msk [vmem:[#allocation2 + $0x159] sm:$0xff] %vm279_vm1, %v362_v40  ;;  %v11130_v48 = vld [vmem:[#allocation2 + $0xa9] sm:$0xff]  ;;  %v11136_v49 = vld [vmem:[#allocation2 + $0xb1] sm:$0xff] }
  0x37   : > { %9300 = vmatprep.mubr.msk.f32.mxu0 %vm279_vm1, %v11086_v34  ;;  %396 = vst.msk [vmem:[#allocation2 + $0x169] sm:$0xff] %vm279_vm1, %v363_v41  ;;  %397 = vst.msk [vmem:[#allocation2 + $0x171] sm:$0xff] %vm279_vm1, %v364_v42  ;;  %v11138_v50 = vld [vmem:[#allocation2 + $0xc1] sm:$0xff]  ;;  %v11144_v51 = vld [vmem:[#allocation2 + $0xc9] sm:$0xff] }
  0x38   : > { %v11146_v52 = vld [vmem:[#allocation2 + $0xd9] sm:$0xff]  ;;  %v11152_v53 = vld [vmem:[#allocation2 + $0xe1] sm:$0xff]  ;;  %v11219_v9 = vld [vmem:[#allocation2 + $0x30] sm:$0xff] }
  0x39   : > { %v11154_v54 = vld [vmem:[#allocation2 + $0xf1] sm:$0xff]  ;;  %v11160_v55 = vld [vmem:[#allocation2 + $0xf9] sm:$0xff]  ;;  %v11229_v11 = vld [vmem:[#allocation2 + $0x48] sm:$0xff] }
  0x3a   : > { %9301 = vmatmul.mubr.msk.f32.gmra.mrb[6].mxu0 %vm279_vm1, %v11092_v35  ;;  %v11162_v56 = vld [vmem:[#allocation2 + $0x109] sm:$0xff]  ;;  %v11168_v57 = vld [vmem:[#allocation2 + $0x111] sm:$0xff]  ;;  %v11217_v8 = vld [vmem:[#allocation2 + $0x20] sm:$0xff] }
  0x3b   : > { %9303 = vmatprep.mubr.msk.f32.mxu0 %vm279_vm1, %v11094_v36  ;;  %v11170_v58 = vld [vmem:[#allocation2 + $0x121] sm:$0xff]  ;;  %v11176_v59 = vld [vmem:[#allocation2 + $0x129] sm:$0xff]  ;;  %v11205_v5 = vld [vmem:[#allocation2 + $0x18] sm:$0xff] }
  0x3c   : > { %v11178_v60 = vld [vmem:[#allocation2 + $0x139] sm:$0xff]  ;;  %v11184_v61 = vld [vmem:[#allocation2 + $0x141] sm:$0xff]  ;;  %v11253_v16 = vld [vmem:[#allocation2 + $0x90] sm:$0xff] }
  0x3d   : > { %v11186_v62 = vld [vmem:[#allocation2 + $0x151] sm:$0xff]  ;;  %v11192_v63 = vld [vmem:[#allocation2 + $0x159] sm:$0xff]  ;;  %v11243_v13 = vld [vmem:[#allocation2 + $0x68] sm:$0xff] }
  0x3e   : > { %9304 = vmatmul.mubr.msk.f32.gmra.mrb[8].mxu0 %vm279_vm1, %v11110_v43  ;;  %13226 = vst [vmem:[#allocation4_spill] sm:$0xff] %v11186_v62  ;;  %13227 = vst [vmem:[#allocation5_spill] sm:$0xff] %v11192_v63  ;;  %v11194_v0 = vld [vmem:[#allocation2 + $0x169] sm:$0xff]  ;;  %v11200_v2 = vld [vmem:[#allocation2 + $0x171] sm:$0xff] }
  0x3f   : > { %9306 = vmatprep.mubr.msk.f32.mxu0 %vm279_vm1, %v11114_v44  ;;  %13228 = vst [vmem:[#allocation6_spill] sm:$0xff] %v11194_v0  ;;  %13229 = vst [vmem:[#allocation7_spill] sm:$0xff] %v11200_v2  ;;  %v11227_v10 = vld [vmem:[#allocation2 + $0x38] sm:$0xff]  ;;  %v11237_v12 = vld [vmem:[#allocation2 + $0x60] sm:$0xff] }
  0x40   : > { %v11245_v14 = vld [vmem:[#allocation2 + $0x78] sm:$0xff]  ;;  %v11251_v15 = vld [vmem:[#allocation2 + $0x80] sm:$0xff]  ;;  %v11261_v18 = vld [vmem:[#allocation2 + $0xa8] sm:$0xff] }
  0x41   : > { %v11259_v17 = vld [vmem:[#allocation2 + $0x98] sm:$0xff]  ;;  %v11267_v19 = vld [vmem:[#allocation2 + $0xb0] sm:$0xff]  ;;  %v11269_v20 = vld [vmem:[#allocation2 + $0xc0] sm:$0xff] }
  0x42   : > { %9307 = vmatmul.mubr.msk.f32.gmra.mrb[10].mxu0 %vm279_vm1, %v11120_v45  ;;  %v11275_v21 = vld [vmem:[#allocation2 + $0xc8] sm:$0xff]  ;;  %v11277_v22 = vld [vmem:[#allocation2 + $0xd8] sm:$0xff]  ;;  %v11283_v23 = vld [vmem:[#allocation2 + $0xe0] sm:$0xff] }
  0x43   : > { %9309 = vmatprep.mubr.msk.f32.mxu0 %vm279_vm1, %v11122_v46  ;;  %v11285_v24 = vld [vmem:[#allocation2 + $0xf0] sm:$0xff]  ;;  %v11291_v25 = vld [vmem:[#allocation2 + $0xf8] sm:$0xff]  ;;  %v11293_v26 = vld [vmem:[#allocation2 + $0x108] sm:$0xff] }
  0x44   : > { %v11299_v27 = vld [vmem:[#allocation2 + $0x110] sm:$0xff]  ;;  %v11301_v31 = vld [vmem:[#allocation2 + $0x120] sm:$0xff]  ;;  %v11307_v32 = vld [vmem:[#allocation2 + $0x128] sm:$0xff] }
  0x45   : > { %v11309_v37 = vld [vmem:[#allocation2 + $0x138] sm:$0xff]  ;;  %v11315_v38 = vld [vmem:[#allocation2 + $0x140] sm:$0xff]  ;;  %v11317_v39 = vld [vmem:[#allocation2 + $0x150] sm:$0xff] }
  0x46   : > { %9310 = vmatmul.mubr.msk.f32.gmra.mrb[12].mxu0 %vm279_vm1, %v11128_v47  ;;  %v365_v40 = vld [vmem:[%s11012_s10 + $0xf0] sm:$0xff]  ;;  %v366_v41 = vld [vmem:[%s11012_s10 + $0xf8] sm:$0xff] }
  0x47   : > { %9312 = vmatprep.mubr.msk.f32.mxu0 %vm279_vm1, %v11130_v48  ;;  %398 = vst.msk [vmem:[#allocation2 + $0x181] sm:$0xff] %vm279_vm1, %v365_v40  ;;  %399 = vst.msk [vmem:[#allocation2 + $0x189] sm:$0xff] %vm279_vm1, %v366_v41  ;;  %v11327_v42 = vld [vmem:[#allocation2 + $0x158] sm:$0xff]  ;;  %v1116_v40 = vld [vmem:[#allocation2 + $0x2] sm:$0xff] }
  0x48   : > { %v1117_v41 = vld [vmem:[#allocation2 + $0xa] sm:$0xff]  ;;  %v11340_v1 = vld [vmem:[#allocation2 + $0x1a] sm:$0xff] }
  0x49   : > { %13230 = vst [vmem:[#allocation8_spill] sm:$0xff] %v11340_v1 }
  0x4a   : > { %9313 = vmatmul.mubr.msk.f32.gmra.mrb[14].mxu0 %vm279_vm1, %v11136_v49 }
  0x4b   : > { %9315 = vmatprep.mubr.msk.f32.mxu0 %vm279_vm1, %v11138_v50 }
  0x4e   : > { %9316 = vmatmul.mubr.msk.f32.gmra.mrb[16].mxu0 %vm279_vm1, %v11144_v51 }
  0x4f   : > { %9318 = vmatprep.mubr.msk.f32.mxu0 %vm279_vm1, %v11146_v52 }
  0x52   : > { %9319 = vmatmul.mubr.msk.f32.gmra.mrb[18].mxu0 %vm279_vm1, %v11152_v53 }
  0x53   : > { %9321 = vmatprep.mubr.msk.f32.mxu0 %vm279_vm1, %v11154_v54 }
  0x56   : > { %9322 = vmatmul.mubr.msk.f32.gmra.mrb[20].mxu0 %vm279_vm1, %v11160_v55 }
  0x57   : > { %9324 = vmatprep.mubr.msk.f32.mxu0 %vm279_vm1, %v11162_v56 }
  0x5a   : > { %9325 = vmatmul.mubr.msk.f32.gmra.mrb[22].mxu0 %vm279_vm1, %v11168_v57 }
  0x5b   : > { %9327 = vmatprep.mubr.msk.f32.mxu0 %vm279_vm1, %v11170_v58 }
  0x5e   : > { %9328 = vmatmul.mubr.msk.f32.gmra.mrb[24].mxu0 %vm279_vm1, %v11176_v59 }
  0x5f   : > { %9330 = vmatprep.mubr.msk.f32.mxu0 %vm279_vm1, %v11178_v60 }
  0x62   : > { %9331 = vmatmul.mubr.msk.f32.gmra.mrb[26].mxu0 %vm279_vm1, %v11184_v61 }
  0x63   : > { %9333 = vmatprep.mubr.msk.f32.mxu0 %vm279_vm1, %v11186_v62 }
  0x66   : > { %9334 = vmatmul.mubr.msk.f32.gmra.mrb[28].mxu0 %vm279_vm1, %v11192_v63  ;;  %v11354_v63 = vld [vmem:[#allocation2 + $0x32] sm:$0xff] }
  0x67   : > { %9336 = vmatprep.mubr.msk.f32.mxu0 %vm279_vm1, %v11194_v0  ;;  %v11352_v0 = vld [vmem:[#allocation2 + $0x22] sm:$0xff]  ;;  %13232 = vst [vmem:[#allocation10_spill] sm:$0xff] %v11354_v63 }
  0x68   : > { %13231 = vst [vmem:[#allocation9_spill] sm:$0xff] %v11352_v0 }
  0x6a   : > { %9337 = vmatmul.mubr.msk.f32.gmra.mrb[30].mxu0 %vm279_vm1, %v11200_v2  ;;  %v11345_v2 = vld [vmem:[%s13102_s1 + $0x10] sm:$0xf] }
  0x6b   : > { %9341 = vmatprep.mubr.msk.f32.mxu0 %vm279_vm1, %v400_v3  ;;  %v11329_v3 = vld [vmem:[#allocation2 + $0x168] sm:$0xff] }
  0x6e   : > { %9342 = vmatmul.mubr.msk.f32.vlgmr.msra.gmra.mrb[0].mxu0 %vm279_vm1, %v401_v4  ;;  %v11335_v4 = vld [vmem:[#allocation2 + $0x170] sm:$0xff] }
  0x6f   : > { %9390 = vmatpush3.msk.msra.mxu0 %vm563_vm0, %v11020_v6  ;;  %9344 = vmatprep.mubr.msk.f32.mxu0 %vm279_vm1, %v11205_v5  ;;  %v11235_v6 = vld [vmem:[#allocation2 + $0x50] sm:$0xff] }
  0x70   : > { %9439 = vmatprep.subr.msk.mxu0 %vm563_vm0, %v11210_v7 }
  0x72   : > { %9345 = vmatmul.mubr.msk.f32.gmra.mrb[2].mxu0 %vm279_vm1, %v11217_v8 }
  0x73   : > { %9347 = vmatprep.mubr.msk.f32.mxu0 %vm279_vm1, %v11219_v9 }
  0x76   : > { %9348 = vmatmul.mubr.msk.f32.gmra.mrb[4].mxu0 %vm279_vm1, %v11227_v10 }
  0x77   : > { %9350 = vmatprep.mubr.msk.f32.mxu0 %vm279_vm1, %v11229_v11 }
  0x7a   : > { %9351 = vmatmul.mubr.msk.f32.gmra.mrb[6].mxu0 %vm279_vm1, %v11235_v6 }
  0x7b   : > { %9353 = vmatprep.mubr.msk.f32.mxu0 %vm279_vm1, %v11237_v12 }
  0x7e   : > { %9354 = vmatmul.mubr.msk.f32.gmra.mrb[8].mxu0 %vm279_vm1, %v11243_v13 }
  0x7f   : > { %9356 = vmatprep.mubr.msk.f32.mxu0 %vm279_vm1, %v11245_v14 }
  0x82   : > { %9357 = vmatmul.mubr.msk.f32.gmra.mrb[10].mxu0 %vm279_vm1, %v11251_v15 }
  0x83   : > { %9359 = vmatprep.mubr.msk.f32.mxu0 %vm279_vm1, %v11253_v16 }
  0x86   : > { %9360 = vmatmul.mubr.msk.f32.gmra.mrb[12].mxu0 %vm279_vm1, %v11259_v17 }
  0x87   : > { %9362 = vmatprep.mubr.msk.f32.mxu0 %vm279_vm1, %v11261_v18 }
  0x8a   : > { %9363 = vmatmul.mubr.msk.f32.gmra.mrb[14].mxu0 %vm279_vm1, %v11267_v19 }
  0x8b   : > { %9365 = vmatprep.mubr.msk.f32.mxu0 %vm279_vm1, %v11269_v20 }
  0x8e   : > { %9366 = vmatmul.mubr.msk.f32.gmra.mrb[16].mxu0 %vm279_vm1, %v11275_v21 }
  0x8f   : > { %9368 = vmatprep.mubr.msk.f32.mxu0 %vm279_vm1, %v11277_v22 }
  0x92   : > { %9369 = vmatmul.mubr.msk.f32.gmra.mrb[18].mxu0 %vm279_vm1, %v11283_v23 }
  0x93   : > { %9371 = vmatprep.mubr.msk.f32.mxu0 %vm279_vm1, %v11285_v24 }
  0x96   : > { %9372 = vmatmul.mubr.msk.f32.gmra.mrb[20].mxu0 %vm279_vm1, %v11291_v25 }
  0x97   : > { %9374 = vmatprep.mubr.msk.f32.mxu0 %vm279_vm1, %v11293_v26 }
  0x9a   : > { %9375 = vmatmul.mubr.msk.f32.gmra.mrb[22].mxu0 %vm279_vm1, %v11299_v27 }
  0x9b   : > { %9377 = vmatprep.mubr.msk.f32.mxu0 %vm279_vm1, %v11301_v31 }
  0x9e   : > { %9378 = vmatmul.mubr.msk.f32.gmra.mrb[24].mxu0 %vm279_vm1, %v11307_v32 }
  0x9f   : > { %9380 = vmatprep.mubr.msk.f32.mxu0 %vm279_vm1, %v11309_v37 }
  0xa2   : > { %9381 = vmatmul.mubr.msk.f32.gmra.mrb[26].mxu0 %vm279_vm1, %v11315_v38 }
  0xa3   : > { %9383 = vmatprep.mubr.msk.f32.mxu0 %vm279_vm1, %v11317_v39 }
  0xa6   : > { %9384 = vmatmul.mubr.msk.f32.gmra.mrb[28].mxu0 %vm279_vm1, %v11327_v42 }
  0xa7   : > { %9386 = vmatprep.mubr.msk.f32.mxu0 %vm279_vm1, %v11329_v3 }
  0xaa   : > { %9387 = vmatmul.mubr.msk.f32.gmra.mrb[30].mxu0 %vm279_vm1, %v11335_v4 }
  0xab   : > { %9391 = vmatprep.mubr.msk.f32.mxu0 %vm279_vm1, %v1116_v40  ;;  %v11362_v40 = vld [vmem:[#allocation2 + $0x3a] sm:$0xff] }
  0xac   : > { %13233 = vst [vmem:[#allocation11_spill] sm:$0xff] %v11362_v40 }
  0xae   : > { %9392 = vmatmul.mubr.msk.f32.vlgmr.msra.gmra.mrb[0].mxu0 %vm279_vm1, %v1117_v41  ;;  %v11364_v41 = vld [vmem:[#allocation2 + $0x4a] sm:$0xff] }
  0xaf   : > { %9440 = vmatpush3.msk.msra.mxu0 %vm563_vm0, %v11210_v7  ;;  %9394 = vmatprep.mubr.msk.f32.mxu0 %vm279_vm1, %v11340_v1  ;;  %13234 = vst [vmem:[#allocation12_spill] sm:$0xff] %v11364_v41  ;;  %v11370_v7 = vld [vmem:[#allocation2 + $0x52] sm:$0xff]  ;;  %v11372_v1 = vld [vmem:[#allocation2 + $0x62] sm:$0xff] }
  0xb0   : > { %9489 = vmatprep.subr.msk.mxu0 %vm563_vm0, %v11345_v2  ;;  %13235 = vst [vmem:[#allocation13_spill] sm:$0xff] %v11370_v7  ;;  %13236 = vst [vmem:[#allocation14_spill] sm:$0xff] %v11372_v1 }
  0xb2   : > { %9395 = vmatmul.mubr.msk.f32.gmra.mrb[2].mxu0 %vm279_vm1, %v11352_v0  ;;  %v11380_v0 = vld [vmem:[#allocation2 + $0x7a] sm:$0xff] }
  0xb3   : > { %9397 = vmatprep.mubr.msk.f32.mxu0 %vm279_vm1, %v11354_v63  ;;  %v11378_v63 = vld [vmem:[#allocation2 + $0x6a] sm:$0xff]  ;;  %13238 = vst [vmem:[#allocation16_spill] sm:$0xff] %v11380_v0 }
  0xb4   : > { %13237 = vst [vmem:[#allocation15_spill] sm:$0xff] %v11378_v63 }
  0xb6   : > { %9398 = vmatmul.mubr.msk.f32.gmra.mrb[4].mxu0 %vm279_vm1, %v11362_v40  ;;  %v11388_v40 = vld [vmem:[#allocation2 + $0x92] sm:$0xff] }
  0xb7   : > { %9400 = vmatprep.mubr.msk.f32.mxu0 %vm279_vm1, %v11364_v41  ;;  %v11386_v41 = vld [vmem:[#allocation2 + $0x82] sm:$0xff]  ;;  %13240 = vst [vmem:[#allocation18_spill] sm:$0xff] %v11388_v40 }
  0xb8   : > { %13239 = vst [vmem:[#allocation17_spill] sm:$0xff] %v11386_v41 }
  0xba   : > { %9401 = vmatmul.mubr.msk.f32.gmra.mrb[6].mxu0 %vm279_vm1, %v11370_v7  ;;  %v11396_v7 = vld [vmem:[#allocation2 + $0xaa] sm:$0xff] }
  0xbb   : > { %9403 = vmatprep.mubr.msk.f32.mxu0 %vm279_vm1, %v11372_v1  ;;  %v11394_v1 = vld [vmem:[#allocation2 + $0x9a] sm:$0xff]  ;;  %13242 = vst [vmem:[#allocation20_spill] sm:$0xff] %v11396_v7 }
  0xbc   : > { %13241 = vst [vmem:[#allocation19_spill] sm:$0xff] %v11394_v1 }
  0xbe   : > { %9404 = vmatmul.mubr.msk.f32.gmra.mrb[8].mxu0 %vm279_vm1, %v11378_v63  ;;  %v11404_v63 = vld [vmem:[#allocation2 + $0xc2] sm:$0xff] }
  0xbf   : > { %9406 = vmatprep.mubr.msk.f32.mxu0 %vm279_vm1, %v11380_v0  ;;  %v11402_v0 = vld [vmem:[#allocation2 + $0xb2] sm:$0xff]  ;;  %13244 = vst [vmem:[#allocation22_spill] sm:$0xff] %v11404_v63 }
  0xc0   : > { %13243 = vst [vmem:[#allocation21_spill] sm:$0xff] %v11402_v0 }
  0xc2   : > { %9407 = vmatmul.mubr.msk.f32.gmra.mrb[10].mxu0 %vm279_vm1, %v11386_v41  ;;  %v11412_v41 = vld [vmem:[#allocation2 + $0xda] sm:$0xff] }
  0xc3   : > { %9409 = vmatprep.mubr.msk.f32.mxu0 %vm279_vm1, %v11388_v40  ;;  %v11410_v40 = vld [vmem:[#allocation2 + $0xca] sm:$0xff]  ;;  %13246 = vst [vmem:[#allocation24_spill] sm:$0xff] %v11412_v41 }
  0xc4   : > { %13245 = vst [vmem:[#allocation23_spill] sm:$0xff] %v11410_v40 }
  0xc6   : > { %9410 = vmatmul.mubr.msk.f32.gmra.mrb[12].mxu0 %vm279_vm1, %v11394_v1  ;;  %v11420_v1 = vld [vmem:[#allocation2 + $0xf2] sm:$0xff] }
  0xc7   : > { %9412 = vmatprep.mubr.msk.f32.mxu0 %vm279_vm1, %v11396_v7  ;;  %v11418_v7 = vld [vmem:[#allocation2 + $0xe2] sm:$0xff]  ;;  %13248 = vst [vmem:[#allocation26_spill] sm:$0xff] %v11420_v1 }
  0xc8   : > { %13247 = vst [vmem:[#allocation25_spill] sm:$0xff] %v11418_v7 }
  0xca   : > { %9413 = vmatmul.mubr.msk.f32.gmra.mrb[14].mxu0 %vm279_vm1, %v11402_v0  ;;  %v11428_v0 = vld [vmem:[#allocation2 + $0x10a] sm:$0xff] }
  0xcb   : > { %9415 = vmatprep.mubr.msk.f32.mxu0 %vm279_vm1, %v11404_v63  ;;  %v11426_v63 = vld [vmem:[#allocation2 + $0xfa] sm:$0xff]  ;;  %13250 = vst [vmem:[#allocation28_spill] sm:$0xff] %v11428_v0 }
  0xcc   : > { %13249 = vst [vmem:[#allocation27_spill] sm:$0xff] %v11426_v63 }
  0xce   : > { %9416 = vmatmul.mubr.msk.f32.gmra.mrb[16].mxu0 %vm279_vm1, %v11410_v40  ;;  %v11436_v40 = vld [vmem:[#allocation2 + $0x122] sm:$0xff] }
  0xcf   : > { %9418 = vmatprep.mubr.msk.f32.mxu0 %vm279_vm1, %v11412_v41  ;;  %v11434_v41 = vld [vmem:[#allocation2 + $0x112] sm:$0xff]  ;;  %13252 = vst [vmem:[#allocation30_spill] sm:$0xff] %v11436_v40 }
  0xd0   : > { %13251 = vst [vmem:[#allocation29_spill] sm:$0xff] %v11434_v41 }
  0xd2   : > { %9419 = vmatmul.mubr.msk.f32.gmra.mrb[18].mxu0 %vm279_vm1, %v11418_v7  ;;  %v11444_v7 = vld [vmem:[#allocation2 + $0x13a] sm:$0xff] }
  0xd3   : > { %9421 = vmatprep.mubr.msk.f32.mxu0 %vm279_vm1, %v11420_v1  ;;  %v11442_v1 = vld [vmem:[#allocation2 + $0x12a] sm:$0xff]  ;;  %13253 = vst [vmem:[#allocation31_spill] sm:$0xff] %v11444_v7 }
  0xd6   : > { %9422 = vmatmul.mubr.msk.f32.gmra.mrb[20].mxu0 %vm279_vm1, %v11426_v63  ;;  %v11452_v63 = vld [vmem:[#allocation2 + $0x152] sm:$0xff] }
  0xd7   : > { %9424 = vmatprep.mubr.msk.f32.mxu0 %vm279_vm1, %v11428_v0  ;;  %v11450_v0 = vld [vmem:[#allocation2 + $0x142] sm:$0xff]  ;;  %13254 = vst [vmem:[#allocation32_spill] sm:$0xff] %v11452_v63 }
  0xda   : > { %9425 = vmatmul.mubr.msk.f32.gmra.mrb[22].mxu0 %vm279_vm1, %v11434_v41  ;;  %v11460_v41 = vld [vmem:[#allocation2 + $0x16a] sm:$0xff] }
  0xdb   : > { %9427 = vmatprep.mubr.msk.f32.mxu0 %vm279_vm1, %v11436_v40  ;;  %v11458_v40 = vld [vmem:[#allocation2 + $0x15a] sm:$0xff]  ;;  %13255 = vst [vmem:[#allocation33_spill] sm:$0xff] %v11460_v41 }
  0xde   : > { %9428 = vmatmul.mubr.msk.f32.gmra.mrb[24].mxu0 %vm279_vm1, %v11442_v1 }
  0xdf   : > { %9430 = vmatprep.mubr.msk.f32.mxu0 %vm279_vm1, %v11444_v7  ;;  %v11466_v7 = vld [vmem:[#allocation2 + $0x172] sm:$0xff] }
  0xe2   : > { %9431 = vmatmul.mubr.msk.f32.gmra.mrb[26].mxu0 %vm279_vm1, %v11450_v0 }
  0xe3   : > { %9433 = vmatprep.mubr.msk.f32.mxu0 %vm279_vm1, %v11452_v63  ;;  %v8190_v63 = vld [vmem:[%s13102_s1 + $0x14] sm:$0xf] }
  0xe6   : > { %9434 = vmatmul.mubr.msk.f32.gmra.mrb[28].mxu0 %vm279_vm1, %v11458_v40 }
  0xe7   : > { %9436 = vmatprep.mubr.msk.f32.mxu0 %vm279_vm1, %v11460_v41 }
  0xea   : > { %9437 = vmatmul.mubr.msk.f32.gmra.mrb[30].mxu0 %vm279_vm1, %v11466_v7 }
  0xeb   : > { %9441 = vmatprep.mubr.msk.f32.mxu0 %vm279_vm1, %v11205_v5  ;;  %v11540_v5 = vld [vmem:[#allocation2 + $0x188] sm:$0xff] }
  0xee   : > { %9442 = vmatmul.mubr.msk.f32.vlgmr.msra.gmra.mrb[0].mxu0 %vm279_vm1, %v11217_v8  ;;  %v8224_v8 = vld [vmem:[%s13102_s1 + $0x18] sm:$0xf] }
  0xef   : > { %9490 = vmatpush3.msk.msra.mxu0 %vm563_vm0, %v11345_v2  ;;  %9444 = vmatprep.mubr.msk.f32.mxu0 %vm279_vm1, %v11219_v9  ;;  %v11534_v2 = vld [vmem:[#allocation2 + $0x180] sm:$0xff] }
  0xf0   : > { %9539 = vmatprep.subr.msk.mxu0 %vm563_vm0, %v8190_v63 }
  0xf2   : > { %9445 = vmatmul.mubr.msk.f32.gmra.mrb[2].mxu0 %vm279_vm1, %v11227_v10 }
  0xf3   : > { %9447 = vmatprep.mubr.msk.f32.mxu0 %vm279_vm1, %v11229_v11 }
  0xf6   : > { %9448 = vmatmul.mubr.msk.f32.gmra.mrb[4].mxu0 %vm279_vm1, %v11235_v6 }
  0xf7   : > { %9450 = vmatprep.mubr.msk.f32.mxu0 %vm279_vm1, %v11237_v12 }
  0xfa   : > { %9451 = vmatmul.mubr.msk.f32.gmra.mrb[6].mxu0 %vm279_vm1, %v11243_v13 }
  0xfb   : > { %9453 = vmatprep.mubr.msk.f32.mxu0 %vm279_vm1, %v11245_v14 }
  0xfe   : > { %9454 = vmatmul.mubr.msk.f32.gmra.mrb[8].mxu0 %vm279_vm1, %v11251_v15 }
  0xff   : > { %9456 = vmatprep.mubr.msk.f32.mxu0 %vm279_vm1, %v11253_v16 }
 0x102   : > { %9457 = vmatmul.mubr.msk.f32.gmra.mrb[10].mxu0 %vm279_vm1, %v11259_v17 }
 0x103   : > { %9459 = vmatprep.mubr.msk.f32.mxu0 %vm279_vm1, %v11261_v18 }
 0x106   : > { %9460 = vmatmul.mubr.msk.f32.gmra.mrb[12].mxu0 %vm279_vm1, %v11267_v19 }
 0x107   : > { %9462 = vmatprep.mubr.msk.f32.mxu0 %vm279_vm1, %v11269_v20 }
 0x10a   : > { %9463 = vmatmul.mubr.msk.f32.gmra.mrb[14].mxu0 %vm279_vm1, %v11275_v21 }
 0x10b   : > { %9465 = vmatprep.mubr.msk.f32.mxu0 %vm279_vm1, %v11277_v22 }
 0x10e   : > { %9466 = vmatmul.mubr.msk.f32.gmra.mrb[16].mxu0 %vm279_vm1, %v11283_v23 }
 0x10f   : > { %9468 = vmatprep.mubr.msk.f32.mxu0 %vm279_vm1, %v11285_v24 }
 0x112   : > { %9469 = vmatmul.mubr.msk.f32.gmra.mrb[18].mxu0 %vm279_vm1, %v11291_v25 }
 0x113   : > { %9471 = vmatprep.mubr.msk.f32.mxu0 %vm279_vm1, %v11293_v26 }
 0x116   : > { %9472 = vmatmul.mubr.msk.f32.gmra.mrb[20].mxu0 %vm279_vm1, %v11299_v27 }
 0x117   : > { %9474 = vmatprep.mubr.msk.f32.mxu0 %vm279_vm1, %v11301_v31 }
 0x11a   : > { %9475 = vmatmul.mubr.msk.f32.gmra.mrb[22].mxu0 %vm279_vm1, %v11307_v32 }
 0x11b   : > { %9477 = vmatprep.mubr.msk.f32.mxu0 %vm279_vm1, %v11309_v37 }
 0x11e   : > { %9478 = vmatmul.mubr.msk.f32.gmra.mrb[24].mxu0 %vm279_vm1, %v11315_v38 }
 0x11f   : > { %9480 = vmatprep.mubr.msk.f32.mxu0 %vm279_vm1, %v11317_v39 }
 0x122   : > { %9481 = vmatmul.mubr.msk.f32.gmra.mrb[26].mxu0 %vm279_vm1, %v11327_v42 }
 0x123   : > { %9483 = vmatprep.mubr.msk.f32.mxu0 %vm279_vm1, %v11329_v3 }
 0x126   : > { %9484 = vmatmul.mubr.msk.f32.gmra.mrb[28].mxu0 %vm279_vm1, %v11335_v4 }
 0x127   : > { %9486 = vmatprep.mubr.msk.f32.mxu0 %vm279_vm1, %v11534_v2 }
 0x12a   : > { %9487 = vmatmul.mubr.msk.f32.gmra.mrb[30].mxu0 %vm279_vm1, %v11540_v5 }
 0x12b   : > { %9491 = vmatprep.mubr.msk.f32.mxu0 %vm279_vm1, %v11065_v28  ;;  %v13256_v28 = vld [vmem:[#allocation5_spill] sm:$0xff] }
 0x12e   : > { %9492 = vmatmul.mubr.msk.f32.vlgmr.msra.gmra.mrb[0].mxu0 %vm279_vm1, %v11067_v29  ;;  %v13257_v29 = vld [vmem:[#allocation6_spill] sm:$0xff] }
 0x12f   : > { %9540 = vmatpush3.msk.msra.mxu0 %vm563_vm0, %v8190_v63  ;;  %9494 = vmatprep.mubr.msk.f32.mxu0 %vm279_vm1, %v11069_v30  ;;  %v11607_v30 = vld [vmem:[#allocation2 + $0x181] sm:$0xff]  ;;  %v8258_v63 = vld [vmem:[%s13102_s1 + $0x1c] sm:$0xf] }
 0x130   : > { %9589 = vmatprep.subr.msk.mxu0 %vm563_vm0, %v8224_v8  ;;  %13258 = vst [vmem:[#allocation34_spill] sm:$0xff] %v11607_v30 }
 0x132   : > { %9495 = vmatmul.mubr.msk.f32.gmra.mrb[2].mxu0 %vm279_vm1, %v11084_v33  ;;  %v13259_v33 = vld [vmem:[#allocation7_spill] sm:$0xff] }
 0x133   : > { %9497 = vmatprep.mubr.msk.f32.mxu0 %vm279_vm1, %v11086_v34  ;;  %v11613_v34 = vld [vmem:[#allocation2 + $0x189] sm:$0xff] }
 0x134   : > { %13260 = vst [vmem:[#allocation35_spill] sm:$0xff] %v11613_v34 }
 0x136   : > { %9498 = vmatmul.mubr.msk.f32.gmra.mrb[4].mxu0 %vm279_vm1, %v11092_v35  ;;  %v13261_v35 = vld [vmem:[#allocation8_spill] sm:$0xff] }
 0x137   : > { %9500 = vmatprep.mubr.msk.f32.mxu0 %vm279_vm1, %v11094_v36 }
 0x13a   : > { %9501 = vmatmul.mubr.msk.f32.gmra.mrb[6].mxu0 %vm279_vm1, %v11110_v43 }
 0x13b   : > { %9503 = vmatprep.mubr.msk.f32.mxu0 %vm279_vm1, %v11114_v44 }
 0x13e   : > { %9504 = vmatmul.mubr.msk.f32.gmra.mrb[8].mxu0 %vm279_vm1, %v11120_v45 }
 0x13f   : > { %9506 = vmatprep.mubr.msk.f32.mxu0 %vm279_vm1, %v11122_v46 }
 0x142   : > { %9507 = vmatmul.mubr.msk.f32.gmra.mrb[10].mxu0 %vm279_vm1, %v11128_v47 }
 0x143   : > { %9509 = vmatprep.mubr.msk.f32.mxu0 %vm279_vm1, %v11130_v48 }
 0x146   : > { %9510 = vmatmul.mubr.msk.f32.gmra.mrb[12].mxu0 %vm279_vm1, %v11136_v49 }
 0x147   : > { %9512 = vmatprep.mubr.msk.f32.mxu0 %vm279_vm1, %v11138_v50 }
 0x14a   : > { %9513 = vmatmul.mubr.msk.f32.gmra.mrb[14].mxu0 %vm279_vm1, %v11144_v51 }
 0x14b   : > { %9515 = vmatprep.mubr.msk.f32.mxu0 %vm279_vm1, %v11146_v52 }
 0x14e   : > { %9516 = vmatmul.mubr.msk.f32.gmra.mrb[16].mxu0 %vm279_vm1, %v11152_v53 }
 0x14f   : > { %9518 = vmatprep.mubr.msk.f32.mxu0 %vm279_vm1, %v11154_v54 }
 0x152   : > { %9519 = vmatmul.mubr.msk.f32.gmra.mrb[18].mxu0 %vm279_vm1, %v11160_v55 }
 0x153   : > { %9521 = vmatprep.mubr.msk.f32.mxu0 %vm279_vm1, %v11162_v56 }
 0x156   : > { %9522 = vmatmul.mubr.msk.f32.gmra.mrb[20].mxu0 %vm279_vm1, %v11168_v57 }
 0x157   : > { %9524 = vmatprep.mubr.msk.f32.mxu0 %vm279_vm1, %v11170_v58 }
 0x15a   : > { %9525 = vmatmul.mubr.msk.f32.gmra.mrb[22].mxu0 %vm279_vm1, %v11176_v59 }
 0x15b   : > { %9527 = vmatprep.mubr.msk.f32.mxu0 %vm279_vm1, %v11178_v60 }
 0x15e   : > { %9528 = vmatmul.mubr.msk.f32.gmra.mrb[24].mxu0 %vm279_vm1, %v11184_v61 }
 0x15f   : > { %9530 = vmatprep.mubr.msk.f32.mxu0 %vm279_vm1, %v11186_v62  ;;  %v13271_v62 = vld [vmem:[#allocation18_spill] sm:$0xff] }
 0x162   : > { %9531 = vmatmul.mubr.msk.f32.gmra.mrb[26].mxu0 %vm279_vm1, %v13256_v28  ;;  %v13267_v28 = vld [vmem:[#allocation14_spill] sm:$0xff] }
 0x163   : > { %9533 = vmatprep.mubr.msk.f32.mxu0 %vm279_vm1, %v13257_v29  ;;  %v13262_v29 = vld [vmem:[#allocation9_spill] sm:$0xff] }
 0x166   : > { %9534 = vmatmul.mubr.msk.f32.gmra.mrb[28].mxu0 %vm279_vm1, %v13259_v33  ;;  %v13263_v33 = vld [vmem:[#allocation10_spill] sm:$0xff] }
 0x167   : > { %9536 = vmatprep.mubr.msk.f32.mxu0 %vm279_vm1, %v11607_v30  ;;  %v13264_v30 = vld [vmem:[#allocation11_spill] sm:$0xff] }
 0x16a   : > { %9537 = vmatmul.mubr.msk.f32.gmra.mrb[30].mxu0 %vm279_vm1, %v11613_v34  ;;  %v13265_v34 = vld [vmem:[#allocation12_spill] sm:$0xff] }
 0x16b   : > { %9541 = vmatprep.mubr.msk.f32.mxu0 %vm279_vm1, %v13261_v35  ;;  %v13266_v35 = vld [vmem:[#allocation13_spill] sm:$0xff] }
 0x16e   : > { %9542 = vmatmul.mubr.msk.f32.vlgmr.msra.gmra.mrb[0].mxu0 %vm279_vm1, %v13262_v29  ;;  %v13268_v29 = vld [vmem:[#allocation15_spill] sm:$0xff] }
 0x16f   : > { %9590 = vmatpush3.msk.msra.mxu0 %vm563_vm0, %v8224_v8  ;;  %9544 = vmatprep.mubr.msk.f32.mxu0 %vm279_vm1, %v13263_v33  ;;  %v13269_v8 = vld [vmem:[#allocation16_spill] sm:$0xff]  ;;  %v13270_v33 = vld [vmem:[#allocation17_spill] sm:$0xff] }
 0x170   : > { %9639 = vmatprep.subr.msk.mxu0 %vm563_vm0, %v8258_v63 }
 0x172   : > { %9545 = vmatmul.mubr.msk.f32.gmra.mrb[2].mxu0 %vm279_vm1, %v13264_v30  ;;  %v13272_v30 = vld [vmem:[#allocation19_spill] sm:$0xff] }
 0x173   : > { %9547 = vmatprep.mubr.msk.f32.mxu0 %vm279_vm1, %v13265_v34  ;;  %v13273_v34 = vld [vmem:[#allocation20_spill] sm:$0xff] }
 0x176   : > { %9548 = vmatmul.mubr.msk.f32.gmra.mrb[4].mxu0 %vm279_vm1, %v13266_v35  ;;  %v13274_v35 = vld [vmem:[#allocation21_spill] sm:$0xff] }
 0x177   : > { %9550 = vmatprep.mubr.msk.f32.mxu0 %vm279_vm1, %v13267_v28  ;;  %v13275_v28 = vld [vmem:[#allocation22_spill] sm:$0xff] }
 0x17a   : > { %9551 = vmatmul.mubr.msk.f32.gmra.mrb[6].mxu0 %vm279_vm1, %v13268_v29  ;;  %v13276_v29 = vld [vmem:[#allocation23_spill] sm:$0xff] }
 0x17b   : > { %9553 = vmatprep.mubr.msk.f32.mxu0 %vm279_vm1, %v13269_v8  ;;  %v13277_v8 = vld [vmem:[#allocation24_spill] sm:$0xff] }
 0x17e   : > { %9554 = vmatmul.mubr.msk.f32.gmra.mrb[8].mxu0 %vm279_vm1, %v13270_v33  ;;  %v13278_v33 = vld [vmem:[#allocation25_spill] sm:$0xff] }
 0x17f   : > { %9556 = vmatprep.mubr.msk.f32.mxu0 %vm279_vm1, %v13271_v62  ;;  %v13279_v62 = vld [vmem:[#allocation26_spill] sm:$0xff] }
 0x182   : > { %9557 = vmatmul.mubr.msk.f32.gmra.mrb[10].mxu0 %vm279_vm1, %v13272_v30  ;;  %v13280_v30 = vld [vmem:[#allocation27_spill] sm:$0xff] }
 0x183   : > { %9559 = vmatprep.mubr.msk.f32.mxu0 %vm279_vm1, %v13273_v34  ;;  %v13281_v34 = vld [vmem:[#allocation28_spill] sm:$0xff] }
 0x186   : > { %9560 = vmatmul.mubr.msk.f32.gmra.mrb[12].mxu0 %vm279_vm1, %v13274_v35  ;;  %v13282_v35 = vld [vmem:[#allocation29_spill] sm:$0xff] }
 0x187   : > { %9562 = vmatprep.mubr.msk.f32.mxu0 %vm279_vm1, %v13275_v28  ;;  %v13283_v28 = vld [vmem:[#allocation30_spill] sm:$0xff] }
 0x18a   : > { %9563 = vmatmul.mubr.msk.f32.gmra.mrb[14].mxu0 %vm279_vm1, %v13276_v29 }
 0x18b   : > { %9565 = vmatprep.mubr.msk.f32.mxu0 %vm279_vm1, %v13277_v8  ;;  %v13284_v8 = vld [vmem:[#allocation31_spill] sm:$0xff] }
 0x18e   : > { %9566 = vmatmul.mubr.msk.f32.gmra.mrb[16].mxu0 %vm279_vm1, %v13278_v33 }
 0x18f   : > { %9568 = vmatprep.mubr.msk.f32.mxu0 %vm279_vm1, %v13279_v62  ;;  %v13285_v62 = vld [vmem:[#allocation32_spill] sm:$0xff] }
 0x192   : > { %9569 = vmatmul.mubr.msk.f32.gmra.mrb[18].mxu0 %vm279_vm1, %v13280_v30 }
 0x193   : > { %9571 = vmatprep.mubr.msk.f32.mxu0 %vm279_vm1, %v13281_v34 }
 0x196   : > { %9572 = vmatmul.mubr.msk.f32.gmra.mrb[20].mxu0 %vm279_vm1, %v13282_v35  ;;  %v11680_v35 = vld [vmem:[#allocation2 + $0x182] sm:$0xff] }
 0x197   : > { %9574 = vmatprep.mubr.msk.f32.mxu0 %vm279_vm1, %v13283_v28 }
 0x19a   : > { %9575 = vmatmul.mubr.msk.f32.gmra.mrb[22].mxu0 %vm279_vm1, %v11442_v1 }
 0x19b   : > { %9577 = vmatprep.mubr.msk.f32.mxu0 %vm279_vm1, %v13284_v8  ;;  %v11686_v8 = vld [vmem:[#allocation2 + $0x18a] sm:$0xff] }
 0x19e   : > { %9578 = vmatmul.mubr.msk.f32.gmra.mrb[24].mxu0 %vm279_vm1, %v11450_v0 }
 0x19f   : > { %9580 = vmatprep.mubr.msk.f32.mxu0 %vm279_vm1, %v13285_v62 }
 0x1a2   : > { %9581 = vmatmul.mubr.msk.f32.gmra.mrb[26].mxu0 %vm279_vm1, %v11458_v40 }
 0x1a3   : > { %9583 = vmatprep.mubr.msk.f32.mxu0 %vm279_vm1, %v11460_v41  ;;  %v8292_v41 = vld [vmem:[%s13102_s1 + $0x20] sm:$0xf] }
 0x1a6   : > { %9584 = vmatmul.mubr.msk.f32.gmra.mrb[28].mxu0 %vm279_vm1, %v11466_v7 }
 0x1a7   : > { %9586 = vmatprep.mubr.msk.f32.mxu0 %vm279_vm1, %v11680_v35 }
 0x1aa   : > { %9587 = vmatmul.mubr.msk.f32.gmra.mrb[30].mxu0 %vm279_vm1, %v11686_v8 }
 0x1ab   : > { %9591 = vmatprep.mubr.msk.f32.mxu0 %vm279_vm1, %v11219_v9  ;;  %v2707_v9 = vld [vmem:[#allocation2 + $0x198] sm:$0xff] }
 0x1ae   : > { %9592 = vmatmul.mubr.msk.f32.vlgmr.msra.gmra.mrb[0].mxu0 %vm279_vm1, %v11227_v10  ;;  %v2708_v10 = vld [vmem:[#allocation2 + $0x1a0] sm:$0xff] }
 0x1af   : > { %9640 = vmatpush3.msk.msra.mxu0 %vm563_vm0, %v8258_v63  ;;  %9594 = vmatprep.mubr.msk.f32.mxu0 %vm279_vm1, %v11229_v11  ;;  %v3067_v11 = vld [vmem:[#allocation2 + $0x31] sm:$0xff] }
 0x1b0   : > { %9689 = vmatprep.subr.msk.mxu0 %vm563_vm0, %v8292_v41 }
 0x1b2   : > { %9595 = vmatmul.mubr.msk.f32.gmra.mrb[2].mxu0 %vm279_vm1, %v11235_v6  ;;  %v3068_v6 = vld [vmem:[#allocation2 + $0x39] sm:$0xff] }
 0x1b3   : > { %9597 = vmatprep.mubr.msk.f32.mxu0 %vm279_vm1, %v11237_v12  ;;  %v3069_v12 = vld [vmem:[#allocation2 + $0x49] sm:$0xff] }
 0x1b6   : > { %9598 = vmatmul.mubr.msk.f32.gmra.mrb[4].mxu0 %vm279_vm1, %v11243_v13  ;;  %v3070_v13 = vld [vmem:[#allocation2 + $0x51] sm:$0xff] }
 0x1b7   : > { %9600 = vmatprep.mubr.msk.f32.mxu0 %vm279_vm1, %v11245_v14  ;;  %v13304_v14 = vld [vmem:[#allocation22_spill] sm:$0xff] }
 0x1ba   : > { %9601 = vmatmul.mubr.msk.f32.gmra.mrb[6].mxu0 %vm279_vm1, %v11251_v15  ;;  %v13305_v15 = vld [vmem:[#allocation24_spill] sm:$0xff] }
 0x1bb   : > { %9603 = vmatprep.mubr.msk.f32.mxu0 %vm279_vm1, %v11253_v16  ;;  %v13306_v16 = vld [vmem:[#allocation26_spill] sm:$0xff] }
 0x1be   : > { %9604 = vmatmul.mubr.msk.f32.gmra.mrb[8].mxu0 %vm279_vm1, %v11259_v17  ;;  %v13307_v17 = vld [vmem:[#allocation29_spill] sm:$0xff] }
 0x1bf   : > { %9606 = vmatprep.mubr.msk.f32.mxu0 %vm279_vm1, %v11261_v18  ;;  %v13308_v18 = vld [vmem:[#allocation31_spill] sm:$0xff] }
 0x1c2   : > { %9607 = vmatmul.mubr.msk.f32.gmra.mrb[10].mxu0 %vm279_vm1, %v11267_v19  ;;  %v13309_v19 = vld [vmem:[#allocation33_spill] sm:$0xff] }
 0x1c3   : > { %9609 = vmatprep.mubr.msk.f32.mxu0 %vm279_vm1, %v11269_v20  ;;  %v8327_v20 = vld [vmem:[%s13104_s3 + $0x8] sm:$0xff] }
 0x1c4   : > { %10239 = vmatprep.subr.mxu1 %v8327_v20 }
 0x1c5   : > { %10240 = vmatpush3.msra.mxu1 %v8327_v20 }
 0x1c6   : > { %9610 = vmatmul.mubr.msk.f32.gmra.mrb[12].mxu0 %vm279_vm1, %v11275_v21 }
 0x1c7   : > { %9612 = vmatprep.mubr.msk.f32.mxu0 %vm279_vm1, %v11277_v22 }
 0x1ca   : > { %9613 = vmatmul.mubr.msk.f32.gmra.mrb[14].mxu0 %vm279_vm1, %v11283_v23  ;;  %v11994_v23 = vld [vmem:[%s13104_s3] sm:$0xff] }
 0x1cb   : > { %9615 = vmatprep.mubr.msk.f32.mxu0 %vm279_vm1, %v11285_v24  ;;  %9789 = vmatprep.subr.mxu1 %v11994_v23  ;;  %v12000_v24 = vld [vmem:[%s13103_s2] ss:$0 sm:$0xff] }
 0x1ce   : > { %9616 = vmatmul.mubr.msk.f32.gmra.mrb[16].mxu0 %vm279_vm1, %v11291_v25 }
 0x1cf   : > { %9618 = vmatprep.mubr.msk.f32.mxu0 %vm279_vm1, %v11293_v26 }
 0x1d2   : > { %9619 = vmatmul.mubr.msk.f32.gmra.mrb[18].mxu0 %vm279_vm1, %v11299_v27 }
 0x1d3   : > { %9621 = vmatprep.mubr.msk.f32.mxu0 %vm279_vm1, %v11301_v31 }
 0x1d6   : > { %9622 = vmatmul.mubr.msk.f32.gmra.mrb[20].mxu0 %vm279_vm1, %v11307_v32 }
 0x1d7   : > { %9624 = vmatprep.mubr.msk.f32.mxu0 %vm279_vm1, %v11309_v37 }
 0x1da   : > { %9625 = vmatmul.mubr.msk.f32.gmra.mrb[22].mxu0 %vm279_vm1, %v11315_v38 }
 0x1db   : > { %9627 = vmatprep.mubr.msk.f32.mxu0 %vm279_vm1, %v11317_v39 }
 0x1de   : > { %9628 = vmatmul.mubr.msk.f32.gmra.mrb[24].mxu0 %vm279_vm1, %v11327_v42 }
 0x1df   : > { %9630 = vmatprep.mubr.msk.f32.mxu0 %vm279_vm1, %v11329_v3 }
 0x1e2   : > { %9631 = vmatmul.mubr.msk.f32.gmra.mrb[26].mxu0 %vm279_vm1, %v11335_v4 }
 0x1e3   : > { %9633 = vmatprep.mubr.msk.f32.mxu0 %vm279_vm1, %v11534_v2 }
 0x1e6   : > { %9634 = vmatmul.mubr.msk.f32.gmra.mrb[28].mxu0 %vm279_vm1, %v11540_v5 }
 0x1e7   : > { %9636 = vmatprep.mubr.msk.f32.mxu0 %vm279_vm1, %v2707_v9 }
 0x1ea   : > { %9637 = vmatmul.mubr.msk.f32.gmra.mrb[30].mxu0 %vm279_vm1, %v2708_v10 }
 0x1eb   : > { %9641 = vmatprep.mubr.msk.f32.mxu0 %vm279_vm1, %v3067_v11 }
 0x1ee   : > { %9642 = vmatmul.mubr.msk.f32.vlgmr.msra.gmra.mrb[0].mxu0 %vm279_vm1, %v3068_v6 }
 0x1ef   : > { %9690 = vmatpush3.msk.msra.mxu0 %vm563_vm0, %v8292_v41  ;;  %9644 = vmatprep.mubr.msk.f32.mxu0 %vm279_vm1, %v3069_v12 }
 0x1f0   : > { %9739 = vmatprep.subr.mxu0 %v8327_v20 }
 0x1f2   : > { %9645 = vmatmul.mubr.msk.f32.gmra.mrb[2].mxu0 %vm279_vm1, %v3070_v13 }
 0x1f3   : > { %9647 = vmatprep.mubr.msk.f32.mxu0 %vm279_vm1, %v11094_v36  ;;  %v13286_v36 = vld [vmem:[#allocation4_spill] sm:$0xff] }
 0x1f6   : > { %9648 = vmatmul.mubr.msk.f32.gmra.mrb[4].mxu0 %vm279_vm1, %v11110_v43  ;;  %v13287_v43 = vld [vmem:[#allocation5_spill] sm:$0xff] }
 0x1f7   : > { %9650 = vmatprep.mubr.msk.f32.mxu0 %vm279_vm1, %v11114_v44  ;;  %v13288_v44 = vld [vmem:[#allocation6_spill] sm:$0xff] }
 0x1fa   : > { %9651 = vmatmul.mubr.msk.f32.gmra.mrb[6].mxu0 %vm279_vm1, %v11120_v45  ;;  %v13289_v45 = vld [vmem:[#allocation7_spill] sm:$0xff] }
 0x1fb   : > { %9653 = vmatprep.mubr.msk.f32.mxu0 %vm279_vm1, %v11122_v46  ;;  %v13290_v46 = vld [vmem:[#allocation34_spill] sm:$0xff] }
 0x1fe   : > { %9654 = vmatmul.mubr.msk.f32.gmra.mrb[8].mxu0 %vm279_vm1, %v11128_v47  ;;  %v3097_v47 = vld [vmem:[#allocation2 + $0x199] sm:$0xff] }
 0x1ff   : > { %9656 = vmatprep.mubr.msk.f32.mxu0 %vm279_vm1, %v11130_v48  ;;  %v13291_v48 = vld [vmem:[#allocation35_spill] sm:$0xff] }
 0x202   : > { %9657 = vmatmul.mubr.msk.f32.gmra.mrb[10].mxu0 %vm279_vm1, %v11136_v49  ;;  %v3098_v49 = vld [vmem:[#allocation2 + $0x1a1] sm:$0xff] }
 0x203   : > { %9659 = vmatprep.mubr.msk.f32.mxu0 %vm279_vm1, %v11138_v50  ;;  %v13292_v50 = vld [vmem:[#allocation10_spill] sm:$0xff] }
 0x206   : > { %9660 = vmatmul.mubr.msk.f32.gmra.mrb[12].mxu0 %vm279_vm1, %v11144_v51  ;;  %v13293_v51 = vld [vmem:[#allocation11_spill] sm:$0xff] }
 0x207   : > { %9662 = vmatprep.mubr.msk.f32.mxu0 %vm279_vm1, %v11146_v52  ;;  %v13294_v52 = vld [vmem:[#allocation12_spill] sm:$0xff] }
 0x20a   : > { %9663 = vmatmul.mubr.msk.f32.gmra.mrb[14].mxu0 %vm279_vm1, %v11152_v53  ;;  %v13295_v53 = vld [vmem:[#allocation13_spill] sm:$0xff] }
 0x20b   : > { %9665 = vmatprep.mubr.msk.f32.mxu0 %vm279_vm1, %v11154_v54  ;;  %v13296_v54 = vld [vmem:[#allocation14_spill] sm:$0xff] }
 0x20e   : > { %9666 = vmatmul.mubr.msk.f32.gmra.mrb[16].mxu0 %vm279_vm1, %v11160_v55  ;;  %v13297_v55 = vld [vmem:[#allocation15_spill] sm:$0xff] }
 0x20f   : > { %9668 = vmatprep.mubr.msk.f32.mxu0 %vm279_vm1, %v11162_v56  ;;  %v13298_v56 = vld [vmem:[#allocation16_spill] sm:$0xff] }
 0x212   : > { %9669 = vmatmul.mubr.msk.f32.gmra.mrb[18].mxu0 %vm279_vm1, %v11168_v57  ;;  %v13299_v57 = vld [vmem:[#allocation17_spill] sm:$0xff] }
 0x213   : > { %9671 = vmatprep.mubr.msk.f32.mxu0 %vm279_vm1, %v11170_v58  ;;  %v13300_v58 = vld [vmem:[#allocation18_spill] sm:$0xff] }
 0x216   : > { %9672 = vmatmul.mubr.msk.f32.gmra.mrb[20].mxu0 %vm279_vm1, %v11176_v59  ;;  %v13301_v59 = vld [vmem:[#allocation19_spill] sm:$0xff] }
 0x217   : > { %9674 = vmatprep.mubr.msk.f32.mxu0 %vm279_vm1, %v11178_v60  ;;  %v13302_v60 = vld [vmem:[#allocation20_spill] sm:$0xff] }
 0x21a   : > { %9675 = vmatmul.mubr.msk.f32.gmra.mrb[22].mxu0 %vm279_vm1, %v11184_v61  ;;  %v13303_v61 = vld [vmem:[#allocation21_spill] sm:$0xff] }
 0x21b   : > { %9677 = vmatprep.mubr.msk.f32.mxu0 %vm279_vm1, %v13286_v36 }
 0x21e   : > { %9678 = vmatmul.mubr.msk.f32.gmra.mrb[24].mxu0 %vm279_vm1, %v13287_v43 }
 0x21f   : > { %9680 = vmatprep.mubr.msk.f32.mxu0 %vm279_vm1, %v13288_v44 }
 0x222   : > { %9681 = vmatmul.mubr.msk.f32.gmra.mrb[26].mxu0 %vm279_vm1, %v13289_v45 }
 0x223   : > { %9683 = vmatprep.mubr.msk.f32.mxu0 %vm279_vm1, %v13290_v46 }
 0x226   : > { %9684 = vmatmul.mubr.msk.f32.gmra.mrb[28].mxu0 %vm279_vm1, %v13291_v48 }
 0x227   : > { %9686 = vmatprep.mubr.msk.f32.mxu0 %vm279_vm1, %v3097_v47 }
 0x22a   : > { %9687 = vmatmul.mubr.msk.f32.gmra.mrb[30].mxu0 %vm279_vm1, %v3098_v49 }
 0x22b   : > { %9691 = vmatprep.mubr.msk.f32.mxu0 %vm279_vm1, %v13292_v50 }
 0x22e   : > { %9692 = vmatmul.mubr.msk.f32.vlgmr.msra.gmra.mrb[0].mxu0 %vm279_vm1, %v13293_v51 }
 0x22f   : > { %9694 = vmatprep.mubr.msk.f32.mxu0 %vm279_vm1, %v13294_v52  ;;  %9740 = vmatpush3.msra.mxu0 %v8327_v20 }
 0x232   : > { %9695 = vmatmul.mubr.msk.f32.gmra.mrb[2].mxu0 %vm279_vm1, %v13295_v53 }
 0x233   : > { %9697 = vmatprep.mubr.msk.f32.mxu0 %vm279_vm1, %v13296_v54 }
 0x236   : > { %9698 = vmatmul.mubr.msk.f32.gmra.mrb[4].mxu0 %vm279_vm1, %v13297_v55 }
 0x237   : > { %9700 = vmatprep.mubr.msk.f32.mxu0 %vm279_vm1, %v13298_v56 }
 0x23a   : > { %9701 = vmatmul.mubr.msk.f32.gmra.mrb[6].mxu0 %vm279_vm1, %v13299_v57 }
 0x23b   : > { %9703 = vmatprep.mubr.msk.f32.mxu0 %vm279_vm1, %v13300_v58 }
 0x23e   : > { %9704 = vmatmul.mubr.msk.f32.gmra.mrb[8].mxu0 %vm279_vm1, %v13301_v59 }
 0x23f   : > { %9706 = vmatprep.mubr.msk.f32.mxu0 %vm279_vm1, %v13302_v60 }
 0x242   : > { %9707 = vmatmul.mubr.msk.f32.gmra.mrb[10].mxu0 %vm279_vm1, %v13303_v61 }
 0x243   : > { %9709 = vmatprep.mubr.msk.f32.mxu0 %vm279_vm1, %v13304_v14 }
 0x246   : > { %9710 = vmatmul.mubr.msk.f32.gmra.mrb[12].mxu0 %vm279_vm1, %v13276_v29 }
 0x247   : > { %9712 = vmatprep.mubr.msk.f32.mxu0 %vm279_vm1, %v13305_v15 }
 0x24a   : > { %9713 = vmatmul.mubr.msk.f32.gmra.mrb[14].mxu0 %vm279_vm1, %v13278_v33 }
 0x24b   : > { %9715 = vmatprep.mubr.msk.f32.mxu0 %vm279_vm1, %v13306_v16 }
 0x24e   : > { %9716 = vmatmul.mubr.msk.f32.gmra.mrb[16].mxu0 %vm279_vm1, %v13280_v30 }
 0x24f   : > { %9718 = vmatprep.mubr.msk.f32.mxu0 %vm279_vm1, %v13281_v34 }
 0x252   : > { %9719 = vmatmul.mubr.msk.f32.gmra.mrb[18].mxu0 %vm279_vm1, %v13307_v17 }
 0x253   : > { %9721 = vmatprep.mubr.msk.f32.mxu0 %vm279_vm1, %v13283_v28 }
 0x256   : > { %9722 = vmatmul.mubr.msk.f32.gmra.mrb[20].mxu0 %vm279_vm1, %v11442_v1  ;;  %v3487_v1 = vld [vmem:[#allocation2 + $0x19a] sm:$0xff] }
 0x257   : > { %9724 = vmatprep.mubr.msk.f32.mxu0 %vm279_vm1, %v13308_v18 }
 0x25a   : > { %9725 = vmatmul.mubr.msk.f32.gmra.mrb[22].mxu0 %vm279_vm1, %v11450_v0  ;;  %v3488_v0 = vld [vmem:[#allocation2 + $0x1a2] sm:$0xff] }
 0x25b   : > { %9727 = vmatprep.mubr.msk.f32.mxu0 %vm279_vm1, %v13285_v62  ;;  %v13310_v62 = vmov 0.0  }
 0x25c   : > { %3924 = vst.msk [vmem:[#allocation3 + $0x20] sm:$0xff] %vm3918_vm3, %v13310_v62  ;;  %3919 = vst.msk [vmem:[#allocation3] sm:$0xff] %vm3918_vm3, %v13310_v62 }
 0x25d   : > { %3920 = vst.msk [vmem:[#allocation3 + $0x8] sm:$0xff] %vm3918_vm3, %v13310_v62  ;;  %3923 = vst.msk [vmem:[#allocation3 + $0x18] sm:$0xff] %vm3918_vm3, %v13310_v62 }
 0x25e   : > { %9728 = vmatmul.mubr.msk.f32.gmra.mrb[24].mxu0 %vm279_vm1, %v11458_v40  ;;  %3926 = vst.msk [vmem:[#allocation3 + $0x30] sm:$0xff] %vm3918_vm3, %v13310_v62  ;;  %3927 = vst.msk [vmem:[#allocation3 + $0x38] sm:$0xff] %vm3918_vm3, %v13310_v62 }
 0x25f   : > { %9730 = vmatprep.mubr.msk.f32.mxu0 %vm279_vm1, %v13309_v19  ;;  %3929 = vst.msk [vmem:[#allocation3 + $0x48] sm:$0xff] %vm3918_vm3, %v13310_v62  ;;  %3930 = vst.msk [vmem:[#allocation3 + $0x50] sm:$0xff] %vm3918_vm3, %v13310_v62 }
 0x260   : > { %3932 = vst.msk [vmem:[#allocation3 + $0x60] sm:$0xff] %vm3918_vm3, %v13310_v62  ;;  %3933 = vst.msk [vmem:[#allocation3 + $0x68] sm:$0xff] %vm3918_vm3, %v13310_v62 }
 0x261   : > { %3935 = vst.msk [vmem:[#allocation3 + $0x78] sm:$0xff] %vm3918_vm3, %v13310_v62  ;;  %3936 = vst.msk [vmem:[#allocation3 + $0x80] sm:$0xff] %vm3918_vm3, %v13310_v62 }
 0x262   : > { %9731 = vmatmul.mubr.msk.f32.gmra.mrb[26].mxu0 %vm279_vm1, %v11466_v7  ;;  %3938 = vst.msk [vmem:[#allocation3 + $0x90] sm:$0xff] %vm3918_vm3, %v13310_v62  ;;  %3939 = vst.msk [vmem:[#allocation3 + $0x98] sm:$0xff] %vm3918_vm3, %v13310_v62 }
 0x263   : > { %9733 = vmatprep.mubr.msk.f32.mxu0 %vm279_vm1, %v11680_v35  ;;  %3941 = vst.msk [vmem:[#allocation3 + $0xa8] sm:$0xff] %vm3918_vm3, %v13310_v62  ;;  %3942 = vst.msk [vmem:[#allocation3 + $0xb0] sm:$0xff] %vm3918_vm3, %v13310_v62 }
 0x264   : > { %3944 = vst.msk [vmem:[#allocation3 + $0xc0] sm:$0xff] %vm3918_vm3, %v13310_v62  ;;  %3945 = vst.msk [vmem:[#allocation3 + $0xc8] sm:$0xff] %vm3918_vm3, %v13310_v62  ;;  %v4040_v21 = vld [vmem:[#allocation3 + $0x1] sm:$0xff] }
 0x265   : > { %3947 = vst.msk [vmem:[#allocation3 + $0xd8] sm:$0xff] %vm3918_vm3, %v13310_v62  ;;  %3948 = vst.msk [vmem:[#allocation3 + $0xe0] sm:$0xff] %vm3918_vm3, %v13310_v62 }
 0x266   : > { %9734 = vmatmul.mubr.msk.f32.gmra.mrb[28].mxu0 %vm279_vm1, %v11686_v8  ;;  %3950 = vst.msk [vmem:[#allocation3 + $0xf0] sm:$0xff] %vm3918_vm3, %v13310_v62  ;;  %3951 = vst.msk [vmem:[#allocation3 + $0xf8] sm:$0xff] %vm3918_vm3, %v13310_v62 }
 0x267   : > { %9736 = vmatprep.mubr.msk.f32.mxu0 %vm279_vm1, %v3487_v1  ;;  %3953 = vst.msk [vmem:[#allocation3 + $0x108] sm:$0xff] %vm3918_vm3, %v13310_v62  ;;  %3954 = vst.msk [vmem:[#allocation3 + $0x110] sm:$0xff] %vm3918_vm3, %v13310_v62 }
 0x268   : > { %3956 = vst.msk [vmem:[#allocation3 + $0x120] sm:$0xff] %vm3918_vm3, %v13310_v62  ;;  %3957 = vst.msk [vmem:[#allocation3 + $0x128] sm:$0xff] %vm3918_vm3, %v13310_v62 }
 0x269   : > { %3959 = vst.msk [vmem:[#allocation3 + $0x138] sm:$0xff] %vm3918_vm3, %v13310_v62  ;;  %3960 = vst.msk [vmem:[#allocation3 + $0x140] sm:$0xff] %vm3918_vm3, %v13310_v62 }
 0x26a   : > { %9737 = vmatmul.mubr.msk.f32.gmra.mrb[30].mxu0 %vm279_vm1, %v3488_v0  ;;  %3962 = vst.msk [vmem:[#allocation3 + $0x150] sm:$0xff] %vm3918_vm3, %v13310_v62  ;;  %3963 = vst.msk [vmem:[#allocation3 + $0x158] sm:$0xff] %vm3918_vm3, %v13310_v62 }
 0x26b   : > { %3965 = vst.msk [vmem:[#allocation3 + $0x168] sm:$0xff] %vm3918_vm3, %v13310_v62  ;;  %3966 = vst.msk [vmem:[#allocation3 + $0x170] sm:$0xff] %vm3918_vm3, %v13310_v62  ;;  %9741 = vmatprep.mubr.msk.f32.mxu0 %vm3918_vm3, %v4040_v21 }
 0x26c   : > { %3968 = vst.msk [vmem:[#allocation3 + $0x180] sm:$0xff] %vm3918_vm3, %v13310_v62  ;;  %3969 = vst.msk [vmem:[#allocation3 + $0x188] sm:$0xff] %vm3918_vm3, %v13310_v62 }
 0x26d   : > { %3971 = vst.msk [vmem:[#allocation3 + $0x198] sm:$0xff] %vm3918_vm3, %v13310_v62  ;;  %3972 = vst.msk [vmem:[#allocation3 + $0x1a0] sm:$0xff] %vm3918_vm3, %v13310_v62 }
 0x26e   : > { %3925 = vst.msk [vmem:[#allocation3 + $0x28] sm:$0x3] %vm3921_vm4, %v13310_v62  ;;  %3922 = vst.msk [vmem:[#allocation3 + $0x10] sm:$0x3] %vm3921_vm4, %v13310_v62 }
 0x26f   : > { %3928 = vst.msk [vmem:[#allocation3 + $0x40] sm:$0x3] %vm3921_vm4, %v13310_v62  ;;  %3931 = vst.msk [vmem:[#allocation3 + $0x58] sm:$0x3] %vm3921_vm4, %v13310_v62 }
 0x270   : > { %3934 = vst.msk [vmem:[#allocation3 + $0x70] sm:$0x3] %vm3921_vm4, %v13310_v62  ;;  %3937 = vst.msk [vmem:[#allocation3 + $0x88] sm:$0x3] %vm3921_vm4, %v13310_v62 }
 0x271   : > { %3940 = vst.msk [vmem:[#allocation3 + $0xa0] sm:$0x3] %vm3921_vm4, %v13310_v62  ;;  %3943 = vst.msk [vmem:[#allocation3 + $0xb8] sm:$0x3] %vm3921_vm4, %v13310_v62 }
 0x272   : > { %3946 = vst.msk [vmem:[#allocation3 + $0xd0] sm:$0x3] %vm3921_vm4, %v13310_v62  ;;  %3949 = vst.msk [vmem:[#allocation3 + $0xe8] sm:$0x3] %vm3921_vm4, %v13310_v62 }
 0x273   : > { %3952 = vst.msk [vmem:[#allocation3 + $0x100] sm:$0x3] %vm3921_vm4, %v13310_v62  ;;  %3955 = vst.msk [vmem:[#allocation3 + $0x118] sm:$0x3] %vm3921_vm4, %v13310_v62 }
 0x274   : > { %3958 = vst.msk [vmem:[#allocation3 + $0x130] sm:$0x3] %vm3921_vm4, %v13310_v62  ;;  %3961 = vst.msk [vmem:[#allocation3 + $0x148] sm:$0x3] %vm3921_vm4, %v13310_v62 }
 0x275   : > { %3964 = vst.msk [vmem:[#allocation3 + $0x160] sm:$0x3] %vm3921_vm4, %v13310_v62  ;;  %3967 = vst.msk [vmem:[#allocation3 + $0x178] sm:$0x3] %vm3921_vm4, %v13310_v62  ;;  %v4041_v22 = vld [vmem:[#allocation3 + $0x9] sm:$0xff] }
 0x276   : > { %3970 = vst.msk [vmem:[#allocation3 + $0x190] sm:$0x3] %vm3921_vm4, %v13310_v62  ;;  %3973 = vst.msk [vmem:[#allocation3 + $0x1a8] sm:$0x3] %vm3921_vm4, %v13310_v62  ;;  %9742 = vmatmul.mubr.msk.f32.vlgmr.msra.gmra.mrb[32].mxu0 %vm3918_vm3, %v4041_v22 }
 0x301   : > { %v9693_v25 = vpop.f32.mrb[0].mxu0 }
 0x302   : > { %v3855_v26 = vadd.f32 %v9693_v25, %v12000_v24  ;;  %v3656_v27 = vpop.f32.mrb[1].mxu0 }
 0x303   : > { %v3854_v31 = vadd.f32 %v12000_v24, %v3656_v27 }
 0x304   : > { %v3887_v32 = vmax.f32 %v3855_v26, 0.0 }
 0x305   : > { %v3886_v37 = vmax.f32 %v3854_v31, 0.0  ;;  %v9696_v38 = vpop.f32.mrb[2].mxu0 }
 0x306   : > { %3976 = vst.msk [vmem:[#allocation3 + $0x21] sm:$0xff] %vm3918_vm3, %v3887_v32  ;;  %v3857_v39 = vadd.f32 %v9696_v38, %v12000_v24  ;;  %v3666_v42 = vpop.f32.mrb[3].mxu0 }
 0x307   : > { %3975 = vst.msk [vmem:[#allocation3 + $0x19] sm:$0xff] %vm3918_vm3, %v3886_v37  ;;  %v3856_v3 = vadd.f32 %v12000_v24, %v3666_v42 }
 0x308   : > { %v3889_v4 = vmax.f32 %v3857_v39, 0.0 }
 0x309   : > { %v3888_v40 = vmax.f32 %v3856_v3, 0.0  ;;  %v9699_v41 = vpop.f32.mrb[4].mxu0 }
 0x30a   : > { %3978 = vst.msk [vmem:[#allocation3 + $0x39] sm:$0xff] %vm3918_vm3, %v3889_v4  ;;  %v3859_v7 = vadd.f32 %v9699_v41, %v12000_v24  ;;  %v3676_v2 = vpop.f32.mrb[5].mxu0 }
 0x30b   : > { %3977 = vst.msk [vmem:[#allocation3 + $0x31] sm:$0xff] %vm3918_vm3, %v3888_v40  ;;  %v3858_v5 = vadd.f32 %v12000_v24, %v3676_v2 }
 0x30c   : > { %v3891_v28 = vmax.f32 %v3859_v7, 0.0 }
 0x30d   : > { %v3890_v30 = vmax.f32 %v3858_v5, 0.0  ;;  %v9702_v33 = vpop.f32.mrb[6].mxu0  ;;  %v12020_v8 = vld [vmem:[#allocation3 + $0x21] sm:$0xff] }
 0x30e   : > { %3980 = vst.msk [vmem:[#allocation3 + $0x51] sm:$0xff] %vm3918_vm3, %v3891_v28  ;;  %v3861_v34 = vadd.f32 %v9702_v33, %v12000_v24  ;;  %v3686_v63 = vpop.f32.mrb[7].mxu0  ;;  %v12014_v35 = vld [vmem:[#allocation3 + $0x19] sm:$0xff] }
 0x30f   : > { %3979 = vst.msk [vmem:[#allocation3 + $0x49] sm:$0xff] %vm3918_vm3, %v3890_v30  ;;  %v3860_v29 = vadd.f32 %v12000_v24, %v3686_v63  ;;  %9744 = vmatprep.mubr.msk.f32.mxu0 %vm3918_vm3, %v12014_v35  ;;  %v12109_v33 = vld [vmem:[%s13104_s3 + $0x10] sm:$0xff] }
 0x310   : > { %v3893_v9 = vmax.f32 %v3861_v34, 0.0  ;;  %9745 = vmatmul.mubr.msk.f32.gmra.mrb[34].mxu0 %vm3918_vm3, %v12020_v8 }
 0x311   : > { %v3892_v10 = vmax.f32 %v3860_v29, 0.0  ;;  %v9705_v11 = vpop.f32.mrb[8].mxu0  ;;  %v12032_v43 = vld [vmem:[#allocation3 + $0x39] sm:$0xff] }
 0x312   : > { %3982 = vst.msk [vmem:[#allocation3 + $0x69] sm:$0xff] %vm3918_vm3, %v3893_v9  ;;  %v3863_v6 = vadd.f32 %v9705_v11, %v12000_v24  ;;  %v3696_v12 = vpop.f32.mrb[9].mxu0  ;;  %v12026_v13 = vld [vmem:[#allocation3 + $0x31] sm:$0xff] }
 0x313   : > { %3981 = vst.msk [vmem:[#allocation3 + $0x61] sm:$0xff] %vm3918_vm3, %v3892_v10  ;;  %v3862_v36 = vadd.f32 %v12000_v24, %v3696_v12  ;;  %9747 = vmatprep.mubr.msk.f32.mxu0 %vm3918_vm3, %v12026_v13 }
 0x314   : > { %v3895_v44 = vmax.f32 %v3863_v6, 0.0  ;;  %9748 = vmatmul.mubr.msk.f32.gmra.mrb[36].mxu0 %vm3918_vm3, %v12032_v43 }
 0x315   : > { %v3894_v45 = vmax.f32 %v3862_v36, 0.0  ;;  %v9708_v46 = vpop.f32.mrb[10].mxu0  ;;  %v12044_v51 = vld [vmem:[#allocation3 + $0x51] sm:$0xff] }
 0x316   : > { %3984 = vst.msk [vmem:[#allocation3 + $0x81] sm:$0xff] %vm3918_vm3, %v3895_v44  ;;  %v3865_v47 = vadd.f32 %v9708_v46, %v12000_v24  ;;  %v3706_v48 = vpop.f32.mrb[11].mxu0  ;;  %v12038_v49 = vld [vmem:[#allocation3 + $0x49] sm:$0xff] }
 0x317   : > { %3983 = vst.msk [vmem:[#allocation3 + $0x79] sm:$0xff] %vm3918_vm3, %v3894_v45  ;;  %v3864_v50 = vadd.f32 %v12000_v24, %v3706_v48  ;;  %9750 = vmatprep.mubr.msk.f32.mxu0 %vm3918_vm3, %v12038_v49 }
 0x318   : > { %v3897_v52 = vmax.f32 %v3865_v47, 0.0  ;;  %9751 = vmatmul.mubr.msk.f32.gmra.mrb[38].mxu0 %vm3918_vm3, %v12044_v51 }
 0x319   : > { %v3896_v53 = vmax.f32 %v3864_v50, 0.0  ;;  %v9711_v54 = vpop.f32.mrb[12].mxu0  ;;  %v12056_v59 = vld [vmem:[#allocation3 + $0x69] sm:$0xff] }
 0x31a   : > { %3986 = vst.msk [vmem:[#allocation3 + $0x99] sm:$0xff] %vm3918_vm3, %v3897_v52  ;;  %v3867_v55 = vadd.f32 %v9711_v54, %v12000_v24  ;;  %v3716_v56 = vpop.f32.mrb[13].mxu0  ;;  %v12050_v57 = vld [vmem:[#allocation3 + $0x61] sm:$0xff] }
 0x31b   : > { %3985 = vst.msk [vmem:[#allocation3 + $0x91] sm:$0xff] %vm3918_vm3, %v3896_v53  ;;  %v3866_v58 = vadd.f32 %v12000_v24, %v3716_v56  ;;  %9753 = vmatprep.mubr.msk.f32.mxu0 %vm3918_vm3, %v12050_v57 }
 0x31c   : > { %v3899_v60 = vmax.f32 %v3867_v55, 0.0  ;;  %9754 = vmatmul.mubr.msk.f32.gmra.mrb[40].mxu0 %vm3918_vm3, %v12056_v59 }
 0x31d   : > { %v3898_v61 = vmax.f32 %v3866_v58, 0.0  ;;  %v9714_v14 = vpop.f32.mrb[14].mxu0  ;;  %v12068_v19 = vld [vmem:[#allocation3 + $0x81] sm:$0xff] }
 0x31e   : > { %3988 = vst.msk [vmem:[#allocation3 + $0xb1] sm:$0xff] %vm3918_vm3, %v3899_v60  ;;  %v3869_v15 = vadd.f32 %v9714_v14, %v12000_v24  ;;  %v3726_v16 = vpop.f32.mrb[15].mxu0  ;;  %v12062_v17 = vld [vmem:[#allocation3 + $0x79] sm:$0xff] }
 0x31f   : > { %3987 = vst.msk [vmem:[#allocation3 + $0xa9] sm:$0xff] %vm3918_vm3, %v3898_v61  ;;  %v3868_v18 = vadd.f32 %v12000_v24, %v3726_v16  ;;  %9756 = vmatprep.mubr.msk.f32.mxu0 %vm3918_vm3, %v12062_v17 }
 0x320   : > { %v3901_v1 = vmax.f32 %v3869_v15, 0.0  ;;  %9757 = vmatmul.mubr.msk.f32.gmra.mrb[42].mxu0 %vm3918_vm3, %v12068_v19 }
 0x321   : > { %v3900_v0 = vmax.f32 %v3868_v18, 0.0  ;;  %v9717_v62 = vpop.f32.mrb[16].mxu0  ;;  %v12080_v26 = vld [vmem:[#allocation3 + $0x99] sm:$0xff] }
 0x322   : > { %3990 = vst.msk [vmem:[#allocation3 + $0xc9] sm:$0xff] %vm3918_vm3, %v3901_v1  ;;  %v3871_v20 = vadd.f32 %v9717_v62, %v12000_v24  ;;  %v3736_v21 = vpop.f32.mrb[17].mxu0  ;;  %v12074_v22 = vld [vmem:[#allocation3 + $0x91] sm:$0xff] }
 0x323   : > { %3989 = vst.msk [vmem:[#allocation3 + $0xc1] sm:$0xff] %vm3918_vm3, %v3900_v0  ;;  %v3870_v25 = vadd.f32 %v12000_v24, %v3736_v21  ;;  %9759 = vmatprep.mubr.msk.f32.mxu0 %vm3918_vm3, %v12074_v22 }
 0x324   : > { %v3903_v27 = vmax.f32 %v3871_v20, 0.0  ;;  %9760 = vmatmul.mubr.msk.f32.gmra.mrb[44].mxu0 %vm3918_vm3, %v12080_v26 }
 0x325   : > { %v3902_v31 = vmax.f32 %v3870_v25, 0.0  ;;  %v9720_v32 = vpop.f32.mrb[18].mxu0  ;;  %v12092_v3 = vld [vmem:[#allocation3 + $0xb1] sm:$0xff] }
 0x326   : > { %3992 = vst.msk [vmem:[#allocation3 + $0xe1] sm:$0xff] %vm3918_vm3, %v3903_v27  ;;  %v3873_v37 = vadd.f32 %v9720_v32, %v12000_v24  ;;  %v3746_v38 = vpop.f32.mrb[19].mxu0  ;;  %v12086_v39 = vld [vmem:[#allocation3 + $0xa9] sm:$0xff] }
 0x327   : > { %3991 = vst.msk [vmem:[#allocation3 + $0xd9] sm:$0xff] %vm3918_vm3, %v3902_v31  ;;  %v3872_v42 = vadd.f32 %v12000_v24, %v3746_v38  ;;  %9762 = vmatprep.mubr.msk.f32.mxu0 %vm3918_vm3, %v12086_v39 }
 0x328   : > { %v3905_v4 = vmax.f32 %v3873_v37, 0.0  ;;  %9763 = vmatmul.mubr.msk.f32.gmra.mrb[46].mxu0 %vm3918_vm3, %v12092_v3 }
 0x329   : > { %v3904_v40 = vmax.f32 %v3872_v42, 0.0  ;;  %v9723_v41 = vpop.f32.mrb[20].mxu0  ;;  %v12104_v30 = vld [vmem:[#allocation3 + $0xc9] sm:$0xff] }
 0x32a   : > { %3994 = vst.msk [vmem:[#allocation3 + $0xf9] sm:$0xff] %vm3918_vm3, %v3905_v4  ;;  %v3875_v7 = vadd.f32 %v9723_v41, %v12000_v24  ;;  %v3756_v2 = vpop.f32.mrb[21].mxu0  ;;  %v12098_v5 = vld [vmem:[#allocation3 + $0xc1] sm:$0xff] }
 0x32b   : > { %3993 = vst.msk [vmem:[#allocation3 + $0xf1] sm:$0xff] %vm3918_vm3, %v3904_v40  ;;  %v3874_v28 = vadd.f32 %v12000_v24, %v3756_v2  ;;  %9765 = vmatprep.mubr.msk.f32.mxu1 %vm3918_vm3, %v12098_v5  ;;  %v4007_v2 = vld [vmem:[#allocation3] sm:$0xff] }
 0x32c   : > { %v3907_v34 = vmax.f32 %v3875_v7, 0.0  ;;  %9766 = vmatmul.mubr.msk.f32.vlgmr.msra.gmra.mrb[0].mxu1 %vm3918_vm3, %v12104_v30 }
 0x32d   : > { %v3906_v63 = vmax.f32 %v3874_v28, 0.0  ;;  %9790 = vmatpush3.msra.mxu1 %v11994_v23  ;;  %v9726_v29 = vpop.f32.mrb[22].mxu0  ;;  %v12123_v12 = vld [vmem:[#allocation3 + $0xe1] sm:$0xff] }
 0x32e   : > { %3996 = vst.msk [vmem:[#allocation3 + $0x111] sm:$0xff] %vm3918_vm3, %v3907_v34  ;;  %v3877_v9 = vadd.f32 %v9726_v29, %v12000_v24  ;;  %v3766_v10 = vpop.f32.mrb[23].mxu0  ;;  %v12116_v11 = vld [vmem:[#allocation3 + $0xd9] sm:$0xff]  ;;  %9839 = vmatprep.subr.mxu1 %v12109_v33  ;;  %v4008_v34 = vld [vmem:[#allocation3 + $0x8] sm:$0xff] }
 0x32f   : > { %3995 = vst.msk [vmem:[#allocation3 + $0x109] sm:$0xff] %vm3918_vm3, %v3906_v63  ;;  %v3876_v6 = vadd.f32 %v12000_v24, %v3766_v10  ;;  %9768 = vmatprep.mubr.msk.f32.mxu1 %vm3918_vm3, %v12116_v11  ;;  %v12197_v63 = vld [vmem:[%s13104_s3 + $0x18] sm:$0xff]  ;;  %v12200_v29 = vld [vmem:[#allocation3 + $0x18] sm:$0xff]  ;;  %v12210_v10 = vld [vmem:[#allocation3 + $0x30] sm:$0xff] }
 0x330   : > { %v3909_v23 = vmax.f32 %v3877_v9, 0.0  ;;  %9769 = vmatmul.mubr.msk.f32.gmra.mrb[2].mxu1 %vm3918_vm3, %v12123_v12  ;;  %v12206_v9 = vld [vmem:[#allocation3 + $0x20] sm:$0xff] }
 0x331   : > { %v3908_v36 = vmax.f32 %v3876_v6, 0.0  ;;  %v9729_v44 = vpop.f32.mrb[24].mxu0  ;;  %v12135_v50 = vld [vmem:[#allocation3 + $0xf9] sm:$0xff] }
 0x332   : > { %3998 = vst.msk [vmem:[#allocation3 + $0x129] sm:$0xff] %vm3918_vm3, %v3909_v23  ;;  %v3879_v45 = vadd.f32 %v9729_v44, %v12000_v24  ;;  %v3776_v46 = vpop.f32.mrb[25].mxu0  ;;  %v12129_v47 = vld [vmem:[#allocation3 + $0xf1] sm:$0xff]  ;;  %v12230_v44 = vld [vmem:[#allocation3 + $0x68] sm:$0xff] }
 0x333   : > { %3997 = vst.msk [vmem:[#allocation3 + $0x121] sm:$0xff] %vm3918_vm3, %v3908_v36  ;;  %v3878_v48 = vadd.f32 %v12000_v24, %v3776_v46  ;;  %9771 = vmatprep.mubr.msk.f32.mxu1 %vm3918_vm3, %v12129_v47  ;;  %v12214_v6 = vld [vmem:[#allocation3 + $0x38] sm:$0xff]  ;;  %v12222_v23 = vld [vmem:[#allocation3 + $0x50] sm:$0xff]  ;;  %v12226_v36 = vld [vmem:[#allocation3 + $0x60] sm:$0xff] }
 0x334   : > { %v3911_v52 = vmax.f32 %v3879_v45, 0.0  ;;  %9772 = vmatmul.mubr.msk.f32.gmra.mrb[4].mxu1 %vm3918_vm3, %v12135_v50  ;;  %v12234_v45 = vld [vmem:[#allocation3 + $0x78] sm:$0xff]  ;;  %v12238_v46 = vld [vmem:[#allocation3 + $0x80] sm:$0xff] }
 0x335   : > { %v3910_v53 = vmax.f32 %v3878_v48, 0.0  ;;  %v9732_v54 = vpop.f32.mrb[26].mxu0  ;;  %v12147_v61 = vld [vmem:[#allocation3 + $0x111] sm:$0xff]  ;;  %13313 = vst [vmem:[#allocation23_spill] sm:$0xff] %v12238_v46 }
 0x336   : > { %4000 = vst.msk [vmem:[#allocation3 + $0x141] sm:$0xff] %vm3918_vm3, %v3911_v52  ;;  %v3881_v55 = vadd.f32 %v9732_v54, %v12000_v24  ;;  %v3786_v56 = vpop.f32.mrb[27].mxu0  ;;  %v12141_v58 = vld [vmem:[#allocation3 + $0x109] sm:$0xff]  ;;  %v12250_v54 = vld [vmem:[#allocation3 + $0x98] sm:$0xff] }
 0x337   : > { %3999 = vst.msk [vmem:[#allocation3 + $0x139] sm:$0xff] %vm3918_vm3, %v3910_v53  ;;  %v3880_v60 = vadd.f32 %v12000_v24, %v3786_v56  ;;  %9774 = vmatprep.mubr.msk.f32.mxu1 %vm3918_vm3, %v12141_v58  ;;  %v12242_v48 = vld [vmem:[#allocation3 + $0x90] sm:$0xff] }
 0x338   : > { %v3913_v14 = vmax.f32 %v3881_v55, 0.0  ;;  %9775 = vmatmul.mubr.msk.f32.gmra.mrb[6].mxu1 %vm3918_vm3, %v12147_v61  ;;  %v12254_v55 = vld [vmem:[#allocation3 + $0xa8] sm:$0xff]  ;;  %v12258_v56 = vld [vmem:[#allocation3 + $0xb0] sm:$0xff] }
 0x339   : > { %v3912_v15 = vmax.f32 %v3880_v60, 0.0  ;;  %v9735_v16 = vpop.f32.mrb[28].mxu0  ;;  %v12159_v20 = vld [vmem:[#allocation3 + $0x129] sm:$0xff]  ;;  %13316 = vst [vmem:[#allocation28_spill] sm:$0xff] %v12254_v55  ;;  %v12262_v60 = vld [vmem:[#allocation3 + $0xc0] sm:$0xff] }
 0x33a   : > { %4002 = vst.msk [vmem:[#allocation3 + $0x159] sm:$0xff] %vm3918_vm3, %v3913_v14  ;;  %v3883_v18 = vadd.f32 %v9735_v16, %v12000_v24  ;;  %v3796_v1 = vpop.f32.mrb[29].mxu0  ;;  %v12153_v0 = vld [vmem:[#allocation3 + $0x121] sm:$0xff] }
 0x33b   : > { %4001 = vst.msk [vmem:[#allocation3 + $0x151] sm:$0xff] %vm3918_vm3, %v3912_v15  ;;  %v3882_v62 = vadd.f32 %v12000_v24, %v3796_v1  ;;  %9777 = vmatprep.mubr.msk.f32.mxu1 %vm3918_vm3, %v12153_v0  ;;  %v12266_v14 = vld [vmem:[#allocation3 + $0xc8] sm:$0xff]  ;;  %v12270_v15 = vld [vmem:[#allocation3 + $0xd8] sm:$0xff]  ;;  %v12274_v16 = vld [vmem:[#allocation3 + $0xe0] sm:$0xff] }
 0x33c   : > { %v3915_v21 = vmax.f32 %v3883_v18, 0.0  ;;  %9778 = vmatmul.mubr.msk.f32.gmra.mrb[8].mxu1 %vm3918_vm3, %v12159_v20  ;;  %v12278_v18 = vld [vmem:[#allocation3 + $0xf0] sm:$0xff]  ;;  %v12282_v1 = vld [vmem:[#allocation3 + $0xf8] sm:$0xff] }
 0x33d   : > { %v3914_v25 = vmax.f32 %v3882_v62, 0.0  ;;  %v9738_v27 = vpop.f32.mrb[30].mxu0  ;;  %v12171_v42 = vld [vmem:[#allocation3 + $0x141] sm:$0xff] }
 0x33e   : > { %4004 = vst.msk [vmem:[#allocation3 + $0x171] sm:$0xff] %vm3918_vm3, %v3915_v21  ;;  %v3885_v31 = vadd.f32 %v9738_v27, %v12000_v24  ;;  %v3806_v32 = vpop.f32.mrb[31].mxu0  ;;  %v12165_v37 = vld [vmem:[#allocation3 + $0x139] sm:$0xff]  ;;  %v12286_v62 = vld [vmem:[#allocation3 + $0x108] sm:$0xff]  ;;  %v12290_v21 = vld [vmem:[#allocation3 + $0x110] sm:$0xff] }
 0x33f   : > { %4003 = vst.msk [vmem:[#allocation3 + $0x169] sm:$0xff] %vm3918_vm3, %v3914_v25  ;;  %v3884_v38 = vadd.f32 %v12000_v24, %v3806_v32  ;;  %9780 = vmatprep.mubr.msk.f32.mxu1 %vm3918_vm3, %v12165_v37  ;;  %v12294_v25 = vld [vmem:[#allocation3 + $0x120] sm:$0xff]  ;;  %v12298_v27 = vld [vmem:[#allocation3 + $0x128] sm:$0xff] }
 0x340   : > { %v3917_v4 = vmax.f32 %v3885_v31, 0.0  ;;  %9781 = vmatmul.mubr.msk.f32.gmra.mrb[10].mxu1 %vm3918_vm3, %v12171_v42  ;;  %v12302_v31 = vld [vmem:[#allocation3 + $0x138] sm:$0xff]  ;;  %v12306_v32 = vld [vmem:[#allocation3 + $0x140] sm:$0xff] }
 0x341   : > { %v3916_v40 = vmax.f32 %v3884_v38, 0.0  ;;  %v12181_v24 = vld [vmem:[#allocation3 + $0x159] sm:$0xff] }
 0x342   : > { %4006 = vst.msk [vmem:[#allocation3 + $0x189] sm:$0xff] %vm3918_vm3, %v3917_v4  ;;  %v12176_v41 = vld [vmem:[#allocation3 + $0x151] sm:$0xff] }
 0x343   : > { %4005 = vst.msk [vmem:[#allocation3 + $0x181] sm:$0xff] %vm3918_vm3, %v3916_v40  ;;  %9783 = vmatprep.mubr.msk.f32.mxu1 %vm3918_vm3, %v12176_v41  ;;  %v12310_v38 = vld [vmem:[#allocation3 + $0x150] sm:$0xff]  ;;  %v12314_v4 = vld [vmem:[#allocation3 + $0x158] sm:$0xff] }
 0x344   : > { %9784 = vmatmul.mubr.msk.f32.gmra.mrb[12].mxu1 %vm3918_vm3, %v12181_v24 }
 0x345   : > { %v12189_v28 = vld [vmem:[#allocation3 + $0x171] sm:$0xff] }
 0x346   : > { %v12185_v7 = vld [vmem:[#allocation3 + $0x169] sm:$0xff]  ;;  %13312 = vst [vmem:[#allocation9_spill] sm:$0xff] %v12189_v28 }
 0x347   : > { %13311 = vst [vmem:[#allocation8_spill] sm:$0xff] %v12185_v7  ;;  %9786 = vmatprep.mubr.msk.f32.mxu1 %vm3918_vm3, %v12185_v7  ;;  %v12318_v40 = vld [vmem:[#allocation3 + $0x168] sm:$0xff] }
 0x348   : > { %9787 = vmatmul.mubr.msk.f32.gmra.mrb[14].mxu1 %vm3918_vm3, %v12189_v28  ;;  %v12333_v28 = vld [vmem:[#allocation3 + $0x1a] sm:$0xff]  ;;  %v12339_v7 = vld [vmem:[#allocation3 + $0x22] sm:$0xff] }
 0x349   : > { %9791 = vmatprep.mubr.msk.f32.mxu1 %vm3918_vm3, %v4007_v2  ;;  %v12244_v52 = vpop.f32.mrb[32].mxu0  ;;  %v4716_v2 = vld [vmem:[#allocation3 + $0x2] sm:$0xff]  ;;  %13317 = vst [vmem:[#allocation30_spill] sm:$0xff] %v12333_v28  ;;  %13318 = vst [vmem:[#allocation32_spill] sm:$0xff] %v12339_v7 }
 0x34a   : > { %13314 = vst [vmem:[#allocation25_spill] sm:$0xff] %v12244_v52  ;;  %v12248_v53 = vpop.f32.mrb[33].mxu0  ;;  %v12330_v52 = vld [vmem:[%s13104_s3 + $0x20] sm:$0xff] }
 0x34b   : > { %13315 = vst [vmem:[#allocation27_spill] sm:$0xff] %v12248_v53  ;;  %v4717_v53 = vld [vmem:[#allocation3 + $0xa] sm:$0xff] }
 0x34c   : > { %9792 = vmatmul.mubr.msk.f32.vlgmr.msra.gmra.mrb[16].mxu1 %vm3918_vm3, %v4008_v34  ;;  %v12322_v34 = vld [vmem:[#allocation3 + $0x170] sm:$0xff] }
 0x34d   : > { %9840 = vmatpush3.msra.mxu1 %v12109_v33  ;;  %9794 = vmatprep.mubr.msk.f32.mxu1 %vm3918_vm3, %v12200_v29  ;;  %v12218_v33 = vld [vmem:[#allocation3 + $0x48] sm:$0xff] }
 0x34e   : > { %9889 = vmatprep.subr.mxu1 %v12197_v63 }
 0x350   : > { %9795 = vmatmul.mubr.msk.f32.gmra.mrb[18].mxu1 %vm3918_vm3, %v12206_v9 }
 0x351   : > { %9797 = vmatprep.mubr.msk.f32.mxu1 %vm3918_vm3, %v12210_v10 }
 0x354   : > { %9798 = vmatmul.mubr.msk.f32.gmra.mrb[20].mxu1 %vm3918_vm3, %v12214_v6 }
 0x355   : > { %9800 = vmatprep.mubr.msk.f32.mxu1 %vm3918_vm3, %v12218_v33 }
 0x358   : > { %9801 = vmatmul.mubr.msk.f32.gmra.mrb[22].mxu1 %vm3918_vm3, %v12222_v23 }
 0x359   : > { %9803 = vmatprep.mubr.msk.f32.mxu1 %vm3918_vm3, %v12226_v36 }
 0x35c   : > { %9804 = vmatmul.mubr.msk.f32.gmra.mrb[24].mxu1 %vm3918_vm3, %v12230_v44 }
 0x35d   : > { %9806 = vmatprep.mubr.msk.f32.mxu1 %vm3918_vm3, %v12234_v45 }
 0x360   : > { %9807 = vmatmul.mubr.msk.f32.gmra.mrb[26].mxu1 %vm3918_vm3, %v12238_v46 }
 0x361   : > { %9809 = vmatprep.mubr.msk.f32.mxu1 %vm3918_vm3, %v12242_v48 }
 0x364   : > { %9810 = vmatmul.mubr.msk.f32.gmra.mrb[28].mxu1 %vm3918_vm3, %v12250_v54 }
 0x365   : > { %9812 = vmatprep.mubr.msk.f32.mxu1 %vm3918_vm3, %v12254_v55 }
 0x368   : > { %9813 = vmatmul.mubr.msk.f32.gmra.mrb[30].mxu1 %vm3918_vm3, %v12258_v56 }
 0x369   : > { %9815 = vmatprep.mubr.msk.f32.mxu1 %vm3918_vm3, %v12262_v60 }
 0x36c   : > { %9816 = vmatmul.mubr.msk.f32.gmra.mrb[0].mxu1 %vm3918_vm3, %v12266_v14 }
 0x36d   : > { %9818 = vmatprep.mubr.msk.f32.mxu1 %vm3918_vm3, %v12270_v15 }
 0x370   : > { %9819 = vmatmul.mubr.msk.f32.gmra.mrb[2].mxu1 %vm3918_vm3, %v12274_v16 }
 0x371   : > { %9821 = vmatprep.mubr.msk.f32.mxu1 %vm3918_vm3, %v12278_v18 }
 0x374   : > { %9822 = vmatmul.mubr.msk.f32.gmra.mrb[4].mxu1 %vm3918_vm3, %v12282_v1 }
 0x375   : > { %9824 = vmatprep.mubr.msk.f32.mxu1 %vm3918_vm3, %v12286_v62 }
 0x378   : > { %9825 = vmatmul.mubr.msk.f32.gmra.mrb[6].mxu1 %vm3918_vm3, %v12290_v21 }
 0x379   : > { %9827 = vmatprep.mubr.msk.f32.mxu1 %vm3918_vm3, %v12294_v25 }
 0x37c   : > { %9828 = vmatmul.mubr.msk.f32.gmra.mrb[8].mxu1 %vm3918_vm3, %v12298_v27 }
 0x37d   : > { %9830 = vmatprep.mubr.msk.f32.mxu1 %vm3918_vm3, %v12302_v31 }
 0x380   : > { %9831 = vmatmul.mubr.msk.f32.gmra.mrb[10].mxu1 %vm3918_vm3, %v12306_v32 }
 0x381   : > { %9833 = vmatprep.mubr.msk.f32.mxu1 %vm3918_vm3, %v12310_v38 }
 0x384   : > { %9834 = vmatmul.mubr.msk.f32.gmra.mrb[12].mxu1 %vm3918_vm3, %v12314_v4 }
 0x385   : > { %9836 = vmatprep.mubr.msk.f32.mxu1 %vm3918_vm3, %v12318_v40 }
 0x388   : > { %9837 = vmatmul.mubr.msk.f32.gmra.mrb[14].mxu1 %vm3918_vm3, %v12322_v34 }
 0x389   : > { %9841 = vmatprep.mubr.msk.f32.mxu1 %vm3918_vm3, %v4716_v2  ;;  %v12343_v2 = vld [vmem:[#allocation3 + $0x32] sm:$0xff] }
 0x38a   : > { %13319 = vst [vmem:[#allocation4_spill] sm:$0xff] %v12343_v2 }
 0x38c   : > { %9842 = vmatmul.mubr.msk.f32.vlgmr.msra.gmra.mrb[16].mxu1 %vm3918_vm3, %v4717_v53  ;;  %v12347_v53 = vld [vmem:[#allocation3 + $0x3a] sm:$0xff] }
 0x38d   : > { %9890 = vmatpush3.msra.mxu1 %v12197_v63  ;;  %9844 = vmatprep.mubr.msk.f32.mxu1 %vm3918_vm3, %v12333_v28  ;;  %13320 = vst [vmem:[#allocation5_spill] sm:$0xff] %v12347_v53  ;;  %v12351_v63 = vld [vmem:[#allocation3 + $0x4a] sm:$0xff]  ;;  %v12355_v28 = vld [vmem:[#allocation3 + $0x52] sm:$0xff] }
 0x38e   : > { %9939 = vmatprep.subr.mxu1 %v12330_v52  ;;  %13321 = vst [vmem:[#allocation6_spill] sm:$0xff] %v12351_v63  ;;  %13322 = vst [vmem:[#allocation7_spill] sm:$0xff] %v12355_v28 }
 0x390   : > { %9845 = vmatmul.mubr.msk.f32.gmra.mrb[18].mxu1 %vm3918_vm3, %v12339_v7  ;;  %v12359_v7 = vld [vmem:[#allocation3 + $0x62] sm:$0xff] }
 0x391   : > { %9847 = vmatprep.mubr.msk.f32.mxu1 %vm3918_vm3, %v12343_v2  ;;  %13323 = vst [vmem:[#allocation34_spill] sm:$0xff] %v12359_v7  ;;  %v12363_v2 = vld [vmem:[#allocation3 + $0x6a] sm:$0xff] }
 0x392   : > { %13324 = vst [vmem:[#allocation35_spill] sm:$0xff] %v12363_v2 }
 0x394   : > { %9848 = vmatmul.mubr.msk.f32.gmra.mrb[20].mxu1 %vm3918_vm3, %v12347_v53  ;;  %v12367_v53 = vld [vmem:[#allocation3 + $0x7a] sm:$0xff] }
 0x395   : > { %9850 = vmatprep.mubr.msk.f32.mxu1 %vm3918_vm3, %v12351_v63  ;;  %13325 = vst [vmem:[#allocation10_spill] sm:$0xff] %v12367_v53  ;;  %v12371_v63 = vld [vmem:[#allocation3 + $0x82] sm:$0xff] }
 0x396   : > { %13326 = vst [vmem:[#allocation11_spill] sm:$0xff] %v12371_v63 }
 0x398   : > { %9851 = vmatmul.mubr.msk.f32.gmra.mrb[22].mxu1 %vm3918_vm3, %v12355_v28  ;;  %v12375_v28 = vld [vmem:[#allocation3 + $0x92] sm:$0xff] }
 0x399   : > { %9853 = vmatprep.mubr.msk.f32.mxu1 %vm3918_vm3, %v12359_v7  ;;  %13327 = vst [vmem:[#allocation12_spill] sm:$0xff] %v12375_v28  ;;  %v12379_v7 = vld [vmem:[#allocation3 + $0x9a] sm:$0xff] }
 0x39a   : > { %13328 = vst [vmem:[#allocation13_spill] sm:$0xff] %v12379_v7 }
 0x39c   : > { %9854 = vmatmul.mubr.msk.f32.gmra.mrb[24].mxu1 %vm3918_vm3, %v12363_v2  ;;  %v12383_v2 = vld [vmem:[#allocation3 + $0xaa] sm:$0xff] }
 0x39d   : > { %9856 = vmatprep.mubr.msk.f32.mxu1 %vm3918_vm3, %v12367_v53  ;;  %13329 = vst [vmem:[#allocation14_spill] sm:$0xff] %v12383_v2  ;;  %v12387_v53 = vld [vmem:[#allocation3 + $0xb2] sm:$0xff] }
 0x39e   : > { %13330 = vst [vmem:[#allocation15_spill] sm:$0xff] %v12387_v53 }
 0x3a0   : > { %9857 = vmatmul.mubr.msk.f32.gmra.mrb[26].mxu1 %vm3918_vm3, %v12371_v63  ;;  %v12391_v63 = vld [vmem:[#allocation3 + $0xc2] sm:$0xff] }
 0x3a1   : > { %9859 = vmatprep.mubr.msk.f32.mxu1 %vm3918_vm3, %v12375_v28  ;;  %13331 = vst [vmem:[#allocation16_spill] sm:$0xff] %v12391_v63  ;;  %v12395_v28 = vld [vmem:[#allocation3 + $0xca] sm:$0xff] }
 0x3a2   : > { %13332 = vst [vmem:[#allocation17_spill] sm:$0xff] %v12395_v28 }
 0x3a4   : > { %9860 = vmatmul.mubr.msk.f32.gmra.mrb[28].mxu1 %vm3918_vm3, %v12379_v7  ;;  %v12399_v7 = vld [vmem:[#allocation3 + $0xda] sm:$0xff] }
 0x3a5   : > { %9862 = vmatprep.mubr.msk.f32.mxu1 %vm3918_vm3, %v12383_v2  ;;  %13333 = vst [vmem:[#allocation18_spill] sm:$0xff] %v12399_v7  ;;  %v12403_v2 = vld [vmem:[#allocation3 + $0xe2] sm:$0xff] }
 0x3a6   : > { %13334 = vst [vmem:[#allocation19_spill] sm:$0xff] %v12403_v2 }
 0x3a8   : > { %9863 = vmatmul.mubr.msk.f32.gmra.mrb[30].mxu1 %vm3918_vm3, %v12387_v53  ;;  %v12407_v53 = vld [vmem:[#allocation3 + $0xf2] sm:$0xff] }
 0x3a9   : > { %9865 = vmatprep.mubr.msk.f32.mxu1 %vm3918_vm3, %v12391_v63  ;;  %13335 = vst [vmem:[#allocation20_spill] sm:$0xff] %v12407_v53  ;;  %v12411_v63 = vld [vmem:[#allocation3 + $0xfa] sm:$0xff] }
 0x3aa   : > { %13336 = vst [vmem:[#allocation21_spill] sm:$0xff] %v12411_v63 }
 0x3ac   : > { %9866 = vmatmul.mubr.msk.f32.gmra.mrb[0].mxu1 %vm3918_vm3, %v12395_v28  ;;  %v12415_v28 = vld [vmem:[#allocation3 + $0x10a] sm:$0xff] }
 0x3ad   : > { %9868 = vmatprep.mubr.msk.f32.mxu1 %vm3918_vm3, %v12399_v7  ;;  %13337 = vst [vmem:[#allocation22_spill] sm:$0xff] %v12415_v28  ;;  %v12419_v7 = vld [vmem:[#allocation3 + $0x112] sm:$0xff] }
 0x3ae   : > { %13338 = vst [vmem:[#allocation24_spill] sm:$0xff] %v12419_v7 }
 0x3b0   : > { %9869 = vmatmul.mubr.msk.f32.gmra.mrb[2].mxu1 %vm3918_vm3, %v12403_v2  ;;  %v12423_v2 = vld [vmem:[#allocation3 + $0x122] sm:$0xff] }
 0x3b1   : > { %9871 = vmatprep.mubr.msk.f32.mxu1 %vm3918_vm3, %v12407_v53  ;;  %13339 = vst [vmem:[#allocation26_spill] sm:$0xff] %v12423_v2  ;;  %v12427_v53 = vld [vmem:[#allocation3 + $0x12a] sm:$0xff] }
 0x3b2   : > { %13340 = vst [vmem:[#allocation29_spill] sm:$0xff] %v12427_v53 }
 0x3b4   : > { %9872 = vmatmul.mubr.msk.f32.gmra.mrb[4].mxu1 %vm3918_vm3, %v12411_v63  ;;  %v12431_v63 = vld [vmem:[#allocation3 + $0x13a] sm:$0xff] }
 0x3b5   : > { %9874 = vmatprep.mubr.msk.f32.mxu1 %vm3918_vm3, %v12415_v28  ;;  %13341 = vst [vmem:[#allocation31_spill] sm:$0xff] %v12431_v63  ;;  %v12435_v28 = vld [vmem:[#allocation3 + $0x142] sm:$0xff] }
 0x3b8   : > { %9875 = vmatmul.mubr.msk.f32.gmra.mrb[6].mxu1 %vm3918_vm3, %v12419_v7  ;;  %v12439_v7 = vld [vmem:[#allocation3 + $0x152] sm:$0xff] }
 0x3b9   : > { %9877 = vmatprep.mubr.msk.f32.mxu1 %vm3918_vm3, %v12423_v2  ;;  %13342 = vst [vmem:[#allocation33_spill] sm:$0xff] %v12439_v7  ;;  %v12443_v2 = vld [vmem:[#allocation3 + $0x15a] sm:$0xff] }
 0x3bc   : > { %9878 = vmatmul.mubr.msk.f32.gmra.mrb[8].mxu1 %vm3918_vm3, %v12427_v53  ;;  %v12447_v53 = vld [vmem:[#allocation3 + $0x16a] sm:$0xff] }
 0x3bd   : > { %9880 = vmatprep.mubr.msk.f32.mxu1 %vm3918_vm3, %v12431_v63  ;;  %13343 = vst [vmem:[#allocation36_spill] sm:$0xff] %v12447_v53  ;;  %v12451_v63 = vld [vmem:[#allocation3 + $0x172] sm:$0xff] }
 0x3c0   : > { %9881 = vmatmul.mubr.msk.f32.gmra.mrb[10].mxu1 %vm3918_vm3, %v12435_v28 }
 0x3c1   : > { %9883 = vmatprep.mubr.msk.f32.mxu1 %vm3918_vm3, %v12439_v7  ;;  %v8491_v7 = vld [vmem:[%s13104_s3 + $0x28] sm:$0xff] }
 0x3c4   : > { %9884 = vmatmul.mubr.msk.f32.gmra.mrb[12].mxu1 %vm3918_vm3, %v12443_v2 }
 0x3c5   : > { %9886 = vmatprep.mubr.msk.f32.mxu1 %vm3918_vm3, %v12447_v53 }
 0x3c8   : > { %9887 = vmatmul.mubr.msk.f32.gmra.mrb[14].mxu1 %vm3918_vm3, %v12451_v63 }
 0x3c9   : > { %9891 = vmatprep.mubr.msk.f32.mxu1 %vm3918_vm3, %v12200_v29 }
 0x3cc   : > { %9892 = vmatmul.mubr.msk.f32.vlgmr.msra.gmra.mrb[16].mxu1 %vm3918_vm3, %v12206_v9 }
 0x3cd   : > { %9940 = vmatpush3.msra.mxu1 %v12330_v52  ;;  %9894 = vmatprep.mubr.msk.f32.mxu1 %vm3918_vm3, %v12210_v10 }
 0x3ce   : > { %9989 = vmatprep.subr.mxu1 %v8491_v7 }
 0x3d0   : > { %9895 = vmatmul.mubr.msk.f32.gmra.mrb[18].mxu1 %vm3918_vm3, %v12214_v6 }
 0x3d1   : > { %9897 = vmatprep.mubr.msk.f32.mxu1 %vm3918_vm3, %v12218_v33 }
 0x3d4   : > { %9898 = vmatmul.mubr.msk.f32.gmra.mrb[20].mxu1 %vm3918_vm3, %v12222_v23 }
 0x3d5   : > { %9900 = vmatprep.mubr.msk.f32.mxu1 %vm3918_vm3, %v12226_v36 }
 0x3d8   : > { %9901 = vmatmul.mubr.msk.f32.gmra.mrb[22].mxu1 %vm3918_vm3, %v12230_v44 }
 0x3d9   : > { %9903 = vmatprep.mubr.msk.f32.mxu1 %vm3918_vm3, %v12234_v45 }
 0x3dc   : > { %9904 = vmatmul.mubr.msk.f32.gmra.mrb[24].mxu1 %vm3918_vm3, %v12238_v46 }
 0x3dd   : > { %9906 = vmatprep.mubr.msk.f32.mxu1 %vm3918_vm3, %v12242_v48 }
 0x3e0   : > { %9907 = vmatmul.mubr.msk.f32.gmra.mrb[26].mxu1 %vm3918_vm3, %v12250_v54 }
 0x3e1   : > { %9909 = vmatprep.mubr.msk.f32.mxu1 %vm3918_vm3, %v12254_v55 }
 0x3e3   : > { %v12485_v29 = vpop.f32.mrb[34].mxu0 }
 0x3e4   : > { %13344 = vst [vmem:[#allocation37_spill] sm:$0xff] %v12485_v29  ;;  %v12487_v9 = vpop.f32.mrb[35].mxu0  ;;  %9910 = vmatmul.mubr.msk.f32.gmra.mrb[28].mxu1 %vm3918_vm3, %v12258_v56 }
 0x3e5   : > { %13345 = vst [vmem:[#allocation38_spill] sm:$0xff] %v12487_v9  ;;  %9912 = vmatprep.mubr.msk.f32.mxu1 %vm3918_vm3, %v12262_v60 }
 0x3e7   : > { %v12493_v52 = vpop.f32.mrb[36].mxu0 }
 0x3e8   : > { %13346 = vst [vmem:[#allocation39_spill] sm:$0xff] %v12493_v52  ;;  %v12495_v46 = vpop.f32.mrb[37].mxu0  ;;  %9913 = vmatmul.mubr.msk.f32.gmra.mrb[30].mxu1 %vm3918_vm3, %v12266_v14 }
 0x3e9   : > { %13347 = vst [vmem:[#allocation40_spill] sm:$0xff] %v12495_v46  ;;  %9915 = vmatprep.mubr.msk.f32.mxu1 %vm3918_vm3, %v12270_v15 }
 0x3eb   : > { %v12501_v55 = vpop.f32.mrb[38].mxu0 }
 0x3ec   : > { %13348 = vst [vmem:[#allocation41_spill] sm:$0xff] %v12501_v55  ;;  %v12503_v29 = vpop.f32.mrb[39].mxu0  ;;  %9916 = vmatmul.mubr.msk.f32.gmra.mrb[0].mxu1 %vm3918_vm3, %v12274_v16 }
 0x3ed   : > { %13349 = vst [vmem:[#allocation42_spill] sm:$0xff] %v12503_v29  ;;  %9918 = vmatprep.mubr.msk.f32.mxu1 %vm3918_vm3, %v12278_v18 }
 0x3ef   : > { %v12509_v9 = vpop.f32.mrb[40].mxu0 }
 0x3f0   : > { %13350 = vst [vmem:[#allocation43_spill] sm:$0xff] %v12509_v9  ;;  %v12511_v52 = vpop.f32.mrb[41].mxu0  ;;  %9919 = vmatmul.mubr.msk.f32.gmra.mrb[2].mxu1 %vm3918_vm3, %v12282_v1 }
 0x3f1   : > { %13351 = vst [vmem:[#allocation44_spill] sm:$0xff] %v12511_v52  ;;  %9921 = vmatprep.mubr.msk.f32.mxu1 %vm3918_vm3, %v12286_v62 }
 0x3f3   : > { %v12517_v46 = vpop.f32.mrb[42].mxu0 }
 0x3f4   : > { %13352 = vst [vmem:[#allocation45_spill] sm:$0xff] %v12517_v46  ;;  %v12519_v55 = vpop.f32.mrb[43].mxu0  ;;  %9922 = vmatmul.mubr.msk.f32.gmra.mrb[4].mxu1 %vm3918_vm3, %v12290_v21 }
 0x3f5   : > { %13353 = vst [vmem:[#allocation46_spill] sm:$0xff] %v12519_v55  ;;  %9924 = vmatprep.mubr.msk.f32.mxu1 %vm3918_vm3, %v12294_v25  ;;  %v13380_v55 = vld [vmem:[#allocation22_spill] sm:$0xff] }
 0x3f7   : > { %v12525_v29 = vpop.f32.mrb[44].mxu0 }
 0x3f8   : > { %13354 = vst [vmem:[#allocation47_spill] sm:$0xff] %v12525_v29  ;;  %v12527_v9 = vpop.f32.mrb[45].mxu0  ;;  %9925 = vmatmul.mubr.msk.f32.gmra.mrb[6].mxu1 %vm3918_vm3, %v12298_v27  ;;  %v13379_v29 = vld [vmem:[#allocation21_spill] sm:$0xff] }
 0x3f9   : > { %13355 = vst [vmem:[#allocation48_spill] sm:$0xff] %v12527_v9  ;;  %9927 = vmatprep.mubr.msk.f32.mxu1 %vm3918_vm3, %v12302_v31  ;;  %v12547_v9 = vld [vmem:[#allocation3 + $0x180] sm:$0xff] }
 0x3fb   : > { %v12533_v52 = vpop.f32.mrb[46].mxu0 }
 0x3fc   : > { %13356 = vst [vmem:[#allocation49_spill] sm:$0xff] %v12533_v52  ;;  %v12535_v46 = vpop.f32.mrb[47].mxu0  ;;  %9928 = vmatmul.mubr.msk.f32.gmra.mrb[8].mxu1 %vm3918_vm3, %v12306_v32  ;;  %v8524_v52 = vld [vmem:[%s13104_s3 + $0x30] sm:$0xff] }
 0x3fd   : > { %13357 = vst [vmem:[#allocation50_spill] sm:$0xff] %v12535_v46  ;;  %9930 = vmatprep.mubr.msk.f32.mxu1 %vm3918_vm3, %v12310_v38  ;;  %v12551_v46 = vld [vmem:[#allocation3 + $0x188] sm:$0xff] }
 0x400   : > { %9931 = vmatmul.mubr.msk.f32.gmra.mrb[10].mxu1 %vm3918_vm3, %v12314_v4 }
 0x401   : > { %9933 = vmatprep.mubr.msk.f32.mxu1 %vm3918_vm3, %v12318_v40 }
 0x404   : > { %9934 = vmatmul.mubr.msk.f32.gmra.mrb[12].mxu1 %vm3918_vm3, %v12322_v34 }
 0x405   : > { %9936 = vmatprep.mubr.msk.f32.mxu1 %vm3918_vm3, %v12547_v9 }
 0x408   : > { %9937 = vmatmul.mubr.msk.f32.gmra.mrb[14].mxu1 %vm3918_vm3, %v12551_v46 }
 0x409   : > { %9941 = vmatprep.mubr.msk.f32.mxu1 %vm3918_vm3, %v12014_v35  ;;  %v13358_v35 = vld [vmem:[#allocation8_spill] sm:$0xff] }
 0x40c   : > { %9942 = vmatmul.mubr.msk.f32.vlgmr.msra.gmra.mrb[16].mxu1 %vm3918_vm3, %v12020_v8  ;;  %v13359_v8 = vld [vmem:[#allocation9_spill] sm:$0xff] }
 0x40d   : > { %9990 = vmatpush3.msra.mxu1 %v8491_v7  ;;  %9944 = vmatprep.mubr.msk.f32.mxu1 %vm3918_vm3, %v12026_v13  ;;  %v12618_v13 = vld [vmem:[#allocation3 + $0x181] sm:$0xff]  ;;  %v13375_v7 = vld [vmem:[#allocation17_spill] sm:$0xff] }
 0x40e   : > { %10039 = vmatprep.subr.mxu1 %v8524_v52 }
 0x410   : > { %9945 = vmatmul.mubr.msk.f32.gmra.mrb[18].mxu1 %vm3918_vm3, %v12032_v43  ;;  %v12622_v43 = vld [vmem:[#allocation3 + $0x189] sm:$0xff] }
 0x411   : > { %9947 = vmatprep.mubr.msk.f32.mxu1 %vm3918_vm3, %v12038_v49  ;;  %v13360_v49 = vld [vmem:[#allocation30_spill] sm:$0xff] }
 0x414   : > { %9948 = vmatmul.mubr.msk.f32.gmra.mrb[20].mxu1 %vm3918_vm3, %v12044_v51  ;;  %v8557_v51 = vld [vmem:[%s13104_s3 + $0x38] sm:$0xff] }
 0x415   : > { %9950 = vmatprep.mubr.msk.f32.mxu1 %vm3918_vm3, %v12050_v57  ;;  %v13361_v57 = vld [vmem:[#allocation32_spill] sm:$0xff] }
 0x418   : > { %9951 = vmatmul.mubr.msk.f32.gmra.mrb[22].mxu1 %vm3918_vm3, %v12056_v59  ;;  %v13362_v59 = vld [vmem:[#allocation4_spill] sm:$0xff] }
 0x419   : > { %9953 = vmatprep.mubr.msk.f32.mxu1 %vm3918_vm3, %v12062_v17  ;;  %v13363_v17 = vld [vmem:[#allocation5_spill] sm:$0xff] }
 0x41c   : > { %9954 = vmatmul.mubr.msk.f32.gmra.mrb[24].mxu1 %vm3918_vm3, %v12068_v19  ;;  %v13364_v19 = vld [vmem:[#allocation6_spill] sm:$0xff] }
 0x41d   : > { %9956 = vmatprep.mubr.msk.f32.mxu1 %vm3918_vm3, %v12074_v22  ;;  %v13365_v22 = vld [vmem:[#allocation7_spill] sm:$0xff] }
 0x420   : > { %9957 = vmatmul.mubr.msk.f32.gmra.mrb[26].mxu1 %vm3918_vm3, %v12080_v26  ;;  %v13366_v26 = vld [vmem:[#allocation34_spill] sm:$0xff] }
 0x421   : > { %9959 = vmatprep.mubr.msk.f32.mxu1 %vm3918_vm3, %v12086_v39  ;;  %v13367_v39 = vld [vmem:[#allocation35_spill] sm:$0xff] }
 0x424   : > { %9960 = vmatmul.mubr.msk.f32.gmra.mrb[28].mxu1 %vm3918_vm3, %v12092_v3  ;;  %v13368_v3 = vld [vmem:[#allocation10_spill] sm:$0xff] }
 0x425   : > { %9962 = vmatprep.mubr.msk.f32.mxu1 %vm3918_vm3, %v12098_v5  ;;  %v13369_v5 = vld [vmem:[#allocation11_spill] sm:$0xff] }
 0x428   : > { %9963 = vmatmul.mubr.msk.f32.gmra.mrb[30].mxu1 %vm3918_vm3, %v12104_v30  ;;  %v13370_v30 = vld [vmem:[#allocation12_spill] sm:$0xff] }
 0x429   : > { %9965 = vmatprep.mubr.msk.f32.mxu1 %vm3918_vm3, %v12116_v11  ;;  %v13371_v11 = vld [vmem:[#allocation13_spill] sm:$0xff] }
 0x42c   : > { %9966 = vmatmul.mubr.msk.f32.gmra.mrb[0].mxu1 %vm3918_vm3, %v12123_v12  ;;  %v13372_v12 = vld [vmem:[#allocation14_spill] sm:$0xff] }
 0x42d   : > { %9968 = vmatprep.mubr.msk.f32.mxu1 %vm3918_vm3, %v12129_v47  ;;  %v13373_v47 = vld [vmem:[#allocation15_spill] sm:$0xff] }
 0x430   : > { %9969 = vmatmul.mubr.msk.f32.gmra.mrb[2].mxu1 %vm3918_vm3, %v12135_v50  ;;  %v13374_v50 = vld [vmem:[#allocation16_spill] sm:$0xff] }
 0x431   : > { %9971 = vmatprep.mubr.msk.f32.mxu1 %vm3918_vm3, %v12141_v58 }
 0x434   : > { %9972 = vmatmul.mubr.msk.f32.gmra.mrb[4].mxu1 %vm3918_vm3, %v12147_v61 }
 0x435   : > { %9974 = vmatprep.mubr.msk.f32.mxu1 %vm3918_vm3, %v12153_v0 }
 0x438   : > { %9975 = vmatmul.mubr.msk.f32.gmra.mrb[6].mxu1 %vm3918_vm3, %v12159_v20 }
 0x439   : > { %9977 = vmatprep.mubr.msk.f32.mxu1 %vm3918_vm3, %v12165_v37 }
 0x43c   : > { %9978 = vmatmul.mubr.msk.f32.gmra.mrb[8].mxu1 %vm3918_vm3, %v12171_v42 }
 0x43d   : > { %9980 = vmatprep.mubr.msk.f32.mxu1 %vm3918_vm3, %v12176_v41 }
 0x440   : > { %9981 = vmatmul.mubr.msk.f32.gmra.mrb[10].mxu1 %vm3918_vm3, %v12181_v24 }
 0x441   : > { %9983 = vmatprep.mubr.msk.f32.mxu1 %vm3918_vm3, %v13358_v35 }
 0x444   : > { %9984 = vmatmul.mubr.msk.f32.gmra.mrb[12].mxu1 %vm3918_vm3, %v13359_v8 }
 0x445   : > { %9986 = vmatprep.mubr.msk.f32.mxu1 %vm3918_vm3, %v12618_v13 }
 0x448   : > { %9987 = vmatmul.mubr.msk.f32.gmra.mrb[14].mxu1 %vm3918_vm3, %v12622_v43 }
 0x449   : > { %9991 = vmatprep.mubr.msk.f32.mxu1 %vm3918_vm3, %v13360_v49  ;;  %v13377_v49 = vld [vmem:[#allocation19_spill] sm:$0xff] }
 0x44c   : > { %9992 = vmatmul.mubr.msk.f32.vlgmr.msra.gmra.mrb[16].mxu1 %vm3918_vm3, %v13361_v57  ;;  %v13378_v57 = vld [vmem:[#allocation20_spill] sm:$0xff] }
 0x44d   : > { %10040 = vmatpush3.msra.mxu1 %v8524_v52  ;;  %9994 = vmatprep.mubr.msk.f32.mxu1 %vm3918_vm3, %v13362_v59  ;;  %v13376_v52 = vld [vmem:[#allocation18_spill] sm:$0xff] }
 0x44e   : > { %10089 = vmatprep.subr.mxu1 %v8557_v51 }
 0x450   : > { %9995 = vmatmul.mubr.msk.f32.gmra.mrb[18].mxu1 %vm3918_vm3, %v13363_v17 }
 0x451   : > { %9997 = vmatprep.mubr.msk.f32.mxu1 %vm3918_vm3, %v13364_v19 }
 0x454   : > { %9998 = vmatmul.mubr.msk.f32.gmra.mrb[20].mxu1 %vm3918_vm3, %v13365_v22 }
 0x455   : > { %10000 = vmatprep.mubr.msk.f32.mxu1 %vm3918_vm3, %v13366_v26 }
 0x458   : > { %10001 = vmatmul.mubr.msk.f32.gmra.mrb[22].mxu1 %vm3918_vm3, %v13367_v39 }
 0x459   : > { %10003 = vmatprep.mubr.msk.f32.mxu1 %vm3918_vm3, %v13368_v3 }
 0x45c   : > { %10004 = vmatmul.mubr.msk.f32.gmra.mrb[24].mxu1 %vm3918_vm3, %v13369_v5 }
 0x45d   : > { %10006 = vmatprep.mubr.msk.f32.mxu1 %vm3918_vm3, %v13370_v30 }
 0x460   : > { %10007 = vmatmul.mubr.msk.f32.gmra.mrb[26].mxu1 %vm3918_vm3, %v13371_v11 }
 0x461   : > { %10009 = vmatprep.mubr.msk.f32.mxu1 %vm3918_vm3, %v13372_v12 }
 0x464   : > { %10010 = vmatmul.mubr.msk.f32.gmra.mrb[28].mxu1 %vm3918_vm3, %v13373_v47  ;;  %v13381_v47 = vld [vmem:[#allocation24_spill] sm:$0xff] }
 0x465   : > { %10012 = vmatprep.mubr.msk.f32.mxu1 %vm3918_vm3, %v13374_v50  ;;  %v13382_v50 = vld [vmem:[#allocation26_spill] sm:$0xff] }
 0x468   : > { %10013 = vmatmul.mubr.msk.f32.gmra.mrb[30].mxu1 %vm3918_vm3, %v13375_v7  ;;  %v13383_v7 = vld [vmem:[#allocation29_spill] sm:$0xff] }
 0x469   : > { %10015 = vmatprep.mubr.msk.f32.mxu1 %vm3918_vm3, %v13376_v52  ;;  %v13384_v52 = vld [vmem:[#allocation31_spill] sm:$0xff] }
 0x46c   : > { %10016 = vmatmul.mubr.msk.f32.gmra.mrb[0].mxu1 %vm3918_vm3, %v13377_v49 }
 0x46d   : > { %10018 = vmatprep.mubr.msk.f32.mxu1 %vm3918_vm3, %v13378_v57  ;;  %v13385_v57 = vld [vmem:[#allocation33_spill] sm:$0xff] }
 0x470   : > { %10019 = vmatmul.mubr.msk.f32.gmra.mrb[2].mxu1 %vm3918_vm3, %v13379_v29 }
 0x471   : > { %10021 = vmatprep.mubr.msk.f32.mxu1 %vm3918_vm3, %v13380_v55 }
 0x474   : > { %10022 = vmatmul.mubr.msk.f32.gmra.mrb[4].mxu1 %vm3918_vm3, %v13381_v47 }
 0x475   : > { %10024 = vmatprep.mubr.msk.f32.mxu1 %vm3918_vm3, %v13382_v50  ;;  %v12689_v50 = vld [vmem:[#allocation3 + $0x182] sm:$0xff] }
 0x478   : > { %10025 = vmatmul.mubr.msk.f32.gmra.mrb[6].mxu1 %vm3918_vm3, %v13383_v7 }
 0x479   : > { %10027 = vmatprep.mubr.msk.f32.mxu1 %vm3918_vm3, %v13384_v52  ;;  %v12693_v52 = vld [vmem:[#allocation3 + $0x18a] sm:$0xff] }
 0x47c   : > { %10028 = vmatmul.mubr.msk.f32.gmra.mrb[8].mxu1 %vm3918_vm3, %v12435_v28 }
 0x47d   : > { %10030 = vmatprep.mubr.msk.f32.mxu1 %vm3918_vm3, %v13385_v57 }
 0x480   : > { %10031 = vmatmul.mubr.msk.f32.gmra.mrb[10].mxu1 %vm3918_vm3, %v12443_v2 }
 0x481   : > { %10033 = vmatprep.mubr.msk.f32.mxu1 %vm3918_vm3, %v12447_v53  ;;  %v8590_v53 = vld [vmem:[%s13104_s3 + $0x40] sm:$0xff] }
 0x484   : > { %10034 = vmatmul.mubr.msk.f32.gmra.mrb[12].mxu1 %vm3918_vm3, %v12451_v63 }
 0x485   : > { %10036 = vmatprep.mubr.msk.f32.mxu1 %vm3918_vm3, %v12689_v50 }
 0x488   : > { %10037 = vmatmul.mubr.msk.f32.gmra.mrb[14].mxu1 %vm3918_vm3, %v12693_v52 }
 0x489   : > { %10041 = vmatprep.mubr.msk.f32.mxu1 %vm3918_vm3, %v12210_v10  ;;  %v13386_v10 = vld [vmem:[#allocation23_spill] sm:$0xff] }
 0x48c   : > { %10042 = vmatmul.mubr.msk.f32.vlgmr.msra.gmra.mrb[16].mxu1 %vm3918_vm3, %v12214_v6  ;;  %v13387_v6 = vld [vmem:[#allocation28_spill] sm:$0xff] }
 0x48d   : > { %10090 = vmatpush3.msra.mxu1 %v8557_v51  ;;  %10044 = vmatprep.mubr.msk.f32.mxu1 %vm3918_vm3, %v12218_v33  ;;  %v6295_v33 = vld [vmem:[#allocation3 + $0x198] sm:$0xff]  ;;  %v7476_v51 = vld [vmem:[%s11012_s10 + $0x58] sm:$0xff] }
 0x48e   : > { %10139 = vmatprep.subr.mxu1 %v8590_v53 }
 0x490   : > { %10045 = vmatmul.mubr.msk.f32.gmra.mrb[18].mxu1 %vm3918_vm3, %v12222_v23  ;;  %v6296_v23 = vld [vmem:[#allocation3 + $0x1a0] sm:$0xff] }
 0x491   : > { %10047 = vmatprep.mubr.msk.f32.mxu1 %vm3918_vm3, %v12226_v36  ;;  %v6652_v36 = vld [vmem:[#allocation3 + $0x31] sm:$0xff] }
 0x494   : > { %10048 = vmatmul.mubr.msk.f32.gmra.mrb[20].mxu1 %vm3918_vm3, %v12230_v44  ;;  %v6653_v44 = vld [vmem:[#allocation3 + $0x39] sm:$0xff] }
 0x495   : > { %10050 = vmatprep.mubr.msk.f32.mxu1 %vm3918_vm3, %v12234_v45  ;;  %v7497_v45 = vld [vmem:[%s13106_s5] sm:$0xf] }
 0x498   : > { %10051 = vmatmul.mubr.msk.f32.gmra.mrb[22].mxu1 %vm3918_vm3, %v13386_v10  ;;  %v7494_v10 = vld [vmem:[%s11012_s10 + $0xe8] sm:$0xff] }
 0x499   : > { %10053 = vmatprep.mubr.msk.f32.mxu1 %vm3918_vm3, %v12242_v48  ;;  %v6654_v48 = vld [vmem:[#allocation3 + $0x49] sm:$0xff] }
 0x49c   : > { %10054 = vmatmul.mubr.msk.f32.gmra.mrb[24].mxu1 %vm3918_vm3, %v12250_v54  ;;  %v6656_v54 = vld [vmem:[#allocation3 + $0x61] sm:$0xff] }
 0x49d   : > { %10056 = vmatprep.mubr.msk.f32.mxu1 %vm3918_vm3, %v13387_v6  ;;  %v7495_v6 = vld [vmem:[%s11012_s10 + $0xf0] sm:$0xff] }
 0x4a0   : > { %10057 = vmatmul.mubr.msk.f32.gmra.mrb[26].mxu1 %vm3918_vm3, %v12258_v56  ;;  %v6657_v56 = vld [vmem:[#allocation3 + $0x69] sm:$0xff] }
 0x4a1   : > { %10059 = vmatprep.mubr.msk.f32.mxu1 %vm3918_vm3, %v12262_v60  ;;  %v6658_v60 = vld [vmem:[#allocation3 + $0x79] sm:$0xff] }
 0x4a4   : > { %10060 = vmatmul.mubr.msk.f32.gmra.mrb[28].mxu1 %vm3918_vm3, %v12266_v14  ;;  %v6659_v14 = vld [vmem:[#allocation3 + $0x81] sm:$0xff] }
 0x4a5   : > { %10062 = vmatprep.mubr.msk.f32.mxu1 %vm3918_vm3, %v12270_v15  ;;  %v6660_v15 = vld [vmem:[#allocation3 + $0x91] sm:$0xff] }
 0x4a8   : > { %10063 = vmatmul.mubr.msk.f32.gmra.mrb[30].mxu1 %vm3918_vm3, %v12274_v16  ;;  %v6661_v16 = vld [vmem:[#allocation3 + $0x99] sm:$0xff] }
 0x4a9   : > { %10065 = vmatprep.mubr.msk.f32.mxu1 %vm3918_vm3, %v12278_v18  ;;  %v6662_v18 = vld [vmem:[#allocation3 + $0xa9] sm:$0xff] }
 0x4ac   : > { %10066 = vmatmul.mubr.msk.f32.gmra.mrb[0].mxu1 %vm3918_vm3, %v12282_v1  ;;  %v6663_v1 = vld [vmem:[#allocation3 + $0xb1] sm:$0xff] }
 0x4ad   : > { %10068 = vmatprep.mubr.msk.f32.mxu1 %vm3918_vm3, %v12286_v62  ;;  %v6664_v62 = vld [vmem:[#allocation3 + $0xc1] sm:$0xff] }
 0x4b0   : > { %10069 = vmatmul.mubr.msk.f32.gmra.mrb[2].mxu1 %vm3918_vm3, %v12290_v21  ;;  %v6665_v21 = vld [vmem:[#allocation3 + $0xc9] sm:$0xff] }
 0x4b1   : > { %10071 = vmatprep.mubr.msk.f32.mxu1 %vm3918_vm3, %v12294_v25  ;;  %v6666_v25 = vld [vmem:[#allocation3 + $0xd9] sm:$0xff] }
 0x4b4   : > { %10072 = vmatmul.mubr.msk.f32.gmra.mrb[4].mxu1 %vm3918_vm3, %v12298_v27  ;;  %v6667_v27 = vld [vmem:[#allocation3 + $0xe1] sm:$0xff] }
 0x4b5   : > { %10074 = vmatprep.mubr.msk.f32.mxu1 %vm3918_vm3, %v12302_v31  ;;  %v6668_v31 = vld [vmem:[#allocation3 + $0xf1] sm:$0xff] }
 0x4b8   : > { %10075 = vmatmul.mubr.msk.f32.gmra.mrb[6].mxu1 %vm3918_vm3, %v12306_v32  ;;  %v6669_v32 = vld [vmem:[#allocation3 + $0xf9] sm:$0xff] }
 0x4b9   : > { %10077 = vmatprep.mubr.msk.f32.mxu1 %vm3918_vm3, %v12310_v38  ;;  %v13394_v38 = vld [vmem:[#allocation31_spill] sm:$0xff] }
 0x4bc   : > { %10078 = vmatmul.mubr.msk.f32.gmra.mrb[8].mxu1 %vm3918_vm3, %v12314_v4  ;;  %v7069_v4 = vld [vmem:[#allocation3 + $0x19a] sm:$0xff] }
 0x4bd   : > { %10080 = vmatprep.mubr.msk.f32.mxu1 %vm3918_vm3, %v12318_v40  ;;  %v7465_v40 = vld [vmem:[%s11012_s10] sm:$0xff] }
 0x4c0   : > { %10081 = vmatmul.mubr.msk.f32.gmra.mrb[10].mxu1 %vm3918_vm3, %v12322_v34  ;;  %v7466_v34 = vld [vmem:[%s11012_s10 + $0x8] sm:$0xff] }
 0x4c1   : > { %10083 = vmatprep.mubr.msk.f32.mxu1 %vm3918_vm3, %v12547_v9  ;;  %v7471_v9 = vld [vmem:[%s11012_s10 + $0x30] sm:$0xff] }
 0x4c4   : > { %10084 = vmatmul.mubr.msk.f32.gmra.mrb[12].mxu1 %vm3918_vm3, %v12551_v46  ;;  %v6655_v46 = vld [vmem:[#allocation3 + $0x51] sm:$0xff] }
 0x4c5   : > { %10086 = vmatprep.mubr.msk.f32.mxu1 %vm3918_vm3, %v6295_v33  ;;  %v7496_v33 = vld [vmem:[%s11012_s10 + $0xf8] sm:$0xff] }
 0x4c8   : > { %10087 = vmatmul.mubr.msk.f32.gmra.mrb[14].mxu1 %vm3918_vm3, %v6296_v23  ;;  %v12940_v23 = vld [vmem:[%s13105_s4] ss:$0 sm:$0xff] }
 0x4c9   : > { %10091 = vmatprep.mubr.msk.f32.mxu1 %vm3918_vm3, %v6652_v36  ;;  %v13396_v36 = vld [vmem:[#allocation25_spill] sm:$0xff] }
 0x4cc   : > { %10092 = vmatmul.mubr.msk.f32.vlgmr.msra.gmra.mrb[16].mxu1 %vm3918_vm3, %v6653_v44  ;;  %v10241_v44 = vadd.f32 %v13396_v36, %v12940_v23 }
 0x4cd   : > { %10140 = vmatpush3.msra.mxu1 %v8590_v53  ;;  %10094 = vmatprep.mubr.msk.f32.mxu1 %vm3918_vm3, %v6654_v48  ;;  %v7468_v53 = vld [vmem:[%s11012_s10 + $0x18] sm:$0xff] }
 0x4ce   : > { %10189 = vmatprep.subr.msk.mxu1 %vm563_vm0, %v7497_v45 }
 0x4d0   : > { %10095 = vmatmul.mubr.msk.f32.gmra.mrb[18].mxu1 %vm3918_vm3, %v6655_v46 }
 0x4d1   : > { %10097 = vmatprep.mubr.msk.f32.mxu1 %vm3918_vm3, %v6656_v54  ;;  %v12949_v54 = vld [vmem:[%s13107_s6] ss:$0 sm:$0xff] }
 0x4d4   : > { %10098 = vmatmul.mubr.msk.f32.gmra.mrb[20].mxu1 %vm3918_vm3, %v6657_v56 }
 0x4d5   : > { %10100 = vmatprep.mubr.msk.f32.mxu1 %vm3918_vm3, %v6658_v60 }
 0x4d8   : > { %10101 = vmatmul.mubr.msk.f32.gmra.mrb[22].mxu1 %vm3918_vm3, %v6659_v14 }
 0x4d9   : > { %10103 = vmatprep.mubr.msk.f32.mxu1 %vm3918_vm3, %v6660_v15  ;;  %v13398_v15 = vld [vmem:[#allocation37_spill] sm:$0xff] }
 0x4dc   : > { %10104 = vmatmul.mubr.msk.f32.gmra.mrb[24].mxu1 %vm3918_vm3, %v6661_v16  ;;  %v10245_v16 = vadd.f32 %v13398_v15, %v12940_v23 }
 0x4dd   : > { %10106 = vmatprep.mubr.msk.f32.mxu1 %vm3918_vm3, %v6662_v18 }
 0x4e0   : > { %10107 = vmatmul.mubr.msk.f32.gmra.mrb[26].mxu1 %vm3918_vm3, %v6663_v1  ;;  %v13399_v1 = vld [vmem:[#allocation38_spill] sm:$0xff] }
 0x4e1   : > { %10109 = vmatprep.mubr.msk.f32.mxu1 %vm3918_vm3, %v6664_v62  ;;  %v10247_v62 = vadd.f32 %v12940_v23, %v13399_v1 }
 0x4e4   : > { %10110 = vmatmul.mubr.msk.f32.gmra.mrb[28].mxu1 %vm3918_vm3, %v6665_v21 }
 0x4e5   : > { %10112 = vmatprep.mubr.msk.f32.mxu1 %vm3918_vm3, %v6666_v25 }
 0x4e8   : > { %10113 = vmatmul.mubr.msk.f32.gmra.mrb[30].mxu1 %vm3918_vm3, %v6667_v27 }
 0x4e9   : > { %10115 = vmatprep.mubr.msk.f32.mxu1 %vm3918_vm3, %v6668_v31 }
 0x4ec   : > { %10116 = vmatmul.mubr.msk.f32.gmra.mrb[0].mxu1 %vm3918_vm3, %v6669_v32 }
 0x4ed   : > { %10118 = vmatprep.mubr.msk.f32.mxu1 %vm3918_vm3, %v12141_v58  ;;  %v6682_v58 = vld [vmem:[#allocation3 + $0x199] sm:$0xff] }
 0x4f0   : > { %10119 = vmatmul.mubr.msk.f32.gmra.mrb[2].mxu1 %vm3918_vm3, %v12147_v61  ;;  %v6683_v61 = vld [vmem:[#allocation3 + $0x1a1] sm:$0xff] }
 0x4f1   : > { %10121 = vmatprep.mubr.msk.f32.mxu1 %vm3918_vm3, %v12153_v0  ;;  %v13388_v0 = vld [vmem:[#allocation15_spill] sm:$0xff] }
 0x4f4   : > { %10122 = vmatmul.mubr.msk.f32.gmra.mrb[4].mxu1 %vm3918_vm3, %v12159_v20  ;;  %v13389_v20 = vld [vmem:[#allocation16_spill] sm:$0xff] }
 0x4f5   : > { %10124 = vmatprep.mubr.msk.f32.mxu1 %vm3918_vm3, %v12165_v37  ;;  %v13390_v37 = vld [vmem:[#allocation17_spill] sm:$0xff] }
 0x4f8   : > { %10125 = vmatmul.mubr.msk.f32.gmra.mrb[6].mxu1 %vm3918_vm3, %v12171_v42  ;;  %v13391_v42 = vld [vmem:[#allocation18_spill] sm:$0xff] }
 0x4f9   : > { %10127 = vmatprep.mubr.msk.f32.mxu1 %vm3918_vm3, %v12176_v41  ;;  %v13392_v41 = vld [vmem:[#allocation20_spill] sm:$0xff] }
 0x4fc   : > { %10128 = vmatmul.mubr.msk.f32.gmra.mrb[8].mxu1 %vm3918_vm3, %v12181_v24  ;;  %v13393_v24 = vld [vmem:[#allocation26_spill] sm:$0xff] }
 0x4fd   : > { %10130 = vmatprep.mubr.msk.f32.mxu1 %vm3918_vm3, %v13358_v35  ;;  %v7472_v35 = vld [vmem:[%s11012_s10 + $0x38] sm:$0xff] }
 0x500   : > { %10131 = vmatmul.mubr.msk.f32.gmra.mrb[10].mxu1 %vm3918_vm3, %v13359_v8  ;;  %v7473_v8 = vld [vmem:[%s11012_s10 + $0x40] sm:$0xff] }
 0x501   : > { %10133 = vmatprep.mubr.msk.f32.mxu1 %vm3918_vm3, %v12618_v13  ;;  %v7474_v13 = vld [vmem:[%s11012_s10 + $0x48] sm:$0xff] }
 0x504   : > { %10134 = vmatmul.mubr.msk.f32.gmra.mrb[12].mxu1 %vm3918_vm3, %v12622_v43  ;;  %v7475_v43 = vld [vmem:[%s11012_s10 + $0x50] sm:$0xff] }
 0x505   : > { %10136 = vmatprep.mubr.msk.f32.mxu1 %vm3918_vm3, %v6682_v58 }
 0x508   : > { %10137 = vmatmul.mubr.msk.f32.gmra.mrb[14].mxu1 %vm3918_vm3, %v6683_v61 }
 0x509   : > { %10141 = vmatprep.mubr.msk.f32.mxu1 %vm3918_vm3, %v13362_v59  ;;  %v7477_v59 = vld [vmem:[%s11012_s10 + $0x60] sm:$0xff] }
 0x50c   : > { %10142 = vmatmul.mubr.msk.f32.vlgmr.msra.gmra.mrb[16].mxu1 %vm3918_vm3, %v13363_v17  ;;  %v7478_v17 = vld [vmem:[%s11012_s10 + $0x68] sm:$0xff] }
 0x50d   : > { %10190 = vmatpush3.msk.msra.mxu1 %vm563_vm0, %v7497_v45  ;;  %10144 = vmatprep.mubr.msk.f32.mxu1 %vm3918_vm3, %v13364_v19  ;;  %v7479_v19 = vld [vmem:[%s11012_s10 + $0x70] sm:$0xff]  ;;  %v13397_v45 = vld [vmem:[#allocation27_spill] sm:$0xff] }
 0x50e   : > { %v10243_v48 = vadd.f32 %v12940_v23, %v13397_v45 }
 0x510   : > { %10145 = vmatmul.mubr.msk.f32.gmra.mrb[18].mxu1 %vm3918_vm3, %v13365_v22  ;;  %v7480_v22 = vld [vmem:[%s11012_s10 + $0x78] sm:$0xff] }
 0x511   : > { %10147 = vmatprep.mubr.msk.f32.mxu1 %vm3918_vm3, %v13366_v26  ;;  %v7481_v26 = vld [vmem:[%s11012_s10 + $0x80] sm:$0xff] }
 0x514   : > { %10148 = vmatmul.mubr.msk.f32.gmra.mrb[20].mxu1 %vm3918_vm3, %v13367_v39  ;;  %v7482_v39 = vld [vmem:[%s11012_s10 + $0x88] sm:$0xff] }
 0x515   : > { %10150 = vmatprep.mubr.msk.f32.mxu1 %vm3918_vm3, %v13368_v3  ;;  %v7483_v3 = vld [vmem:[%s11012_s10 + $0x90] sm:$0xff] }
 0x518   : > { %10151 = vmatmul.mubr.msk.f32.gmra.mrb[22].mxu1 %vm3918_vm3, %v13369_v5  ;;  %v7484_v5 = vld [vmem:[%s11012_s10 + $0x98] sm:$0xff] }
 0x519   : > { %10153 = vmatprep.mubr.msk.f32.mxu1 %vm3918_vm3, %v13370_v30  ;;  %v7485_v30 = vld [vmem:[%s11012_s10 + $0xa0] sm:$0xff] }
 0x51c   : > { %10154 = vmatmul.mubr.msk.f32.gmra.mrb[24].mxu1 %vm3918_vm3, %v13371_v11  ;;  %v7486_v11 = vld [vmem:[%s11012_s10 + $0xa8] sm:$0xff] }
 0x51d   : > { %10156 = vmatprep.mubr.msk.f32.mxu1 %vm3918_vm3, %v13372_v12  ;;  %v7487_v12 = vld [vmem:[%s11012_s10 + $0xb0] sm:$0xff] }
 0x520   : > { %10157 = vmatmul.mubr.msk.f32.gmra.mrb[26].mxu1 %vm3918_vm3, %v13388_v0  ;;  %v13400_v0 = vld [vmem:[#allocation39_spill] sm:$0xff] }
 0x521   : > { %10159 = vmatprep.mubr.msk.f32.mxu1 %vm3918_vm3, %v13389_v20  ;;  %v10249_v20 = vadd.f32 %v13400_v0, %v12940_v23 }
 0x524   : > { %10160 = vmatmul.mubr.msk.f32.gmra.mrb[28].mxu1 %vm3918_vm3, %v13390_v37 }
 0x525   : > { %10162 = vmatprep.mubr.msk.f32.mxu1 %vm3918_vm3, %v13391_v42  ;;  %v13401_v42 = vld [vmem:[#allocation40_spill] sm:$0xff] }
 0x528   : > { %10163 = vmatmul.mubr.msk.f32.gmra.mrb[30].mxu1 %vm3918_vm3, %v13377_v49  ;;  %v7492_v49 = vld [vmem:[%s11012_s10 + $0xd8] sm:$0xff] }
 0x529   : > { %10165 = vmatprep.mubr.msk.f32.mxu1 %vm3918_vm3, %v13392_v41  ;;  %v10251_v41 = vadd.f32 %v12940_v23, %v13401_v42 }
 0x52c   : > { %10166 = vmatmul.mubr.msk.f32.gmra.mrb[0].mxu1 %vm3918_vm3, %v13379_v29  ;;  %v7470_v29 = vld [vmem:[%s11012_s10 + $0x28] sm:$0xff] }
 0x52d   : > { %10168 = vmatprep.mubr.msk.f32.mxu1 %vm3918_vm3, %v13380_v55  ;;  %v13395_v55 = vld [vmem:[#allocation36_spill] sm:$0xff] }
 0x530   : > { %10169 = vmatmul.mubr.msk.f32.gmra.mrb[2].mxu1 %vm3918_vm3, %v13381_v47  ;;  %v7488_v47 = vld [vmem:[%s11012_s10 + $0xb8] sm:$0xff] }
 0x531   : > { %10171 = vmatprep.mubr.msk.f32.mxu1 %vm3918_vm3, %v13393_v24 }
 0x534   : > { %10172 = vmatmul.mubr.msk.f32.gmra.mrb[4].mxu1 %vm3918_vm3, %v13383_v7  ;;  %v7490_v7 = vld [vmem:[%s11012_s10 + $0xc8] sm:$0xff] }
 0x535   : > { %10174 = vmatprep.mubr.msk.f32.mxu1 %vm3918_vm3, %v13394_v38 }
 0x538   : > { %10175 = vmatmul.mubr.msk.f32.gmra.mrb[6].mxu1 %vm3918_vm3, %v12435_v28  ;;  %v7070_v28 = vld [vmem:[#allocation3 + $0x1a2] sm:$0xff] }
 0x539   : > { %10177 = vmatprep.mubr.msk.f32.mxu1 %vm3918_vm3, %v13385_v57  ;;  %v7493_v57 = vld [vmem:[%s11012_s10 + $0xe0] sm:$0xff] }
 0x53c   : > { %10178 = vmatmul.mubr.msk.f32.gmra.mrb[8].mxu1 %vm3918_vm3, %v12443_v2  ;;  %v7467_v2 = vld [vmem:[%s11012_s10 + $0x10] sm:$0xff] }
 0x53d   : > { %10180 = vmatprep.mubr.msk.f32.mxu1 %vm3918_vm3, %v13395_v55 }
 0x540   : > { %10181 = vmatmul.mubr.msk.f32.gmra.mrb[10].mxu1 %vm3918_vm3, %v12451_v63  ;;  %v7469_v63 = vld [vmem:[%s11012_s10 + $0x20] sm:$0xff] }
 0x541   : > { %10183 = vmatprep.mubr.msk.f32.mxu1 %vm3918_vm3, %v12689_v50  ;;  %v7489_v50 = vld [vmem:[%s11012_s10 + $0xc0] sm:$0xff] }
 0x544   : > { %10184 = vmatmul.mubr.msk.f32.gmra.mrb[12].mxu1 %vm3918_vm3, %v12693_v52  ;;  %v7491_v52 = vld [vmem:[%s11012_s10 + $0xd0] sm:$0xff] }
 0x545   : > { %10186 = vmatprep.mubr.msk.f32.mxu1 %vm3918_vm3, %v7069_v4 }
 0x548   : > { %10187 = vmatmul.mubr.msk.f32.gmra.mrb[14].mxu1 %vm3918_vm3, %v7070_v28 }
 0x549   : > { %10191 = vmatprep.mubr.msk.f32.mxu1 %vm279_vm1, %v7465_v40 }
 0x54c   : > { %10192 = vmatmul.mubr.msk.f32.vlgmr.msra.gmra.mrb[16].mxu1 %vm279_vm1, %v7466_v34 }
 0x54d   : > { %10194 = vmatprep.mubr.msk.f32.mxu1 %vm279_vm1, %v7467_v2  ;;  %v13402_v2 = vld [vmem:[#allocation41_spill] sm:$0xff] }
 0x550   : > { %10195 = vmatmul.mubr.msk.f32.gmra.mrb[18].mxu1 %vm279_vm1, %v7468_v53  ;;  %v10253_v53 = vadd.f32 %v13402_v2, %v12940_v23 }
 0x551   : > { %10197 = vmatprep.mubr.msk.f32.mxu1 %vm279_vm1, %v7469_v63 }
 0x554   : > { %10198 = vmatmul.mubr.msk.f32.gmra.mrb[20].mxu1 %vm279_vm1, %v7470_v29  ;;  %v13403_v29 = vld [vmem:[#allocation42_spill] sm:$0xff] }
 0x555   : > { %10200 = vmatprep.mubr.msk.f32.mxu1 %vm279_vm1, %v7471_v9  ;;  %v10255_v9 = vadd.f32 %v12940_v23, %v13403_v29 }
 0x558   : > { %10201 = vmatmul.mubr.msk.f32.gmra.mrb[22].mxu1 %vm279_vm1, %v7472_v35 }
 0x559   : > { %10203 = vmatprep.mubr.msk.f32.mxu1 %vm279_vm1, %v7473_v8 }
 0x55c   : > { %10204 = vmatmul.mubr.msk.f32.gmra.mrb[24].mxu1 %vm279_vm1, %v7474_v13 }
 0x55d   : > { %10206 = vmatprep.mubr.msk.f32.mxu1 %vm279_vm1, %v7475_v43 }
 0x560   : > { %10207 = vmatmul.mubr.msk.f32.gmra.mrb[26].mxu1 %vm279_vm1, %v7476_v51 }
 0x561   : > { %10209 = vmatprep.mubr.msk.f32.mxu1 %vm279_vm1, %v7477_v59 }
 0x564   : > { %10210 = vmatmul.mubr.msk.f32.gmra.mrb[28].mxu1 %vm279_vm1, %v7478_v17 }
 0x565   : > { %10212 = vmatprep.mubr.msk.f32.mxu1 %vm279_vm1, %v7479_v19  ;;  %v13404_v19 = vld [vmem:[#allocation43_spill] sm:$0xff] }
 0x568   : > { %10213 = vmatmul.mubr.msk.f32.gmra.mrb[30].mxu1 %vm279_vm1, %v7480_v22  ;;  %v10257_v22 = vadd.f32 %v13404_v19, %v12940_v23 }
 0x569   : > { %10215 = vmatprep.mubr.msk.f32.mxu1 %vm279_vm1, %v7481_v26 }
 0x56c   : > { %10216 = vmatmul.mubr.msk.f32.gmra.mrb[0].mxu1 %vm279_vm1, %v7482_v39  ;;  %v13405_v39 = vld [vmem:[#allocation44_spill] sm:$0xff] }
 0x56d   : > { %10218 = vmatprep.mubr.msk.f32.mxu1 %vm279_vm1, %v7483_v3  ;;  %v10259_v3 = vadd.f32 %v12940_v23, %v13405_v39 }
 0x570   : > { %10219 = vmatmul.mubr.msk.f32.gmra.mrb[2].mxu1 %vm279_vm1, %v7484_v5 }
 0x571   : > { %10221 = vmatprep.mubr.msk.f32.mxu1 %vm279_vm1, %v7485_v30 }
 0x574   : > { %10222 = vmatmul.mubr.msk.f32.gmra.mrb[4].mxu1 %vm279_vm1, %v7486_v11 }
 0x575   : > { %10224 = vmatprep.mubr.msk.f32.mxu1 %vm279_vm1, %v7487_v12 }
 0x578   : > { %10225 = vmatmul.mubr.msk.f32.gmra.mrb[6].mxu1 %vm279_vm1, %v7488_v47 }
 0x579   : > { %10227 = vmatprep.mubr.msk.f32.mxu1 %vm279_vm1, %v7489_v50 }
 0x57c   : > { %10228 = vmatmul.mubr.msk.f32.gmra.mrb[8].mxu1 %vm279_vm1, %v7490_v7 }
 0x57d   : > { %10230 = vmatprep.mubr.msk.f32.mxu1 %vm279_vm1, %v7491_v52  ;;  %v13406_v52 = vld [vmem:[#allocation45_spill] sm:$0xff] }
 0x580   : > { %10231 = vmatmul.mubr.msk.f32.gmra.mrb[10].mxu1 %vm279_vm1, %v7492_v49  ;;  %v10261_v49 = vadd.f32 %v13406_v52, %v12940_v23 }
 0x581   : > { %10233 = vmatprep.mubr.msk.f32.mxu1 %vm279_vm1, %v7493_v57 }
 0x584   : > { %10234 = vmatmul.mubr.msk.f32.gmra.mrb[12].mxu1 %vm279_vm1, %v7494_v10  ;;  %v13407_v10 = vld [vmem:[#allocation46_spill] sm:$0xff] }
 0x585   : > { %10236 = vmatprep.mubr.msk.f32.mxu1 %vm279_vm1, %v7495_v6  ;;  %v10263_v6 = vadd.f32 %v12940_v23, %v13407_v10 }
 0x588   : > { %10237 = vmatmul.mubr.msk.f32.gmra.mrb[14].mxu1 %vm279_vm1, %v7496_v33 }
 0x61f   : > { %v10193_v46 = vpop.f32.mrb[16].mxu1 }
 0x620   : > { %v10242_v56 = vadd.f32 %v10241_v44, %v10193_v46  ;;  %v7663_v60 = vpop.f32.mrb[17].mxu1 }
 0x621   : > { %v10244_v14 = vadd.f32 %v10243_v48, %v7663_v60  ;;  %v13408_v60 = vld [vmem:[#allocation47_spill] sm:$0xff] }
 0x622   : > { %v7862_v18 = vadd.f32 %v10242_v56, %v12949_v54 }
 0x623   : > { %v7861_v21 = vadd.f32 %v10244_v14, %v12949_v54  ;;  %v10196_v25 = vpop.f32.mrb[18].mxu1  ;;  %v10265_v14 = vadd.f32 %v13408_v60, %v12940_v23 }
 0x624   : > { %v7894_v27 = vmax.f32 %v7862_v18, 0.0  ;;  %v10246_v31 = vadd.f32 %v10245_v16, %v10196_v25  ;;  %v7673_v32 = vpop.f32.mrb[19].mxu1  ;;  %v13409_v16 = vld [vmem:[#allocation48_spill] sm:$0xff] }
 0x625   : > { %v7893_v58 = vmax.f32 %v7861_v21, 0.0  ;;  %v10248_v61 = vadd.f32 %v10247_v62, %v7673_v32  ;;  %v10267_v18 = vadd.f32 %v12940_v23, %v13409_v16 }
 0x626   : > { %7926 = vst.msk [vmem:[%s12961_s14 + $0x8] sm:$0xff] %vm3918_vm3, %v7894_v27  ;;  %v7864_v37 = vadd.f32 %v10246_v31, %v12949_v54 }
 0x627   : > { %7925 = vst.msk [vmem:[%s12961_s14] sm:$0xff] %vm3918_vm3, %v7893_v58  ;;  %v7863_v24 = vadd.f32 %v10248_v61, %v12949_v54  ;;  %v10199_v38 = vpop.f32.mrb[20].mxu1  ;;  %v13410_v58 = vld [vmem:[#allocation49_spill] sm:$0xff] }
 0x628   : > { %v7896_v55 = vmax.f32 %v7864_v37, 0.0  ;;  %v10250_v4 = vadd.f32 %v10249_v20, %v10199_v38  ;;  %v7683_v28 = vpop.f32.mrb[21].mxu1  ;;  %v10269_v61 = vadd.f32 %v13410_v58, %v12940_v23  ;;  %v13411_v20 = vld [vmem:[#allocation50_spill] sm:$0xff] }
 0x629   : > { %v7895_v40 = vmax.f32 %v7863_v24, 0.0  ;;  %v10252_v34 = vadd.f32 %v10251_v41, %v7683_v28  ;;  %v10271_v37 = vadd.f32 %v12940_v23, %v13411_v20 }
 0x62a   : > { %7928 = vst.msk [vmem:[%s12961_s14 + $0x18] sm:$0xff] %vm3918_vm3, %v7896_v55  ;;  %v7866_v63 = vadd.f32 %v10250_v4, %v12949_v54 }
 0x62b   : > { %7927 = vst.msk [vmem:[%s12961_s14 + $0x10] sm:$0xff] %vm3918_vm3, %v7895_v40  ;;  %v7865_v35 = vadd.f32 %v10252_v34, %v12949_v54  ;;  %v10202_v8 = vpop.f32.mrb[22].mxu1 }
 0x62c   : > { %v7898_v13 = vmax.f32 %v7866_v63, 0.0  ;;  %v10254_v43 = vadd.f32 %v10253_v53, %v10202_v8  ;;  %v7693_v51 = vpop.f32.mrb[23].mxu1 }
 0x62d   : > { %v7897_v59 = vmax.f32 %v7865_v35, 0.0  ;;  %v10256_v17 = vadd.f32 %v10255_v9, %v7693_v51 }
 0x62e   : > { %7930 = vst.msk [vmem:[%s12961_s14 + $0x28] sm:$0xff] %vm3918_vm3, %v7898_v13  ;;  %v7868_v26 = vadd.f32 %v10254_v43, %v12949_v54 }
 0x62f   : > { %7929 = vst.msk [vmem:[%s12961_s14 + $0x20] sm:$0xff] %vm3918_vm3, %v7897_v59  ;;  %v7867_v5 = vadd.f32 %v10256_v17, %v12949_v54  ;;  %v10205_v30 = vpop.f32.mrb[24].mxu1 }
 0x630   : > { %v7900_v11 = vmax.f32 %v7868_v26, 0.0  ;;  %v10258_v12 = vadd.f32 %v10257_v22, %v10205_v30  ;;  %v7703_v47 = vpop.f32.mrb[25].mxu1 }
 0x631   : > { %v7899_v50 = vmax.f32 %v7867_v5, 0.0  ;;  %v10260_v7 = vadd.f32 %v10259_v3, %v7703_v47 }
 0x632   : > { %7932 = vst.msk [vmem:[%s12961_s14 + $0x38] sm:$0xff] %vm3918_vm3, %v7900_v11  ;;  %v7870_v57 = vadd.f32 %v10258_v12, %v12949_v54 }
 0x633   : > { %7931 = vst.msk [vmem:[%s12961_s14 + $0x30] sm:$0xff] %vm3918_vm3, %v7899_v50  ;;  %v7869_v33 = vadd.f32 %v10260_v7, %v12949_v54  ;;  %v10208_v36 = vpop.f32.mrb[26].mxu1 }
 0x634   : > { %v7902_v44 = vmax.f32 %v7870_v57, 0.0  ;;  %v10262_v45 = vadd.f32 %v10261_v49, %v10208_v36  ;;  %v7713_v48 = vpop.f32.mrb[27].mxu1 }
 0x635   : > { %v7901_v46 = vmax.f32 %v7869_v33, 0.0  ;;  %v10264_v56 = vadd.f32 %v10263_v6, %v7713_v48 }
 0x636   : > { %7934 = vst.msk [vmem:[%s12961_s14 + $0x48] sm:$0xff] %vm3918_vm3, %v7902_v44  ;;  %v7872_v15 = vadd.f32 %v10262_v45, %v12949_v54 }
 0x637   : > { %7933 = vst.msk [vmem:[%s12961_s14 + $0x40] sm:$0xff] %vm3918_vm3, %v7901_v46  ;;  %v7871_v1 = vadd.f32 %v10264_v56, %v12949_v54  ;;  %v10211_v62 = vpop.f32.mrb[28].mxu1 }
 0x638   : > { %v7904_v21 = vmax.f32 %v7872_v15, 0.0  ;;  %v10266_v25 = vadd.f32 %v10265_v14, %v10211_v62  ;;  %v7723_v27 = vpop.f32.mrb[29].mxu1 }
 0x639   : > { %v7903_v31 = vmax.f32 %v7871_v1, 0.0  ;;  %v10268_v32 = vadd.f32 %v10267_v18, %v7723_v27 }
 0x63a   : > { %7936 = vst.msk [vmem:[%s12961_s14 + $0x58] sm:$0xff] %vm3918_vm3, %v7904_v21  ;;  %v7874_v0 = vadd.f32 %v10266_v25, %v12949_v54 }
 0x63b   : > { %7935 = vst.msk [vmem:[%s12961_s14 + $0x50] sm:$0xff] %vm3918_vm3, %v7903_v31  ;;  %v7873_v42 = vadd.f32 %v10268_v32, %v12949_v54  ;;  %v10214_v41 = vpop.f32.mrb[30].mxu1 }
 0x63c   : > { %v7906_v24 = vmax.f32 %v7874_v0, 0.0  ;;  %v10270_v38 = vadd.f32 %v10269_v61, %v10214_v41  ;;  %v7733_v55 = vpop.f32.mrb[31].mxu1 }
 0x63d   : > { %v7905_v4 = vmax.f32 %v7873_v42, 0.0  ;;  %v10272_v28 = vadd.f32 %v10271_v37, %v7733_v55 }
 0x63e   : > { %7938 = vst.msk [vmem:[%s12961_s14 + $0x68] sm:$0xff] %vm3918_vm3, %v7906_v24  ;;  %v7876_v40 = vadd.f32 %v10270_v38, %v12949_v54 }
 0x63f   : > { %7937 = vst.msk [vmem:[%s12961_s14 + $0x60] sm:$0xff] %vm3918_vm3, %v7905_v4  ;;  %v7875_v34 = vadd.f32 %v10272_v28, %v12949_v54  ;;  %v10217_v2 = vpop.f32.mrb[0].mxu1 }
 0x640   : > { %v7908_v53 = vmax.f32 %v7876_v40, 0.0  ;;  %v10273_v63 = vadd.f32 %v10217_v2, %v12940_v23  ;;  %v7743_v29 = vpop.f32.mrb[1].mxu1 }
 0x641   : > { %v7907_v9 = vmax.f32 %v7875_v34, 0.0  ;;  %v10274_v35 = vadd.f32 %v12940_v23, %v7743_v29 }
 0x642   : > { %7940 = vst.msk [vmem:[%s12961_s14 + $0x78] sm:$0xff] %vm3918_vm3, %v7908_v53  ;;  %v7878_v8 = vadd.f32 %v10273_v63, %v12949_v54 }
 0x643   : > { %7939 = vst.msk [vmem:[%s12961_s14 + $0x70] sm:$0xff] %vm3918_vm3, %v7907_v9  ;;  %v7877_v13 = vadd.f32 %v10274_v35, %v12949_v54  ;;  %v10220_v43 = vpop.f32.mrb[2].mxu1 }
 0x644   : > { %v7910_v51 = vmax.f32 %v7878_v8, 0.0  ;;  %v10275_v59 = vadd.f32 %v10220_v43, %v12940_v23  ;;  %v7753_v17 = vpop.f32.mrb[3].mxu1 }
 0x645   : > { %v7909_v19 = vmax.f32 %v7877_v13, 0.0  ;;  %v10276_v22 = vadd.f32 %v12940_v23, %v7753_v17 }
 0x646   : > { %7942 = vst.msk [vmem:[%s12961_s14 + $0x88] sm:$0xff] %vm3918_vm3, %v7910_v51  ;;  %v7880_v26 = vadd.f32 %v10275_v59, %v12949_v54 }
 0x647   : > { %7941 = vst.msk [vmem:[%s12961_s14 + $0x80] sm:$0xff] %vm3918_vm3, %v7909_v19  ;;  %v7879_v39 = vadd.f32 %v10276_v22, %v12949_v54  ;;  %v10223_v3 = vpop.f32.mrb[4].mxu1 }
 0x648   : > { %v7912_v5 = vmax.f32 %v7880_v26, 0.0  ;;  %v10277_v30 = vadd.f32 %v10223_v3, %v12940_v23  ;;  %v7763_v11 = vpop.f32.mrb[5].mxu1 }
 0x649   : > { %v7911_v12 = vmax.f32 %v7879_v39, 0.0  ;;  %v10278_v47 = vadd.f32 %v12940_v23, %v7763_v11 }
 0x64a   : > { %7944 = vst.msk [vmem:[%s12961_s14 + $0x98] sm:$0xff] %vm3918_vm3, %v7912_v5  ;;  %v7882_v50 = vadd.f32 %v10277_v30, %v12949_v54 }
 0x64b   : > { %7943 = vst.msk [vmem:[%s12961_s14 + $0x90] sm:$0xff] %vm3918_vm3, %v7911_v12  ;;  %v7881_v7 = vadd.f32 %v10278_v47, %v12949_v54  ;;  %v10226_v52 = vpop.f32.mrb[6].mxu1 }
 0x64c   : > { %v7914_v49 = vmax.f32 %v7882_v50, 0.0  ;;  %v10279_v57 = vadd.f32 %v10226_v52, %v12940_v23  ;;  %v7773_v10 = vpop.f32.mrb[7].mxu1 }
 0x64d   : > { %v7913_v6 = vmax.f32 %v7881_v7, 0.0  ;;  %v10280_v33 = vadd.f32 %v12940_v23, %v7773_v10 }
 0x64e   : > { %7946 = vst.msk [vmem:[%s12961_s14 + $0xa8] sm:$0xff] %vm3918_vm3, %v7914_v49  ;;  %v7884_v36 = vadd.f32 %v10279_v57, %v12949_v54 }
 0x64f   : > { %7945 = vst.msk [vmem:[%s12961_s14 + $0xa0] sm:$0xff] %vm3918_vm3, %v7913_v6  ;;  %v7883_v44 = vadd.f32 %v10280_v33, %v12949_v54  ;;  %v10229_v45 = vpop.f32.mrb[8].mxu1 }
 0x650   : > { %v7916_v48 = vmax.f32 %v7884_v36, 0.0  ;;  %v10281_v46 = vadd.f32 %v10229_v45, %v12940_v23  ;;  %v7783_v56 = vpop.f32.mrb[9].mxu1 }
 0x651   : > { %v7915_v60 = vmax.f32 %v7883_v44, 0.0  ;;  %v10282_v14 = vadd.f32 %v12940_v23, %v7783_v56 }
 0x652   : > { %7948 = vst.msk [vmem:[%s12961_s14 + $0xb8] sm:$0xff] %vm3918_vm3, %v7916_v48  ;;  %v7886_v15 = vadd.f32 %v10281_v46, %v12949_v54 }
 0x653   : > { %7947 = vst.msk [vmem:[%s12961_s14 + $0xb0] sm:$0xff] %vm3918_vm3, %v7915_v60  ;;  %v7885_v16 = vadd.f32 %v10282_v14, %v12949_v54  ;;  %v10232_v18 = vpop.f32.mrb[10].mxu1 }
 0x654   : > { %v7918_v1 = vmax.f32 %v7886_v15, 0.0  ;;  %v10283_v62 = vadd.f32 %v10232_v18, %v12940_v23  ;;  %v7793_v21 = vpop.f32.mrb[11].mxu1 }
 0x655   : > { %v7917_v25 = vmax.f32 %v7885_v16, 0.0  ;;  %v10284_v27 = vadd.f32 %v12940_v23, %v7793_v21 }
 0x656   : > { %7950 = vst.msk [vmem:[%s12961_s14 + $0xc8] sm:$0xff] %vm3918_vm3, %v7918_v1  ;;  %v7888_v31 = vadd.f32 %v10283_v62, %v12949_v54 }
 0x657   : > { %7949 = vst.msk [vmem:[%s12961_s14 + $0xc0] sm:$0xff] %vm3918_vm3, %v7917_v25  ;;  %v7887_v32 = vadd.f32 %v10284_v27, %v12949_v54  ;;  %v10235_v58 = vpop.f32.mrb[12].mxu1 }
 0x658   : > { %v7920_v61 = vmax.f32 %v7888_v31, 0.0  ;;  %v10285_v0 = vadd.f32 %v10235_v58, %v12940_v23  ;;  %v7803_v20 = vpop.f32.mrb[13].mxu1 }
 0x659   : > { %v7919_v37 = vmax.f32 %v7887_v32, 0.0  ;;  %v10286_v42 = vadd.f32 %v12940_v23, %v7803_v20 }
 0x65a   : > { %7952 = vst.msk [vmem:[%s12961_s14 + $0xd8] sm:$0xff] %vm3918_vm3, %v7920_v61  ;;  %v7890_v41 = vadd.f32 %v10285_v0, %v12949_v54 }
 0x65b   : > { %7951 = vst.msk [vmem:[%s12961_s14 + $0xd0] sm:$0xff] %vm3918_vm3, %v7919_v37  ;;  %v7889_v24 = vadd.f32 %v10286_v42, %v12949_v54  ;;  %v10238_v38 = vpop.f32.mrb[14].mxu1 }
 0x65c   : > { %v7922_v55 = vmax.f32 %v7890_v41, 0.0  ;;  %v10287_v4 = vadd.f32 %v10238_v38, %v12940_v23  ;;  %v7813_v28 = vpop.f32.mrb[15].mxu1 }
 0x65d   : > { %v7921_v40 = vmax.f32 %v7889_v24, 0.0  ;;  %v10288_v34 = vadd.f32 %v12940_v23, %v7813_v28 }
 0x65e   : > { %7954 = vst.msk [vmem:[%s12961_s14 + $0xe8] sm:$0xff] %vm3918_vm3, %v7922_v55  ;;  %v7892_v2 = vadd.f32 %v10287_v4, %v12949_v54 }
 0x65f   : > { %7953 = vst.msk [vmem:[%s12961_s14 + $0xe0] sm:$0xff] %vm3918_vm3, %v7921_v40  ;;  %v7891_v53 = vadd.f32 %v10288_v34, %v12949_v54 }
 0x660   : > { %v7924_v63 = vmax.f32 %v7892_v2, 0.0 }
 0x661   : > { %v7923_v29 = vmax.f32 %v7891_v53, 0.0 }
 0x662   : > { %7956 = vst.msk [vmem:[%s12961_s14 + $0xf8] sm:$0xff] %vm3918_vm3, %v7924_v63 }
 0x663   : > { %7955 = vst.msk [vmem:[%s12961_s14 + $0xf0] sm:$0xff] %vm3918_vm3, %v7923_v29 }
 0x664 PF: > { %s17_s24 = sadd.s32 1, %s10832_s24  }
 0x665   : > { %p14_p4 = scmp.ge.s32.totalorder %s17_s24, 4  }
 0x667   :  { %16 = sbr.rel (!%p14_p4) target bundleno = 1 (0x1), region = 98 }

</bundles_post_ra>
